<compile_context>
chip_gen: v7x
topology: tpu7x:2x2x1
jax: 0.10.0
libtpu: 0.0.40
codegen_flags: <defaults>
</compile_context>

<pallas_src>
import functools

import jax
import jax.numpy as jnp
from jax.experimental import pallas as pl
from jax.experimental.pallas import tpu as pltpu

MAX_ITER = 3  # matches LBPSemanticDependency(max_iter=3)


def _lbp_kernel(pe_ref, mt_ref, s_sib_ref, s_cop_ref, s_grd_ref, out_ref,
                p_sib_scr, p_cop_scr, p_grd_scr, *, max_iter, block_i):
    TI = block_i
    S = pe_ref.shape[2]
    f32 = jnp.float32

    # ---- prologue: re-layout raw scores s_X[b, j, i, l] -> p_X[i, j, l] ----
    # (loop-invariant, done once per grid step; only static slices/stores)
    def restack(src_ref, dst_ref):
        raw = src_ref[0].astype(f32)          # [S(j), TI(i), S(l)]
        for ii in range(TI):                  # TI is small (multiple of 8)
            dst_ref[ii] = raw[:, ii, :]

    restack(s_sib_ref, p_sib_scr)
    restack(s_cop_ref, p_cop_scr)
    restack(s_grd_ref, p_grd_scr)

    pe = pe_ref[0].astype(f32)                # [TI, S]   pe[i, j] = s_edge[b, j, i]
    mt = mt_ref[0].astype(f32)                # [TI, S]   mt[i, l] = mask[b, l, i]

    # ---- second-order mask, built in-kernel (no S^3 HBM mask tensor) -------
    # mask2o[i, j, l] = mask[b,l,i] * mask[b,j,i] * (l != i) * (l != j)
    i0 = pl.program_id(1) * TI
    iota_i = jax.lax.broadcasted_iota(jnp.int32, (TI, S), 0) + i0     # global i
    iota_l2 = jax.lax.broadcasted_iota(jnp.int32, (TI, S), 1)         # l
    li_ne = (iota_i != iota_l2).astype(f32)                           # [TI, S]
    iota_j = jax.lax.broadcasted_iota(jnp.int32, (S, S), 0)           # j
    iota_l = jax.lax.broadcasted_iota(jnp.int32, (S, S), 1)           # l
    jl_ne = (iota_j != iota_l).astype(f32)                            # [S, S]
    w = (mt * li_ne)[:, None, :] * mt[:, :, None] * jl_ne[None, :, :]  # [TI,S,S]

    def softplus(x):  # numerically stable: 1 exp + 1 log1p on the EUP
        return jnp.maximum(x, 0.0) + jnp.log1p(jnp.exp(-jnp.abs(x)))

    # ---- LBP iterations in log-odds "delta" form ----------------------------
    # d_X[i, j, l] = m_X[1] - m_X[0],   db[i, j] = b[1] - b[0]
    zero3 = jnp.zeros((TI, S, S), f32)
    zero2 = jnp.zeros((TI, S), f32)

    def step(_, carry):
        d_sib, d_cop, d_grd, db = carry

        def upd(d_old, p_ref):
            delta = db[:, :, None] - d_old                    # [TI, j, l]
            p = p_ref[...]
            g = softplus(delta + p) - softplus(delta)         # new (t1 - t0)
            return jnp.transpose(g, (0, 2, 1))                # torch .transpose(2, 3)

        d_sib = upd(d_sib, p_sib_scr)
        d_cop = upd(d_cop, p_cop_scr)
        d_grd = upd(d_grd, p_grd_scr)
        db = pe + jnp.sum((d_sib + d_cop + d_grd) * w, axis=2)
        return d_sib, d_cop, d_grd, db

    _, _, _, db = jax.lax.fori_loop(0, max_iter, step,
                                    (zero3, zero3, zero3, zero2),
                                    unroll=True)

    # marginals = exp(log_softmax(b, labels)) == sigmoid(+/- db), stably.
    e = jnp.exp(-jnp.abs(db))
    p_hi = 1.0 / (1.0 + e)                                    # sigmoid(|db|)
    p_lo = e / (1.0 + e)                                      # sigmoid(-|db|)
    q1 = jnp.where(db >= 0, p_hi, p_lo)
    q0 = jnp.where(db >= 0, p_lo, p_hi)
    out_ref[0, 0] = q0
    out_ref[0, 1] = q1


def lbp_semantic_dependency(s_edge, s_sib, s_cop, s_grd, mask,
                            max_iter=MAX_ITER, block_i=None):
    """Forward pass of LBPSemanticDependency with target=None.

    Args:
      s_edge: [B, S, S] float
      s_sib, s_cop, s_grd: [B, S, S, S] float
      mask:   [B, S, S] bool
    Returns:
      marginals: [B, S, S, 2] float (same convention as the torch module).
    """
    B, S, _ = s_edge.shape
    f32 = jnp.float32

    if block_i is None:
        block_i = 8 if S % 8 == 0 else S      # keep blocks (8,128)-legal
    assert S % block_i == 0
    TI = block_i

    # Small (S^2-sized) glue only; the S^3 tensors stay in raw layout in HBM.
    pe_t = jnp.transpose(s_edge, (0, 2, 1)).astype(f32)       # pe_t[b,i,j] = s_edge[b,j,i]
    mt_t = jnp.transpose(mask, (0, 2, 1)).astype(f32)         # mt_t[b,i,l] = mask[b,l,i]
    s_sib = s_sib.astype(f32)                                  # no-op if already f32
    s_cop = s_cop.astype(f32)
    s_grd = s_grd.astype(f32)
    # TODO(synk): for bf16 pipelines, pass the S^3 scores as bf16 and rely on
    # the in-kernel .astype(f32) upcast to halve HBM traffic.

    spec_small = pl.BlockSpec((1, TI, S), lambda b, i: (b, i, 0))
    spec_big = pl.BlockSpec((1, S, TI, S), lambda b, i: (b, 0, i, 0))

    out = pl.pallas_call(
        functools.partial(_lbp_kernel, max_iter=max_iter, block_i=TI),
        out_shape=jax.ShapeDtypeStruct((B, 2, S, S), f32),
        grid_spec=pltpu.PrefetchScalarGridSpec(
            num_scalar_prefetch=0,
            grid=(B, S // TI),
            in_specs=[spec_small, spec_small, spec_big, spec_big, spec_big],
            out_specs=pl.BlockSpec((1, 2, TI, S), lambda b, i: (b, 0, i, 0)),
            scratch_shapes=[pltpu.VMEM((TI, S, S), f32),
                            pltpu.VMEM((TI, S, S), f32),
                            pltpu.VMEM((TI, S, S), f32)],
        ),
        compiler_params=pltpu.CompilerParams(
            dimension_semantics=("parallel", "parallel"),
            vmem_limit_bytes=48 * 1024 * 1024),
    )(pe_t, mt_t, s_sib, s_cop, s_grd)

    # out[b, t, i, j] -> marginals[b, j, i, t]   (torch convention)
    return jnp.transpose(out, (0, 3, 2, 1)).astype(s_edge.dtype)
    # TODO(synk): the `target is not None` loss branch (gather + masked mean)
    # is trivial JAX glue and is omitted since target defaults to None.


# ---------------------------------------------------------------------------
# pure-JAX reference mirroring the torch code 1:1 (for correctness check)
# ---------------------------------------------------------------------------
def _reference_marginals(s_edge, s_sib, s_cop, s_grd, mask, max_iter=MAX_ITER):
    B, S, _ = mask.shape
    f32 = jnp.float32
    idx = jnp.arange(S)
    hs = jnp.minimum(idx[:, None], idx[None, :])
    ms = jnp.maximum(idx[:, None], idx[None, :])

    mask_p = jnp.transpose(mask, (2, 1, 0))                           # [S, S, B]
    mask2o = mask_p[:, None, :, :] & mask_p[:, :, None, :]            # [S, S, S, B]
    mask2o = mask2o & (hs[:, :, None] != idx[None, None, :])[..., None]
    mask2o = mask2o & (ms[:, :, None] != idx[None, None, :])[..., None]
    mask2o = mask2o.astype(f32)

    p_edge = jnp.transpose(
        jnp.stack([jnp.zeros_like(s_edge), s_edge]).astype(f32), (0, 3, 2, 1))
    p_sib = jnp.transpose(s_sib, (2, 1, 3, 0)).astype(f32)
    p_cop = jnp.transpose(s_cop, (2, 1, 3, 0)).astype(f32)
    p_grd = jnp.transpose(s_grd, (2, 1, 3, 0)).astype(f32)

    b = jnp.zeros((2, S, S, B), f32)
    m_sib = jnp.zeros((2, S, S, S, B), f32)
    m_cop = jnp.zeros((2, S, S, S, B), f32)
    m_grd = jnp.zeros((2, S, S, S, B), f32)

    def lsm0(x):
        return x - jax.scipy.special.logsumexp(x, axis=0, keepdims=True)

    for _ in range(max_iter):
        b = lsm0(b)

        def upd(mX, pX):
            m = b[:, :, :, None, :] - mX
            t0 = jnp.logaddexp(m[0], m[1])
            t1 = jnp.logaddexp(m[0], m[1] + pX)
            new = jnp.stack([t0, t1])
            new = jnp.swapaxes(new, 2, 3)
            return lsm0(new)

        m_sib = upd(m_sib, p_sib)
        m_cop = upd(m_cop, p_cop)
        m_grd = upd(m_grd, p_grd)
        b = p_edge + ((m_sib + m_cop + m_grd) * mask2o).sum(3)

    logQ = jnp.transpose(b, (3, 2, 1, 0))
    logQ = logQ - jax.scipy.special.logsumexp(logQ, axis=-1, keepdims=True)
    return jnp.exp(logQ)


if __name__ == "__main__":
    B, S = 2, 8
    key = jax.random.PRNGKey(0)
    k1, k2, k3, k4 = jax.random.split(key, 4)
    s_edge = jax.random.normal(k1, (B, S, S), jnp.float32)
    s_sib = jax.random.normal(k2, (B, S, S, S), jnp.float32)
    s_cop = jax.random.normal(k3, (B, S, S, S), jnp.float32)
    s_grd = jax.random.normal(k4, (B, S, S, S), jnp.float32)

    lengths = jnp.array([S, S - 2])
    tok = jnp.arange(S)[None, :] < lengths[:, None]                   # [B, S]
    mask = tok[:, :, None] & tok[:, None, :]                          # [B, S, S] bool

    marginals = jax.jit(lbp_semantic_dependency)(s_edge, s_sib, s_cop, s_grd, mask)
    marginals = jax.block_until_ready(marginals)

    ref = _reference_marginals(s_edge, s_sib, s_cop, s_grd, mask)
    ref = jax.block_until_ready(ref)

    assert marginals.shape == (B, S, S, 2), marginals.shape
    max_err = float(jnp.max(jnp.abs(marginals - ref)))
    assert max_err < 2e-4, f"mismatch vs reference: {max_err}"

    print("KERNEL_OK")
</pallas_src>

<mosaic_0001>
module attributes {stable_mosaic.version = 11 : i64} {
  func.func @_lbp_kernel(%arg0: i32, %arg1: i32, %arg2: memref<1x8x8xf32, #tpu.memory_space<vmem>>, %arg3: memref<1x8x8xf32, #tpu.memory_space<vmem>>, %arg4: memref<1x8x8x8xf32, #tpu.memory_space<vmem>>, %arg5: memref<1x8x8x8xf32, #tpu.memory_space<vmem>>, %arg6: memref<1x8x8x8xf32, #tpu.memory_space<vmem>>, %arg7: memref<1x2x8x8xf32, #tpu.memory_space<vmem>>, %arg8: memref<8x8x8xf32, #tpu.memory_space<vmem>>, %arg9: memref<8x8x8xf32, #tpu.memory_space<vmem>>, %arg10: memref<8x8x8xf32, #tpu.memory_space<vmem>>) attributes {dimension_semantics = [#tpu.dimension_semantics<parallel>, #tpu.dimension_semantics<parallel>], iteration_bounds = array<i64: 2, 1>, scalar_prefetch = 0 : i64, scratch_operands = 3 : i64, tpu.core_type = #tpu.core_type<tc>, window_params = [{transform_indices = @transform_0, window_bounds = array<i64: 1, 8, 8>}, {transform_indices = @transform_1, window_bounds = array<i64: 1, 8, 8>}, {transform_indices = @transform_2, window_bounds = array<i64: 1, 8, 8, 8>}, {transform_indices = @transform_3, window_bounds = array<i64: 1, 8, 8, 8>}, {transform_indices = @transform_4, window_bounds = array<i64: 1, 8, 8, 8>}, {transform_indices = @transform_5, window_bounds = array<i64: 1, 2, 8, 8>}]} {
    %c0 = arith.constant 0 : index
    %c0_0 = arith.constant 0 : index
    %c0_1 = arith.constant 0 : index
    %c0_2 = arith.constant 0 : index
    %0 = vector.load %arg4[%c0, %c0_0, %c0_1, %c0_2] : memref<1x8x8x8xf32, #tpu.memory_space<vmem>>, vector<1x8x8x8xf32>
    %1 = vector.shape_cast %0 : vector<1x8x8x8xf32> to vector<8x8x8xf32>
    %2 = vector.extract_strided_slice %1 {offsets = [0, 0, 0], sizes = [8, 1, 8], strides = [1, 1, 1]} : vector<8x8x8xf32> to vector<8x1x8xf32>
    %3 = vector.shape_cast %2 : vector<8x1x8xf32> to vector<8x8xf32>
    %c0_3 = arith.constant 0 : index
    %c0_4 = arith.constant 0 : index
    %c0_5 = arith.constant 0 : index
    %4 = vector.load %arg8[%c0_3, %c0_4, %c0_5] : memref<8x8x8xf32, #tpu.memory_space<vmem>>, vector<1x8x8xf32>
    %5 = vector.shape_cast %4 : vector<1x8x8xf32> to vector<8x8xf32>
    %6 = vector.shape_cast %3 : vector<8x8xf32> to vector<1x8x8xf32>
    tpu.vector_store %arg8[%c0_3, %c0_4, %c0_5], %6 {strides = array<i32>} : memref<8x8x8xf32, #tpu.memory_space<vmem>>, vector<1x8x8xf32>,
    %7 = vector.extract_strided_slice %1 {offsets = [0, 1, 0], sizes = [8, 1, 8], strides = [1, 1, 1]} : vector<8x8x8xf32> to vector<8x1x8xf32>
    %8 = vector.shape_cast %7 : vector<8x1x8xf32> to vector<8x8xf32>
    %c1 = arith.constant 1 : index
    %c0_6 = arith.constant 0 : index
    %c0_7 = arith.constant 0 : index
    %9 = vector.load %arg8[%c1, %c0_6, %c0_7] : memref<8x8x8xf32, #tpu.memory_space<vmem>>, vector<1x8x8xf32>
    %10 = vector.shape_cast %9 : vector<1x8x8xf32> to vector<8x8xf32>
    %11 = vector.shape_cast %8 : vector<8x8xf32> to vector<1x8x8xf32>
    tpu.vector_store %arg8[%c1, %c0_6, %c0_7], %11 {strides = array<i32>} : memref<8x8x8xf32, #tpu.memory_space<vmem>>, vector<1x8x8xf32>,
    %12 = vector.extract_strided_slice %1 {offsets = [0, 2, 0], sizes = [8, 1, 8], strides = [1, 1, 1]} : vector<8x8x8xf32> to vector<8x1x8xf32>
    %13 = vector.shape_cast %12 : vector<8x1x8xf32> to vector<8x8xf32>
    %c2 = arith.constant 2 : index
    %c0_8 = arith.constant 0 : index
    %c0_9 = arith.constant 0 : index
    %14 = vector.load %arg8[%c2, %c0_8, %c0_9] : memref<8x8x8xf32, #tpu.memory_space<vmem>>, vector<1x8x8xf32>
    %15 = vector.shape_cast %14 : vector<1x8x8xf32> to vector<8x8xf32>
    %16 = vector.shape_cast %13 : vector<8x8xf32> to vector<1x8x8xf32>
    tpu.vector_store %arg8[%c2, %c0_8, %c0_9], %16 {strides = array<i32>} : memref<8x8x8xf32, #tpu.memory_space<vmem>>, vector<1x8x8xf32>,
    %17 = vector.extract_strided_slice %1 {offsets = [0, 3, 0], sizes = [8, 1, 8], strides = [1, 1, 1]} : vector<8x8x8xf32> to vector<8x1x8xf32>
    %18 = vector.shape_cast %17 : vector<8x1x8xf32> to vector<8x8xf32>
    %c3 = arith.constant 3 : index
    %c0_10 = arith.constant 0 : index
    %c0_11 = arith.constant 0 : index
    %19 = vector.load %arg8[%c3, %c0_10, %c0_11] : memref<8x8x8xf32, #tpu.memory_space<vmem>>, vector<1x8x8xf32>
    %20 = vector.shape_cast %19 : vector<1x8x8xf32> to vector<8x8xf32>
    %21 = vector.shape_cast %18 : vector<8x8xf32> to vector<1x8x8xf32>
    tpu.vector_store %arg8[%c3, %c0_10, %c0_11], %21 {strides = array<i32>} : memref<8x8x8xf32, #tpu.memory_space<vmem>>, vector<1x8x8xf32>,
    %22 = vector.extract_strided_slice %1 {offsets = [0, 4, 0], sizes = [8, 1, 8], strides = [1, 1, 1]} : vector<8x8x8xf32> to vector<8x1x8xf32>
    %23 = vector.shape_cast %22 : vector<8x1x8xf32> to vector<8x8xf32>
    %c4 = arith.constant 4 : index
    %c0_12 = arith.constant 0 : index
    %c0_13 = arith.constant 0 : index
    %24 = vector.load %arg8[%c4, %c0_12, %c0_13] : memref<8x8x8xf32, #tpu.memory_space<vmem>>, vector<1x8x8xf32>
    %25 = vector.shape_cast %24 : vector<1x8x8xf32> to vector<8x8xf32>
    %26 = vector.shape_cast %23 : vector<8x8xf32> to vector<1x8x8xf32>
    tpu.vector_store %arg8[%c4, %c0_12, %c0_13], %26 {strides = array<i32>} : memref<8x8x8xf32, #tpu.memory_space<vmem>>, vector<1x8x8xf32>,
    %27 = vector.extract_strided_slice %1 {offsets = [0, 5, 0], sizes = [8, 1, 8], strides = [1, 1, 1]} : vector<8x8x8xf32> to vector<8x1x8xf32>
    %28 = vector.shape_cast %27 : vector<8x1x8xf32> to vector<8x8xf32>
    %c5 = arith.constant 5 : index
    %c0_14 = arith.constant 0 : index
    %c0_15 = arith.constant 0 : index
    %29 = vector.load %arg8[%c5, %c0_14, %c0_15] : memref<8x8x8xf32, #tpu.memory_space<vmem>>, vector<1x8x8xf32>
    %30 = vector.shape_cast %29 : vector<1x8x8xf32> to vector<8x8xf32>
    %31 = vector.shape_cast %28 : vector<8x8xf32> to vector<1x8x8xf32>
    tpu.vector_store %arg8[%c5, %c0_14, %c0_15], %31 {strides = array<i32>} : memref<8x8x8xf32, #tpu.memory_space<vmem>>, vector<1x8x8xf32>,
    %32 = vector.extract_strided_slice %1 {offsets = [0, 6, 0], sizes = [8, 1, 8], strides = [1, 1, 1]} : vector<8x8x8xf32> to vector<8x1x8xf32>
    %33 = vector.shape_cast %32 : vector<8x1x8xf32> to vector<8x8xf32>
    %c6 = arith.constant 6 : index
    %c0_16 = arith.constant 0 : index
    %c0_17 = arith.constant 0 : index
    %34 = vector.load %arg8[%c6, %c0_16, %c0_17] : memref<8x8x8xf32, #tpu.memory_space<vmem>>, vector<1x8x8xf32>
    %35 = vector.shape_cast %34 : vector<1x8x8xf32> to vector<8x8xf32>
    %36 = vector.shape_cast %33 : vector<8x8xf32> to vector<1x8x8xf32>
    tpu.vector_store %arg8[%c6, %c0_16, %c0_17], %36 {strides = array<i32>} : memref<8x8x8xf32, #tpu.memory_space<vmem>>, vector<1x8x8xf32>,
    %37 = vector.extract_strided_slice %1 {offsets = [0, 7, 0], sizes = [8, 1, 8], strides = [1, 1, 1]} : vector<8x8x8xf32> to vector<8x1x8xf32>
    %38 = vector.shape_cast %37 : vector<8x1x8xf32> to vector<8x8xf32>
    %c7 = arith.constant 7 : index
    %c0_18 = arith.constant 0 : index
    %c0_19 = arith.constant 0 : index
    %39 = vector.load %arg8[%c7, %c0_18, %c0_19] : memref<8x8x8xf32, #tpu.memory_space<vmem>>, vector<1x8x8xf32>
    %40 = vector.shape_cast %39 : vector<1x8x8xf32> to vector<8x8xf32>
    %41 = vector.shape_cast %38 : vector<8x8xf32> to vector<1x8x8xf32>
    tpu.vector_store %arg8[%c7, %c0_18, %c0_19], %41 {strides = array<i32>} : memref<8x8x8xf32, #tpu.memory_space<vmem>>, vector<1x8x8xf32>,
    %c0_20 = arith.constant 0 : index
    %c0_21 = arith.constant 0 : index
    %c0_22 = arith.constant 0 : index
    %c0_23 = arith.constant 0 : index
    %42 = vector.load %arg5[%c0_20, %c0_21, %c0_22, %c0_23] : memref<1x8x8x8xf32, #tpu.memory_space<vmem>>, vector<1x8x8x8xf32>
    %43 = vector.shape_cast %42 : vector<1x8x8x8xf32> to vector<8x8x8xf32>
    %44 = vector.extract_strided_slice %43 {offsets = [0, 0, 0], sizes = [8, 1, 8], strides = [1, 1, 1]} : vector<8x8x8xf32> to vector<8x1x8xf32>
    %45 = vector.shape_cast %44 : vector<8x1x8xf32> to vector<8x8xf32>
    %c0_24 = arith.constant 0 : index
    %c0_25 = arith.constant 0 : index
    %c0_26 = arith.constant 0 : index
    %46 = vector.load %arg9[%c0_24, %c0_25, %c0_26] : memref<8x8x8xf32, #tpu.memory_space<vmem>>, vector<1x8x8xf32>
    %47 = vector.shape_cast %46 : vector<1x8x8xf32> to vector<8x8xf32>
    %48 = vector.shape_cast %45 : vector<8x8xf32> to vector<1x8x8xf32>
    tpu.vector_store %arg9[%c0_24, %c0_25, %c0_26], %48 {strides = array<i32>} : memref<8x8x8xf32, #tpu.memory_space<vmem>>, vector<1x8x8xf32>,
    %49 = vector.extract_strided_slice %43 {offsets = [0, 1, 0], sizes = [8, 1, 8], strides = [1, 1, 1]} : vector<8x8x8xf32> to vector<8x1x8xf32>
    %50 = vector.shape_cast %49 : vector<8x1x8xf32> to vector<8x8xf32>
    %c1_27 = arith.constant 1 : index
    %c0_28 = arith.constant 0 : index
    %c0_29 = arith.constant 0 : index
    %51 = vector.load %arg9[%c1_27, %c0_28, %c0_29] : memref<8x8x8xf32, #tpu.memory_space<vmem>>, vector<1x8x8xf32>
    %52 = vector.shape_cast %51 : vector<1x8x8xf32> to vector<8x8xf32>
    %53 = vector.shape_cast %50 : vector<8x8xf32> to vector<1x8x8xf32>
    tpu.vector_store %arg9[%c1_27, %c0_28, %c0_29], %53 {strides = array<i32>} : memref<8x8x8xf32, #tpu.memory_space<vmem>>, vector<1x8x8xf32>,
    %54 = vector.extract_strided_slice %43 {offsets = [0, 2, 0], sizes = [8, 1, 8], strides = [1, 1, 1]} : vector<8x8x8xf32> to vector<8x1x8xf32>
    %55 = vector.shape_cast %54 : vector<8x1x8xf32> to vector<8x8xf32>
    %c2_30 = arith.constant 2 : index
    %c0_31 = arith.constant 0 : index
    %c0_32 = arith.constant 0 : index
    %56 = vector.load %arg9[%c2_30, %c0_31, %c0_32] : memref<8x8x8xf32, #tpu.memory_space<vmem>>, vector<1x8x8xf32>
    %57 = vector.shape_cast %56 : vector<1x8x8xf32> to vector<8x8xf32>
    %58 = vector.shape_cast %55 : vector<8x8xf32> to vector<1x8x8xf32>
    tpu.vector_store %arg9[%c2_30, %c0_31, %c0_32], %58 {strides = array<i32>} : memref<8x8x8xf32, #tpu.memory_space<vmem>>, vector<1x8x8xf32>,
    %59 = vector.extract_strided_slice %43 {offsets = [0, 3, 0], sizes = [8, 1, 8], strides = [1, 1, 1]} : vector<8x8x8xf32> to vector<8x1x8xf32>
    %60 = vector.shape_cast %59 : vector<8x1x8xf32> to vector<8x8xf32>
    %c3_33 = arith.constant 3 : index
    %c0_34 = arith.constant 0 : index
    %c0_35 = arith.constant 0 : index
    %61 = vector.load %arg9[%c3_33, %c0_34, %c0_35] : memref<8x8x8xf32, #tpu.memory_space<vmem>>, vector<1x8x8xf32>
    %62 = vector.shape_cast %61 : vector<1x8x8xf32> to vector<8x8xf32>
    %63 = vector.shape_cast %60 : vector<8x8xf32> to vector<1x8x8xf32>
    tpu.vector_store %arg9[%c3_33, %c0_34, %c0_35], %63 {strides = array<i32>} : memref<8x8x8xf32, #tpu.memory_space<vmem>>, vector<1x8x8xf32>,
    %64 = vector.extract_strided_slice %43 {offsets = [0, 4, 0], sizes = [8, 1, 8], strides = [1, 1, 1]} : vector<8x8x8xf32> to vector<8x1x8xf32>
    %65 = vector.shape_cast %64 : vector<8x1x8xf32> to vector<8x8xf32>
    %c4_36 = arith.constant 4 : index
    %c0_37 = arith.constant 0 : index
    %c0_38 = arith.constant 0 : index
    %66 = vector.load %arg9[%c4_36, %c0_37, %c0_38] : memref<8x8x8xf32, #tpu.memory_space<vmem>>, vector<1x8x8xf32>
    %67 = vector.shape_cast %66 : vector<1x8x8xf32> to vector<8x8xf32>
    %68 = vector.shape_cast %65 : vector<8x8xf32> to vector<1x8x8xf32>
    tpu.vector_store %arg9[%c4_36, %c0_37, %c0_38], %68 {strides = array<i32>} : memref<8x8x8xf32, #tpu.memory_space<vmem>>, vector<1x8x8xf32>,
    %69 = vector.extract_strided_slice %43 {offsets = [0, 5, 0], sizes = [8, 1, 8], strides = [1, 1, 1]} : vector<8x8x8xf32> to vector<8x1x8xf32>
    %70 = vector.shape_cast %69 : vector<8x1x8xf32> to vector<8x8xf32>
    %c5_39 = arith.constant 5 : index
    %c0_40 = arith.constant 0 : index
    %c0_41 = arith.constant 0 : index
    %71 = vector.load %arg9[%c5_39, %c0_40, %c0_41] : memref<8x8x8xf32, #tpu.memory_space<vmem>>, vector<1x8x8xf32>
    %72 = vector.shape_cast %71 : vector<1x8x8xf32> to vector<8x8xf32>
    %73 = vector.shape_cast %70 : vector<8x8xf32> to vector<1x8x8xf32>
    tpu.vector_store %arg9[%c5_39, %c0_40, %c0_41], %73 {strides = array<i32>} : memref<8x8x8xf32, #tpu.memory_space<vmem>>, vector<1x8x8xf32>,
    %74 = vector.extract_strided_slice %43 {offsets = [0, 6, 0], sizes = [8, 1, 8], strides = [1, 1, 1]} : vector<8x8x8xf32> to vector<8x1x8xf32>
    %75 = vector.shape_cast %74 : vector<8x1x8xf32> to vector<8x8xf32>
    %c6_42 = arith.constant 6 : index
    %c0_43 = arith.constant 0 : index
    %c0_44 = arith.constant 0 : index
    %76 = vector.load %arg9[%c6_42, %c0_43, %c0_44] : memref<8x8x8xf32, #tpu.memory_space<vmem>>, vector<1x8x8xf32>
    %77 = vector.shape_cast %76 : vector<1x8x8xf32> to vector<8x8xf32>
    %78 = vector.shape_cast %75 : vector<8x8xf32> to vector<1x8x8xf32>
    tpu.vector_store %arg9[%c6_42, %c0_43, %c0_44], %78 {strides = array<i32>} : memref<8x8x8xf32, #tpu.memory_space<vmem>>, vector<1x8x8xf32>,
    %79 = vector.extract_strided_slice %43 {offsets = [0, 7, 0], sizes = [8, 1, 8], strides = [1, 1, 1]} : vector<8x8x8xf32> to vector<8x1x8xf32>
    %80 = vector.shape_cast %79 : vector<8x1x8xf32> to vector<8x8xf32>
    %c7_45 = arith.constant 7 : index
    %c0_46 = arith.constant 0 : index
    %c0_47 = arith.constant 0 : index
    %81 = vector.load %arg9[%c7_45, %c0_46, %c0_47] : memref<8x8x8xf32, #tpu.memory_space<vmem>>, vector<1x8x8xf32>
    %82 = vector.shape_cast %81 : vector<1x8x8xf32> to vector<8x8xf32>
    %83 = vector.shape_cast %80 : vector<8x8xf32> to vector<1x8x8xf32>
    tpu.vector_store %arg9[%c7_45, %c0_46, %c0_47], %83 {strides = array<i32>} : memref<8x8x8xf32, #tpu.memory_space<vmem>>, vector<1x8x8xf32>,
    %c0_48 = arith.constant 0 : index
    %c0_49 = arith.constant 0 : index
    %c0_50 = arith.constant 0 : index
    %c0_51 = arith.constant 0 : index
    %84 = vector.load %arg6[%c0_48, %c0_49, %c0_50, %c0_51] : memref<1x8x8x8xf32, #tpu.memory_space<vmem>>, vector<1x8x8x8xf32>
    %85 = vector.shape_cast %84 : vector<1x8x8x8xf32> to vector<8x8x8xf32>
    %86 = vector.extract_strided_slice %85 {offsets = [0, 0, 0], sizes = [8, 1, 8], strides = [1, 1, 1]} : vector<8x8x8xf32> to vector<8x1x8xf32>
    %87 = vector.shape_cast %86 : vector<8x1x8xf32> to vector<8x8xf32>
    %c0_52 = arith.constant 0 : index
    %c0_53 = arith.constant 0 : index
    %c0_54 = arith.constant 0 : index
    %88 = vector.load %arg10[%c0_52, %c0_53, %c0_54] : memref<8x8x8xf32, #tpu.memory_space<vmem>>, vector<1x8x8xf32>
    %89 = vector.shape_cast %88 : vector<1x8x8xf32> to vector<8x8xf32>
    %90 = vector.shape_cast %87 : vector<8x8xf32> to vector<1x8x8xf32>
    tpu.vector_store %arg10[%c0_52, %c0_53, %c0_54], %90 {strides = array<i32>} : memref<8x8x8xf32, #tpu.memory_space<vmem>>, vector<1x8x8xf32>,
    %91 = vector.extract_strided_slice %85 {offsets = [0, 1, 0], sizes = [8, 1, 8], strides = [1, 1, 1]} : vector<8x8x8xf32> to vector<8x1x8xf32>
    %92 = vector.shape_cast %91 : vector<8x1x8xf32> to vector<8x8xf32>
    %c1_55 = arith.constant 1 : index
    %c0_56 = arith.constant 0 : index
    %c0_57 = arith.constant 0 : index
    %93 = vector.load %arg10[%c1_55, %c0_56, %c0_57] : memref<8x8x8xf32, #tpu.memory_space<vmem>>, vector<1x8x8xf32>
    %94 = vector.shape_cast %93 : vector<1x8x8xf32> to vector<8x8xf32>
    %95 = vector.shape_cast %92 : vector<8x8xf32> to vector<1x8x8xf32>
    tpu.vector_store %arg10[%c1_55, %c0_56, %c0_57], %95 {strides = array<i32>} : memref<8x8x8xf32, #tpu.memory_space<vmem>>, vector<1x8x8xf32>,
    %96 = vector.extract_strided_slice %85 {offsets = [0, 2, 0], sizes = [8, 1, 8], strides = [1, 1, 1]} : vector<8x8x8xf32> to vector<8x1x8xf32>
    %97 = vector.shape_cast %96 : vector<8x1x8xf32> to vector<8x8xf32>
    %c2_58 = arith.constant 2 : index
    %c0_59 = arith.constant 0 : index
    %c0_60 = arith.constant 0 : index
    %98 = vector.load %arg10[%c2_58, %c0_59, %c0_60] : memref<8x8x8xf32, #tpu.memory_space<vmem>>, vector<1x8x8xf32>
    %99 = vector.shape_cast %98 : vector<1x8x8xf32> to vector<8x8xf32>
    %100 = vector.shape_cast %97 : vector<8x8xf32> to vector<1x8x8xf32>
    tpu.vector_store %arg10[%c2_58, %c0_59, %c0_60], %100 {strides = array<i32>} : memref<8x8x8xf32, #tpu.memory_space<vmem>>, vector<1x8x8xf32>,
    %101 = vector.extract_strided_slice %85 {offsets = [0, 3, 0], sizes = [8, 1, 8], strides = [1, 1, 1]} : vector<8x8x8xf32> to vector<8x1x8xf32>
    %102 = vector.shape_cast %101 : vector<8x1x8xf32> to vector<8x8xf32>
    %c3_61 = arith.constant 3 : index
    %c0_62 = arith.constant 0 : index
    %c0_63 = arith.constant 0 : index
    %103 = vector.load %arg10[%c3_61, %c0_62, %c0_63] : memref<8x8x8xf32, #tpu.memory_space<vmem>>, vector<1x8x8xf32>
    %104 = vector.shape_cast %103 : vector<1x8x8xf32> to vector<8x8xf32>
    %105 = vector.shape_cast %102 : vector<8x8xf32> to vector<1x8x8xf32>
    tpu.vector_store %arg10[%c3_61, %c0_62, %c0_63], %105 {strides = array<i32>} : memref<8x8x8xf32, #tpu.memory_space<vmem>>, vector<1x8x8xf32>,
    %106 = vector.extract_strided_slice %85 {offsets = [0, 4, 0], sizes = [8, 1, 8], strides = [1, 1, 1]} : vector<8x8x8xf32> to vector<8x1x8xf32>
    %107 = vector.shape_cast %106 : vector<8x1x8xf32> to vector<8x8xf32>
    %c4_64 = arith.constant 4 : index
    %c0_65 = arith.constant 0 : index
    %c0_66 = arith.constant 0 : index
    %108 = vector.load %arg10[%c4_64, %c0_65, %c0_66] : memref<8x8x8xf32, #tpu.memory_space<vmem>>, vector<1x8x8xf32>
    %109 = vector.shape_cast %108 : vector<1x8x8xf32> to vector<8x8xf32>
    %110 = vector.shape_cast %107 : vector<8x8xf32> to vector<1x8x8xf32>
    tpu.vector_store %arg10[%c4_64, %c0_65, %c0_66], %110 {strides = array<i32>} : memref<8x8x8xf32, #tpu.memory_space<vmem>>, vector<1x8x8xf32>,
    %111 = vector.extract_strided_slice %85 {offsets = [0, 5, 0], sizes = [8, 1, 8], strides = [1, 1, 1]} : vector<8x8x8xf32> to vector<8x1x8xf32>
    %112 = vector.shape_cast %111 : vector<8x1x8xf32> to vector<8x8xf32>
    %c5_67 = arith.constant 5 : index
    %c0_68 = arith.constant 0 : index
    %c0_69 = arith.constant 0 : index
    %113 = vector.load %arg10[%c5_67, %c0_68, %c0_69] : memref<8x8x8xf32, #tpu.memory_space<vmem>>, vector<1x8x8xf32>
    %114 = vector.shape_cast %113 : vector<1x8x8xf32> to vector<8x8xf32>
    %115 = vector.shape_cast %112 : vector<8x8xf32> to vector<1x8x8xf32>
    tpu.vector_store %arg10[%c5_67, %c0_68, %c0_69], %115 {strides = array<i32>} : memref<8x8x8xf32, #tpu.memory_space<vmem>>, vector<1x8x8xf32>,
    %116 = vector.extract_strided_slice %85 {offsets = [0, 6, 0], sizes = [8, 1, 8], strides = [1, 1, 1]} : vector<8x8x8xf32> to vector<8x1x8xf32>
    %117 = vector.shape_cast %116 : vector<8x1x8xf32> to vector<8x8xf32>
    %c6_70 = arith.constant 6 : index
    %c0_71 = arith.constant 0 : index
    %c0_72 = arith.constant 0 : index
    %118 = vector.load %arg10[%c6_70, %c0_71, %c0_72] : memref<8x8x8xf32, #tpu.memory_space<vmem>>, vector<1x8x8xf32>
    %119 = vector.shape_cast %118 : vector<1x8x8xf32> to vector<8x8xf32>
    %120 = vector.shape_cast %117 : vector<8x8xf32> to vector<1x8x8xf32>
    tpu.vector_store %arg10[%c6_70, %c0_71, %c0_72], %120 {strides = array<i32>} : memref<8x8x8xf32, #tpu.memory_space<vmem>>, vector<1x8x8xf32>,
    %121 = vector.extract_strided_slice %85 {offsets = [0, 7, 0], sizes = [8, 1, 8], strides = [1, 1, 1]} : vector<8x8x8xf32> to vector<8x1x8xf32>
    %122 = vector.shape_cast %121 : vector<8x1x8xf32> to vector<8x8xf32>
    %c7_73 = arith.constant 7 : index
    %c0_74 = arith.constant 0 : index
    %c0_75 = arith.constant 0 : index
    %123 = vector.load %arg10[%c7_73, %c0_74, %c0_75] : memref<8x8x8xf32, #tpu.memory_space<vmem>>, vector<1x8x8xf32>
    %124 = vector.shape_cast %123 : vector<1x8x8xf32> to vector<8x8xf32>
    %125 = vector.shape_cast %122 : vector<8x8xf32> to vector<1x8x8xf32>
    tpu.vector_store %arg10[%c7_73, %c0_74, %c0_75], %125 {strides = array<i32>} : memref<8x8x8xf32, #tpu.memory_space<vmem>>, vector<1x8x8xf32>,
    %c0_76 = arith.constant 0 : index
    %c0_77 = arith.constant 0 : index
    %c0_78 = arith.constant 0 : index
    %126 = vector.load %arg2[%c0_76, %c0_77, %c0_78] : memref<1x8x8xf32, #tpu.memory_space<vmem>>, vector<1x8x8xf32>
    %127 = vector.shape_cast %126 : vector<1x8x8xf32> to vector<8x8xf32>
    %c0_79 = arith.constant 0 : index
    %c0_80 = arith.constant 0 : index
    %c0_81 = arith.constant 0 : index
    %128 = vector.load %arg3[%c0_79, %c0_80, %c0_81] : memref<1x8x8xf32, #tpu.memory_space<vmem>>, vector<1x8x8xf32>
    %129 = vector.shape_cast %128 : vector<1x8x8xf32> to vector<8x8xf32>
    %c8_i32 = arith.constant 8 : i32
    %130 = arith.muli %arg1, %c8_i32 : i32
    %131 = tpu.iota {dimensions = array<i32: 0>} : vector<8x8xi32>
    %132 = vector.broadcast %130 : i32 to vector<8x8xi32>
    %133 = arith.addi %131, %132 : vector<8x8xi32>
    %134 = tpu.iota {dimensions = array<i32: 1>} : vector<8x8xi32>
    %135 = arith.cmpi ne, %133, %134 : vector<8x8xi32>
    %136 = arith.extui %135 : vector<8x8xi1> to vector<8x8xi32>
    %137 = arith.sitofp %136 : vector<8x8xi32> to vector<8x8xf32>
    %138 = tpu.iota {dimensions = array<i32: 0>} : vector<8x8xi32>
    %139 = tpu.iota {dimensions = array<i32: 1>} : vector<8x8xi32>
    %140 = arith.cmpi ne, %138, %139 : vector<8x8xi32>
    %141 = arith.extui %140 : vector<8x8xi1> to vector<8x8xi32>
    %142 = arith.sitofp %141 : vector<8x8xi32> to vector<8x8xf32>
    %143 = arith.mulf %129, %137 : vector<8x8xf32>
    %144 = vector.shape_cast %143 : vector<8x8xf32> to vector<8x1x8xf32>
    %145 = vector.shape_cast %129 : vector<8x8xf32> to vector<8x8x1xf32>
    %146 = vector.broadcast %144 : vector<8x1x8xf32> to vector<8x8x8xf32>
    %147 = vector.broadcast %145 : vector<8x8x1xf32> to vector<8x8x8xf32>
    %148 = arith.mulf %146, %147 : vector<8x8x8xf32>
    %149 = vector.shape_cast %142 : vector<8x8xf32> to vector<1x8x8xf32>
    %150 = vector.broadcast %149 : vector<1x8x8xf32> to vector<8x8x8xf32>
    %151 = arith.mulf %148, %150 : vector<8x8x8xf32>
    %cst = arith.constant 0.000000e+00 : f32
    %152 = vector.broadcast %cst : f32 to vector<8x8x8xf32>
    %cst_82 = arith.constant 0.000000e+00 : f32
    %153 = vector.broadcast %cst_82 : f32 to vector<8x8xf32>
    %c0_i32 = arith.constant 0 : i32
    %154 = vector.shape_cast %153 : vector<8x8xf32> to vector<8x8x1xf32>
    %155 = vector.broadcast %154 : vector<8x8x1xf32> to vector<8x8x8xf32>
    %156 = arith.subf %155, %152 : vector<8x8x8xf32>
    %c0_83 = arith.constant 0 : index
    %c0_84 = arith.constant 0 : index
    %c0_85 = arith.constant 0 : index
    %157 = vector.load %arg8[%c0_83, %c0_84, %c0_85] : memref<8x8x8xf32, #tpu.memory_space<vmem>>, vector<8x8x8xf32>
    %158 = arith.addf %156, %157 : vector<8x8x8xf32>
    %cst_86 = arith.constant 0.000000e+00 : f32
    %159 = vector.broadcast %cst_86 : f32 to vector<8x8x8xf32>
    %160 = arith.maximumf %158, %159 : vector<8x8x8xf32>
    %161 = math.absf %158 : vector<8x8x8xf32>
    %cst_87 = arith.constant 0.000000e+00 : f32
    %162 = vector.broadcast %cst_87 : f32 to vector<8x8x8xf32>
    %163 = arith.subf %162, %161 : vector<8x8x8xf32>
    %164 = math.exp %163 : vector<8x8x8xf32>
    %165 = math.log1p %164 : vector<8x8x8xf32>
    %166 = arith.addf %160, %165 : vector<8x8x8xf32>
    %cst_88 = arith.constant 0.000000e+00 : f32
    %167 = vector.broadcast %cst_88 : f32 to vector<8x8x8xf32>
    %168 = arith.maximumf %156, %167 : vector<8x8x8xf32>
    %169 = math.absf %156 : vector<8x8x8xf32>
    %cst_89 = arith.constant 0.000000e+00 : f32
    %170 = vector.broadcast %cst_89 : f32 to vector<8x8x8xf32>
    %171 = arith.subf %170, %169 : vector<8x8x8xf32>
    %172 = math.exp %171 : vector<8x8x8xf32>
    %173 = math.log1p %172 : vector<8x8x8xf32>
    %174 = arith.addf %168, %173 : vector<8x8x8xf32>
    %175 = arith.subf %166, %174 : vector<8x8x8xf32>
    %176 = tpu.transpose %175, [0, 2, 1] : vector<8x8x8xf32> -> vector<8x8x8xf32>
    %177 = vector.shape_cast %153 : vector<8x8xf32> to vector<8x8x1xf32>
    %178 = vector.broadcast %177 : vector<8x8x1xf32> to vector<8x8x8xf32>
    %179 = arith.subf %178, %152 : vector<8x8x8xf32>
    %c0_90 = arith.constant 0 : index
    %c0_91 = arith.constant 0 : index
    %c0_92 = arith.constant 0 : index
    %180 = vector.load %arg9[%c0_90, %c0_91, %c0_92] : memref<8x8x8xf32, #tpu.memory_space<vmem>>, vector<8x8x8xf32>
    %181 = arith.addf %179, %180 : vector<8x8x8xf32>
    %cst_93 = arith.constant 0.000000e+00 : f32
    %182 = vector.broadcast %cst_93 : f32 to vector<8x8x8xf32>
    %183 = arith.maximumf %181, %182 : vector<8x8x8xf32>
    %184 = math.absf %181 : vector<8x8x8xf32>
    %cst_94 = arith.constant 0.000000e+00 : f32
    %185 = vector.broadcast %cst_94 : f32 to vector<8x8x8xf32>
    %186 = arith.subf %185, %184 : vector<8x8x8xf32>
    %187 = math.exp %186 : vector<8x8x8xf32>
    %188 = math.log1p %187 : vector<8x8x8xf32>
    %189 = arith.addf %183, %188 : vector<8x8x8xf32>
    %cst_95 = arith.constant 0.000000e+00 : f32
    %190 = vector.broadcast %cst_95 : f32 to vector<8x8x8xf32>
    %191 = arith.maximumf %179, %190 : vector<8x8x8xf32>
    %192 = math.absf %179 : vector<8x8x8xf32>
    %cst_96 = arith.constant 0.000000e+00 : f32
    %193 = vector.broadcast %cst_96 : f32 to vector<8x8x8xf32>
    %194 = arith.subf %193, %192 : vector<8x8x8xf32>
    %195 = math.exp %194 : vector<8x8x8xf32>
    %196 = math.log1p %195 : vector<8x8x8xf32>
    %197 = arith.addf %191, %196 : vector<8x8x8xf32>
    %198 = arith.subf %189, %197 : vector<8x8x8xf32>
    %199 = tpu.transpose %198, [0, 2, 1] : vector<8x8x8xf32> -> vector<8x8x8xf32>
    %200 = vector.shape_cast %153 : vector<8x8xf32> to vector<8x8x1xf32>
    %201 = vector.broadcast %200 : vector<8x8x1xf32> to vector<8x8x8xf32>
    %202 = arith.subf %201, %152 : vector<8x8x8xf32>
    %c0_97 = arith.constant 0 : index
    %c0_98 = arith.constant 0 : index
    %c0_99 = arith.constant 0 : index
    %203 = vector.load %arg10[%c0_97, %c0_98, %c0_99] : memref<8x8x8xf32, #tpu.memory_space<vmem>>, vector<8x8x8xf32>
    %204 = arith.addf %202, %203 : vector<8x8x8xf32>
    %cst_100 = arith.constant 0.000000e+00 : f32
    %205 = vector.broadcast %cst_100 : f32 to vector<8x8x8xf32>
    %206 = arith.maximumf %204, %205 : vector<8x8x8xf32>
    %207 = math.absf %204 : vector<8x8x8xf32>
    %cst_101 = arith.constant 0.000000e+00 : f32
    %208 = vector.broadcast %cst_101 : f32 to vector<8x8x8xf32>
    %209 = arith.subf %208, %207 : vector<8x8x8xf32>
    %210 = math.exp %209 : vector<8x8x8xf32>
    %211 = math.log1p %210 : vector<8x8x8xf32>
    %212 = arith.addf %206, %211 : vector<8x8x8xf32>
    %cst_102 = arith.constant 0.000000e+00 : f32
    %213 = vector.broadcast %cst_102 : f32 to vector<8x8x8xf32>
    %214 = arith.maximumf %202, %213 : vector<8x8x8xf32>
    %215 = math.absf %202 : vector<8x8x8xf32>
    %cst_103 = arith.constant 0.000000e+00 : f32
    %216 = vector.broadcast %cst_103 : f32 to vector<8x8x8xf32>
    %217 = arith.subf %216, %215 : vector<8x8x8xf32>
    %218 = math.exp %217 : vector<8x8x8xf32>
    %219 = math.log1p %218 : vector<8x8x8xf32>
    %220 = arith.addf %214, %219 : vector<8x8x8xf32>
    %221 = arith.subf %212, %220 : vector<8x8x8xf32>
    %222 = tpu.transpose %221, [0, 2, 1] : vector<8x8x8xf32> -> vector<8x8x8xf32>
    %223 = arith.addf %176, %199 : vector<8x8x8xf32>
    %224 = arith.addf %223, %222 : vector<8x8x8xf32>
    %225 = arith.mulf %224, %151 : vector<8x8x8xf32>
    %cst_104 = arith.constant dense<0.000000e+00> : vector<8x8xf32>
    %226 = vector.multi_reduction <add>, %225, %cst_104 [2] : vector<8x8x8xf32> to vector<8x8xf32>
    %227 = arith.addf %127, %226 : vector<8x8xf32>
    %c1_i32 = arith.constant 1 : i32
    %228 = vector.shape_cast %227 : vector<8x8xf32> to vector<8x8x1xf32>
    %229 = vector.broadcast %228 : vector<8x8x1xf32> to vector<8x8x8xf32>
    %230 = arith.subf %229, %176 : vector<8x8x8xf32>
    %c0_105 = arith.constant 0 : index
    %c0_106 = arith.constant 0 : index
    %c0_107 = arith.constant 0 : index
    %231 = vector.load %arg8[%c0_105, %c0_106, %c0_107] : memref<8x8x8xf32, #tpu.memory_space<vmem>>, vector<8x8x8xf32>
    %232 = arith.addf %230, %231 : vector<8x8x8xf32>
    %cst_108 = arith.constant 0.000000e+00 : f32
    %233 = vector.broadcast %cst_108 : f32 to vector<8x8x8xf32>
    %234 = arith.maximumf %232, %233 : vector<8x8x8xf32>
    %235 = math.absf %232 : vector<8x8x8xf32>
    %cst_109 = arith.constant 0.000000e+00 : f32
    %236 = vector.broadcast %cst_109 : f32 to vector<8x8x8xf32>
    %237 = arith.subf %236, %235 : vector<8x8x8xf32>
    %238 = math.exp %237 : vector<8x8x8xf32>
    %239 = math.log1p %238 : vector<8x8x8xf32>
    %240 = arith.addf %234, %239 : vector<8x8x8xf32>
    %cst_110 = arith.constant 0.000000e+00 : f32
    %241 = vector.broadcast %cst_110 : f32 to vector<8x8x8xf32>
    %242 = arith.maximumf %230, %241 : vector<8x8x8xf32>
    %243 = math.absf %230 : vector<8x8x8xf32>
    %cst_111 = arith.constant 0.000000e+00 : f32
    %244 = vector.broadcast %cst_111 : f32 to vector<8x8x8xf32>
    %245 = arith.subf %244, %243 : vector<8x8x8xf32>
    %246 = math.exp %245 : vector<8x8x8xf32>
    %247 = math.log1p %246 : vector<8x8x8xf32>
    %248 = arith.addf %242, %247 : vector<8x8x8xf32>
    %249 = arith.subf %240, %248 : vector<8x8x8xf32>
    %250 = tpu.transpose %249, [0, 2, 1] : vector<8x8x8xf32> -> vector<8x8x8xf32>
    %251 = vector.shape_cast %227 : vector<8x8xf32> to vector<8x8x1xf32>
    %252 = vector.broadcast %251 : vector<8x8x1xf32> to vector<8x8x8xf32>
    %253 = arith.subf %252, %199 : vector<8x8x8xf32>
    %c0_112 = arith.constant 0 : index
    %c0_113 = arith.constant 0 : index
    %c0_114 = arith.constant 0 : index
    %254 = vector.load %arg9[%c0_112, %c0_113, %c0_114] : memref<8x8x8xf32, #tpu.memory_space<vmem>>, vector<8x8x8xf32>
    %255 = arith.addf %253, %254 : vector<8x8x8xf32>
    %cst_115 = arith.constant 0.000000e+00 : f32
    %256 = vector.broadcast %cst_115 : f32 to vector<8x8x8xf32>
    %257 = arith.maximumf %255, %256 : vector<8x8x8xf32>
    %258 = math.absf %255 : vector<8x8x8xf32>
    %cst_116 = arith.constant 0.000000e+00 : f32
    %259 = vector.broadcast %cst_116 : f32 to vector<8x8x8xf32>
    %260 = arith.subf %259, %258 : vector<8x8x8xf32>
    %261 = math.exp %260 : vector<8x8x8xf32>
    %262 = math.log1p %261 : vector<8x8x8xf32>
    %263 = arith.addf %257, %262 : vector<8x8x8xf32>
    %cst_117 = arith.constant 0.000000e+00 : f32
    %264 = vector.broadcast %cst_117 : f32 to vector<8x8x8xf32>
    %265 = arith.maximumf %253, %264 : vector<8x8x8xf32>
    %266 = math.absf %253 : vector<8x8x8xf32>
    %cst_118 = arith.constant 0.000000e+00 : f32
    %267 = vector.broadcast %cst_118 : f32 to vector<8x8x8xf32>
    %268 = arith.subf %267, %266 : vector<8x8x8xf32>
    %269 = math.exp %268 : vector<8x8x8xf32>
    %270 = math.log1p %269 : vector<8x8x8xf32>
    %271 = arith.addf %265, %270 : vector<8x8x8xf32>
    %272 = arith.subf %263, %271 : vector<8x8x8xf32>
    %273 = tpu.transpose %272, [0, 2, 1] : vector<8x8x8xf32> -> vector<8x8x8xf32>
    %274 = vector.shape_cast %227 : vector<8x8xf32> to vector<8x8x1xf32>
    %275 = vector.broadcast %274 : vector<8x8x1xf32> to vector<8x8x8xf32>
    %276 = arith.subf %275, %222 : vector<8x8x8xf32>
    %c0_119 = arith.constant 0 : index
    %c0_120 = arith.constant 0 : index
    %c0_121 = arith.constant 0 : index
    %277 = vector.load %arg10[%c0_119, %c0_120, %c0_121] : memref<8x8x8xf32, #tpu.memory_space<vmem>>, vector<8x8x8xf32>
    %278 = arith.addf %276, %277 : vector<8x8x8xf32>
    %cst_122 = arith.constant 0.000000e+00 : f32
    %279 = vector.broadcast %cst_122 : f32 to vector<8x8x8xf32>
    %280 = arith.maximumf %278, %279 : vector<8x8x8xf32>
    %281 = math.absf %278 : vector<8x8x8xf32>
    %cst_123 = arith.constant 0.000000e+00 : f32
    %282 = vector.broadcast %cst_123 : f32 to vector<8x8x8xf32>
    %283 = arith.subf %282, %281 : vector<8x8x8xf32>
    %284 = math.exp %283 : vector<8x8x8xf32>
    %285 = math.log1p %284 : vector<8x8x8xf32>
    %286 = arith.addf %280, %285 : vector<8x8x8xf32>
    %cst_124 = arith.constant 0.000000e+00 : f32
    %287 = vector.broadcast %cst_124 : f32 to vector<8x8x8xf32>
    %288 = arith.maximumf %276, %287 : vector<8x8x8xf32>
    %289 = math.absf %276 : vector<8x8x8xf32>
    %cst_125 = arith.constant 0.000000e+00 : f32
    %290 = vector.broadcast %cst_125 : f32 to vector<8x8x8xf32>
    %291 = arith.subf %290, %289 : vector<8x8x8xf32>
    %292 = math.exp %291 : vector<8x8x8xf32>
    %293 = math.log1p %292 : vector<8x8x8xf32>
    %294 = arith.addf %288, %293 : vector<8x8x8xf32>
    %295 = arith.subf %286, %294 : vector<8x8x8xf32>
    %296 = tpu.transpose %295, [0, 2, 1] : vector<8x8x8xf32> -> vector<8x8x8xf32>
    %297 = arith.addf %250, %273 : vector<8x8x8xf32>
    %298 = arith.addf %297, %296 : vector<8x8x8xf32>
    %299 = arith.mulf %298, %151 : vector<8x8x8xf32>
    %cst_126 = arith.constant dense<0.000000e+00> : vector<8x8xf32>
    %300 = vector.multi_reduction <add>, %299, %cst_126 [2] : vector<8x8x8xf32> to vector<8x8xf32>
    %301 = arith.addf %127, %300 : vector<8x8xf32>
    %c2_i32 = arith.constant 2 : i32
    %302 = vector.shape_cast %301 : vector<8x8xf32> to vector<8x8x1xf32>
    %303 = vector.broadcast %302 : vector<8x8x1xf32> to vector<8x8x8xf32>
    %304 = arith.subf %303, %250 : vector<8x8x8xf32>
    %c0_127 = arith.constant 0 : index
    %c0_128 = arith.constant 0 : index
    %c0_129 = arith.constant 0 : index
    %305 = vector.load %arg8[%c0_127, %c0_128, %c0_129] : memref<8x8x8xf32, #tpu.memory_space<vmem>>, vector<8x8x8xf32>
    %306 = arith.addf %304, %305 : vector<8x8x8xf32>
    %cst_130 = arith.constant 0.000000e+00 : f32
    %307 = vector.broadcast %cst_130 : f32 to vector<8x8x8xf32>
    %308 = arith.maximumf %306, %307 : vector<8x8x8xf32>
    %309 = math.absf %306 : vector<8x8x8xf32>
    %cst_131 = arith.constant 0.000000e+00 : f32
    %310 = vector.broadcast %cst_131 : f32 to vector<8x8x8xf32>
    %311 = arith.subf %310, %309 : vector<8x8x8xf32>
    %312 = math.exp %311 : vector<8x8x8xf32>
    %313 = math.log1p %312 : vector<8x8x8xf32>
    %314 = arith.addf %308, %313 : vector<8x8x8xf32>
    %cst_132 = arith.constant 0.000000e+00 : f32
    %315 = vector.broadcast %cst_132 : f32 to vector<8x8x8xf32>
    %316 = arith.maximumf %304, %315 : vector<8x8x8xf32>
    %317 = math.absf %304 : vector<8x8x8xf32>
    %cst_133 = arith.constant 0.000000e+00 : f32
    %318 = vector.broadcast %cst_133 : f32 to vector<8x8x8xf32>
    %319 = arith.subf %318, %317 : vector<8x8x8xf32>
    %320 = math.exp %319 : vector<8x8x8xf32>
    %321 = math.log1p %320 : vector<8x8x8xf32>
    %322 = arith.addf %316, %321 : vector<8x8x8xf32>
    %323 = arith.subf %314, %322 : vector<8x8x8xf32>
    %324 = tpu.transpose %323, [0, 2, 1] : vector<8x8x8xf32> -> vector<8x8x8xf32>
    %325 = vector.shape_cast %301 : vector<8x8xf32> to vector<8x8x1xf32>
    %326 = vector.broadcast %325 : vector<8x8x1xf32> to vector<8x8x8xf32>
    %327 = arith.subf %326, %273 : vector<8x8x8xf32>
    %c0_134 = arith.constant 0 : index
    %c0_135 = arith.constant 0 : index
    %c0_136 = arith.constant 0 : index
    %328 = vector.load %arg9[%c0_134, %c0_135, %c0_136] : memref<8x8x8xf32, #tpu.memory_space<vmem>>, vector<8x8x8xf32>
    %329 = arith.addf %327, %328 : vector<8x8x8xf32>
    %cst_137 = arith.constant 0.000000e+00 : f32
    %330 = vector.broadcast %cst_137 : f32 to vector<8x8x8xf32>
    %331 = arith.maximumf %329, %330 : vector<8x8x8xf32>
    %332 = math.absf %329 : vector<8x8x8xf32>
    %cst_138 = arith.constant 0.000000e+00 : f32
    %333 = vector.broadcast %cst_138 : f32 to vector<8x8x8xf32>
    %334 = arith.subf %333, %332 : vector<8x8x8xf32>
    %335 = math.exp %334 : vector<8x8x8xf32>
    %336 = math.log1p %335 : vector<8x8x8xf32>
    %337 = arith.addf %331, %336 : vector<8x8x8xf32>
    %cst_139 = arith.constant 0.000000e+00 : f32
    %338 = vector.broadcast %cst_139 : f32 to vector<8x8x8xf32>
    %339 = arith.maximumf %327, %338 : vector<8x8x8xf32>
    %340 = math.absf %327 : vector<8x8x8xf32>
    %cst_140 = arith.constant 0.000000e+00 : f32
    %341 = vector.broadcast %cst_140 : f32 to vector<8x8x8xf32>
    %342 = arith.subf %341, %340 : vector<8x8x8xf32>
    %343 = math.exp %342 : vector<8x8x8xf32>
    %344 = math.log1p %343 : vector<8x8x8xf32>
    %345 = arith.addf %339, %344 : vector<8x8x8xf32>
    %346 = arith.subf %337, %345 : vector<8x8x8xf32>
    %347 = tpu.transpose %346, [0, 2, 1] : vector<8x8x8xf32> -> vector<8x8x8xf32>
    %348 = vector.shape_cast %301 : vector<8x8xf32> to vector<8x8x1xf32>
    %349 = vector.broadcast %348 : vector<8x8x1xf32> to vector<8x8x8xf32>
    %350 = arith.subf %349, %296 : vector<8x8x8xf32>
    %c0_141 = arith.constant 0 : index
    %c0_142 = arith.constant 0 : index
    %c0_143 = arith.constant 0 : index
    %351 = vector.load %arg10[%c0_141, %c0_142, %c0_143] : memref<8x8x8xf32, #tpu.memory_space<vmem>>, vector<8x8x8xf32>
    %352 = arith.addf %350, %351 : vector<8x8x8xf32>
    %cst_144 = arith.constant 0.000000e+00 : f32
    %353 = vector.broadcast %cst_144 : f32 to vector<8x8x8xf32>
    %354 = arith.maximumf %352, %353 : vector<8x8x8xf32>
    %355 = math.absf %352 : vector<8x8x8xf32>
    %cst_145 = arith.constant 0.000000e+00 : f32
    %356 = vector.broadcast %cst_145 : f32 to vector<8x8x8xf32>
    %357 = arith.subf %356, %355 : vector<8x8x8xf32>
    %358 = math.exp %357 : vector<8x8x8xf32>
    %359 = math.log1p %358 : vector<8x8x8xf32>
    %360 = arith.addf %354, %359 : vector<8x8x8xf32>
    %cst_146 = arith.constant 0.000000e+00 : f32
    %361 = vector.broadcast %cst_146 : f32 to vector<8x8x8xf32>
    %362 = arith.maximumf %350, %361 : vector<8x8x8xf32>
    %363 = math.absf %350 : vector<8x8x8xf32>
    %cst_147 = arith.constant 0.000000e+00 : f32
    %364 = vector.broadcast %cst_147 : f32 to vector<8x8x8xf32>
    %365 = arith.subf %364, %363 : vector<8x8x8xf32>
    %366 = math.exp %365 : vector<8x8x8xf32>
    %367 = math.log1p %366 : vector<8x8x8xf32>
    %368 = arith.addf %362, %367 : vector<8x8x8xf32>
    %369 = arith.subf %360, %368 : vector<8x8x8xf32>
    %370 = tpu.transpose %369, [0, 2, 1] : vector<8x8x8xf32> -> vector<8x8x8xf32>
    %371 = arith.addf %324, %347 : vector<8x8x8xf32>
    %372 = arith.addf %371, %370 : vector<8x8x8xf32>
    %373 = arith.mulf %372, %151 : vector<8x8x8xf32>
    %cst_148 = arith.constant dense<0.000000e+00> : vector<8x8xf32>
    %374 = vector.multi_reduction <add>, %373, %cst_148 [2] : vector<8x8x8xf32> to vector<8x8xf32>
    %375 = arith.addf %127, %374 : vector<8x8xf32>
    %376 = math.absf %375 : vector<8x8xf32>
    %cst_149 = arith.constant 0.000000e+00 : f32
    %377 = vector.broadcast %cst_149 : f32 to vector<8x8xf32>
    %378 = arith.subf %377, %376 : vector<8x8xf32>
    %379 = math.exp %378 : vector<8x8xf32>
    %cst_150 = arith.constant 1.000000e+00 : f32
    %380 = vector.broadcast %cst_150 : f32 to vector<8x8xf32>
    %381 = arith.addf %380, %379 : vector<8x8xf32>
    %cst_151 = arith.constant 1.000000e+00 : f32
    %382 = vector.broadcast %cst_151 : f32 to vector<8x8xf32>
    %383 = arith.divf %382, %381 : vector<8x8xf32>
    %cst_152 = arith.constant 1.000000e+00 : f32
    %384 = vector.broadcast %cst_152 : f32 to vector<8x8xf32>
    %385 = arith.addf %384, %379 : vector<8x8xf32>
    %386 = arith.divf %379, %385 : vector<8x8xf32>
    %cst_153 = arith.constant 0.000000e+00 : f32
    %387 = vector.broadcast %cst_153 : f32 to vector<8x8xf32>
    %388 = arith.cmpf oge, %375, %387 : vector<8x8xf32>
    %389 = arith.select %388, %383, %386 : vector<8x8xi1>, vector<8x8xf32>
    %cst_154 = arith.constant 0.000000e+00 : f32
    %390 = vector.broadcast %cst_154 : f32 to vector<8x8xf32>
    %391 = arith.cmpf oge, %375, %390 : vector<8x8xf32>
    %392 = arith.select %391, %386, %383 : vector<8x8xi1>, vector<8x8xf32>
    %c0_155 = arith.constant 0 : index
    %c0_156 = arith.constant 0 : index
    %c0_157 = arith.constant 0 : index
    %c0_158 = arith.constant 0 : index
    %393 = vector.load %arg7[%c0_155, %c0_156, %c0_157, %c0_158] : memref<1x2x8x8xf32, #tpu.memory_space<vmem>>, vector<1x1x8x8xf32>
    %394 = vector.shape_cast %393 : vector<1x1x8x8xf32> to vector<8x8xf32>
    %395 = vector.shape_cast %392 : vector<8x8xf32> to vector<1x1x8x8xf32>
    tpu.vector_store %arg7[%c0_155, %c0_156, %c0_157, %c0_158], %395 {strides = array<i32>} : memref<1x2x8x8xf32, #tpu.memory_space<vmem>>, vector<1x1x8x8xf32>,
    %c0_159 = arith.constant 0 : index
    %c1_160 = arith.constant 1 : index
    %c0_161 = arith.constant 0 : index
    %c0_162 = arith.constant 0 : index
    %396 = vector.load %arg7[%c0_159, %c1_160, %c0_161, %c0_162] : memref<1x2x8x8xf32, #tpu.memory_space<vmem>>, vector<1x1x8x8xf32>
    %397 = vector.shape_cast %396 : vector<1x1x8x8xf32> to vector<8x8xf32>
    %398 = vector.shape_cast %389 : vector<8x8xf32> to vector<1x1x8x8xf32>
    tpu.vector_store %arg7[%c0_159, %c1_160, %c0_161, %c0_162], %398 {strides = array<i32>} : memref<1x2x8x8xf32, #tpu.memory_space<vmem>>, vector<1x1x8x8xf32>,
    return
  }
  func.func @transform_0(%arg0: i32, %arg1: i32) -> (i32, i32, i32) {
    %c0_i32 = arith.constant 0 : i32
    %c0_i32_0 = arith.constant 0 : i32
    return %arg0, %arg1, %c0_i32 : i32, i32, i32
  }
  func.func @transform_1(%arg0: i32, %arg1: i32) -> (i32, i32, i32) {
    %c0_i32 = arith.constant 0 : i32
    %c0_i32_0 = arith.constant 0 : i32
    return %arg0, %arg1, %c0_i32 : i32, i32, i32
  }
  func.func @transform_2(%arg0: i32, %arg1: i32) -> (i32, i32, i32, i32) {
    %c0_i32 = arith.constant 0 : i32
    %c0_i32_0 = arith.constant 0 : i32
    %c0_i32_1 = arith.constant 0 : i32
    return %arg0, %c0_i32, %arg1, %c0_i32_0 : i32, i32, i32, i32
  }
  func.func @transform_3(%arg0: i32, %arg1: i32) -> (i32, i32, i32, i32) {
    %c0_i32 = arith.constant 0 : i32
    %c0_i32_0 = arith.constant 0 : i32
    %c0_i32_1 = arith.constant 0 : i32
    return %arg0, %c0_i32, %arg1, %c0_i32_0 : i32, i32, i32, i32
  }
  func.func @transform_4(%arg0: i32, %arg1: i32) -> (i32, i32, i32, i32) {
    %c0_i32 = arith.constant 0 : i32
    %c0_i32_0 = arith.constant 0 : i32
    %c0_i32_1 = arith.constant 0 : i32
    return %arg0, %c0_i32, %arg1, %c0_i32_0 : i32, i32, i32, i32
  }
  func.func @transform_5(%arg0: i32, %arg1: i32) -> (i32, i32, i32, i32) {
    %c0_i32 = arith.constant 0 : i32
    %c0_i32_0 = arith.constant 0 : i32
    %c0_i32_1 = arith.constant 0 : i32
    return %arg0, %c0_i32, %arg1, %c0_i32_0 : i32, i32, i32, i32
  }
}

</mosaic_0001>

<bundles_post_ra>
// kernel: lbp_semantic_dependency.1
= control target key start
LH: loop header
LB: loop body
LE: loop exit
PB: predicated region body
PF: predicated region fallthrough
CT: control target
= control target key end

     0   :  { %s9476_s0 = inlined_call_operand.vmem [shape: f32[2,8,8], index: 0, kind: input, shape index: {}]   ;;  %s9477_s1 = inlined_call_operand.vmem [shape: f32[2,8,8], index: 1, kind: input, shape index: {}]   ;;  %s9478_s2 = inlined_call_operand.hbm [shape: f32[2,8,8,8], index: 2, kind: input, shape index: {}]   ;;  %s9479_s3 = inlined_call_operand.hbm [shape: f32[2,8,8,8], index: 3, kind: input, shape index: {}]   ;;  %s9480_s4 = inlined_call_operand.hbm [shape: f32[2,8,8,8], index: 4, kind: input, shape index: {}]   ;;  %s9481_s5 = inlined_call_operand.vmem [shape: f32[2,2,8,8], index: 5, kind: output, shape index: {}]  }
   0x1   :  { %9609 = sst [smem:[#allocation62_spill]] %s9478_s2 }
   0x2   :  { %10 = vsyncpa [#allocation6], 0 }
   0x3   :  { %12 = vsyncpa [#allocation6 + $0x1], 0 }
   0x4   :  { %13 = vsyncpa [#allocation8], 0 }
   0x5   :  { %15 = vsyncpa [#allocation8 + $0x1], 0  ;;  %s6676_s18 = smov 0   ;;  %s6678_s19 = smov 0  }
   0x6   :  { %s6680_s20 = smov 0   ;;  %s6682_s21 = smov 0  }
   0x7   :  { %s6684_s22 = smov 0   ;;  %s6686_s23 = smov 0  }
   0x8 LB: > { %s9483_s24 = sadd.s32 4294967295, %s6637_s23   ;;  %s33_s25 = sadd.s32 1, %s6633_s22  ;;  %s6637_s23 = sphi %s6686_s23, %s21_s23   ;;  %s6633_s22 = sphi %s6684_s22, %s10016_s22   ;;  %s6629_s21 = sphi %s6682_s21, %s10015_s21   ;;  %s6625_s20 = sphi %s6680_s20, %s10014_s20   ;;  %s6621_s19 = sphi %s6678_s19, %s10013_s19   ;;  %s6617_s18 = sphi %s6676_s18, %s10012_s18  }
   0x9   : > { %p35_p0 = scmp.ge.s32.totalorder %s33_s25, 2  ;;  %s98_s26 = sadd.s32 1, %s6625_s20 }
   0xa   : > { %p105_p1 = scmp.ne.s32.totalorder %s6625_s20, %s6621_s19  ;;  %p106_p2 = scmp.eq.s32.totalorder %s6637_s23, 0 }
   0xb   : > { %s10018_s25 = smov (%p35_p0, %s33_s25), 0  ;;  %p111_p4 = scmp.ne.s32.totalorder %s6621_s19, %s6617_s18 }
   0xc   : > { %p107_p3 = por %p106_p2, %p105_p1  ;;  %s93_s27 = ssub.s32 %s6633_s22, %s10018_s25 }
   0xd   : > { %p112_p5 = scmp.eq.s32.totalorder %s9483_s24, 0  ;;  %p96_p6 = scmp.eq.s32.totalorder %s93_s27, 0 }
   0xe   : > { %p5909_p8 = scmp.lt.s32.totalorder %s6637_s23, 2  ;;  %s239_s30 = sand.u32 1, %s6625_s20  }
   0xf   : > { %p6717_p7 = por %p112_p5, %p111_p4  ;;  %s6727_s6 = sshll.u32 %s6633_s22, 10 }
  0x10   : > { %s6723_s29 = scalar_select %p96_p6, %s6625_s20, %s98_s26  }
  0x11   : > { %s9610_s28 = scalar_select %p6717_p7, 1, 0 }
  0x12   : > { %s6731_s7 = sshll.u32 %s239_s30, 6  ;;  %p6733_p9 = pnand %p5909_p8, %p107_p3 }
  0x13   : > { %s261_s9 = sand.u32 1, %s6637_s23   ;;  %s6742_s12 = scalar_lea.hbm %s9479_s3, %s6727_s6 }
  0x14   : > { %s265_s13 = scalar_lea.vmem [#allocation7], %s6731_s7  ;;  %s6748_s15 = scalar_lea.sflag [#allocation8], %s261_s9 }
  0x15   : > { %s273_s14 = sshll.u32 %s265_s13, 4  ;;  %s6493_s16 = scalar_lea.hbm %s6742_s12, 1024  ;;  %s6745_s14 = int_to_ptr.vmem [resolvable:$true] %s273_s14 }
  0x16   : > { %p6494_p11 = scmp.ne.s32.totalorder %s6742_s12, %s6493_s16  ;;  %p6754_p12 = pneg %p6733_p9 }
  0x17   : > { %s6498_s27 = scalar_lea.hbm %s9479_s3, 2048  ;;  %p6499_p1 = scmp.lt.u32.totalorder %s6742_s12, %s9479_s3 }
  0x18   : > { %p6496_p13 = pnand %p6754_p12, %p6494_p11  ;;  %p6500_p2 = scmp.lt.u32.totalorder %s6498_s27, %s6493_s16 }
  0x19   : > { %p6502_p4 = scmp.lt.u32.totalorder %s6493_s16, %s6742_s12 }
  0x1a   : > { %p6497_p0 = pneg %p6496_p13  ;;  %p6501_p3 = por %p6500_p2, %p6499_p1 }
  0x1c   : > { %p6503_p5 = por %p6502_p4, %p6501_p3 }
  0x1e   : > { %p6504_p6 = pnand %p6503_p5, %p6497_p0 }
  0x20   : > { %6507 = shalt.err (!%p6504_p6)
}
  0x21   : > { %s6508_s9 = scalar_lea.vmem %s6745_s14, 1024  ;;  %s6639_s13 = smov [#allocation7]  }
  0x22   : > { %p6509_p8 = scmp.ne.s32.totalorder %s6745_s14, %s6508_s9  ;;  %s6513_s18 = sshll.u32 %s6639_s13, 4  ;;  %s6514_s18 = int_to_ptr.vmem [resolvable:$false] %s6513_s18 }
  0x23   : > { %s6515_s26 = scalar_lea.vmem %s6514_s18, 2048  ;;  %p6516_p10 = scmp.lt.s32.totalorder %s6745_s14, %s6514_s18 }
  0x24   : > { %p6511_p11 = pnand %p6509_p8, %p6754_p12  ;;  %p6517_p7 = scmp.lt.s32.totalorder %s6515_s26, %s6508_s9 }
  0x26   : > { %p6512_p13 = pneg %p6511_p11  ;;  %p6518_p1 = por %p6517_p7, %p6516_p10 }
  0x28   : > { %p6519_p2 = pnand %p6518_p1, %p6512_p13 }
  0x2a   : > { %6522 = shalt.err (!%p6519_p2)
}
  0x2b   : > { %s9484_s16 = smov 128   ;;  %s9486_s27 = smov 8  }
  0x2c   : > { %5905 = dma.hbm_to_vmem [thread:$0]  (!%p6733_p9), %s6742_s12, 1024, %s6745_s14, %s6748_s15, %s9484_s16, %s9484_s16, %s9486_s27  }
  0x2d   : > { %p303_p7 = scmp.lt.s32.totalorder %s6637_s23, 3  ;;  %p9613_p10 = scmp.ge.s32.totalorder %s6637_s23, 1 }
  0x2e   : > { %s9615_s2 = sld [smem:[#allocation62_spill]]  ;;  %s243_s18 = scalar_lea.vmem [#allocation5], %s6731_s7 }
  0x2f   : > { %p6784_p0 = pnand %p9613_p10, %p303_p7  ;;  %s251_s26 = sshll.u32 %s243_s18, 4  ;;  %s6795_s26 = int_to_ptr.vmem [resolvable:$true] %s251_s26 }
  0x30   : > { %s6799_s12 = scalar_lea.sflag [#allocation6], %s239_s30 }
  0x31   : > { %s9614_s10 = scalar_select %p6784_p0, 1, 0 }
  0x34   : > { %s6792_s13 = scalar_lea.hbm %s9615_s2, %s6727_s6  ;;  %s6528_s9 = scalar_lea.hbm %s9615_s2, 2048 }
  0x35   : > { %s6523_s14 = scalar_lea.hbm %s6792_s13, 1024  ;;  %p6529_p6 = scmp.lt.u32.totalorder %s6792_s13, %s9615_s2 }
  0x36   : > { %p6524_p3 = scmp.ne.s32.totalorder %s6792_s13, %s6523_s14  ;;  %p6530_p8 = scmp.lt.u32.totalorder %s6528_s9, %s6523_s14 }
  0x37   : > { %p6532_p13 = scmp.lt.u32.totalorder %s6523_s14, %s6792_s13 }
  0x38   : > { %p6526_p4 = pnand %p6524_p3, %p6754_p12  ;;  %p6531_p11 = por %p6530_p8, %p6529_p6 }
  0x3a   : > { %p6527_p5 = pneg %p6526_p4  ;;  %p6533_p1 = por %p6532_p13, %p6531_p11 }
  0x3c   : > { %p6534_p2 = pnand %p6533_p1, %p6527_p5 }
  0x3e   : > { %6537 = shalt.err (!%p6534_p2)
}
  0x3f   : > { %s6538_s30 = scalar_lea.vmem %s6795_s26, 1024  ;;  %s6642_s24 = smov [#allocation5]  }
  0x40   : > { %p6539_p7 = scmp.ne.s32.totalorder %s6795_s26, %s6538_s30  ;;  %s6543_s18 = sshll.u32 %s6642_s24, 4  ;;  %s6544_s18 = int_to_ptr.vmem [resolvable:$false] %s6543_s18 }
  0x41   : > { %s6545_s16 = scalar_lea.vmem %s6544_s18, 2048  ;;  %p6546_p4 = scmp.lt.s32.totalorder %s6795_s26, %s6544_s18 }
  0x42   : > { %p6541_p10 = pnand %p6539_p7, %p6754_p12  ;;  %p6547_p0 = scmp.lt.s32.totalorder %s6545_s16, %s6538_s30 }
  0x44   : > { %p6542_p3 = pneg %p6541_p10  ;;  %p6548_p6 = por %p6547_p0, %p6546_p4 }
  0x46   : > { %p6549_p8 = pnand %p6548_p6, %p6542_p3 }
  0x48   : > { %6552 = shalt.err (!%p6549_p8)
}
  0x49   : > { %s9616_s27 = smov 8   ;;  %s9617_s14 = smov 128  }
  0x4a   : > { %5902 = dma.hbm_to_vmem [thread:$0]  (!%p6733_p9), %s6792_s13, 1024, %s6795_s26, %s6799_s12, %s9617_s14, %s9617_s14, %s9616_s27  }
  0x4b   : > { %s6830_s24 = scalar_lea.hbm %s9480_s4, %s6727_s6  ;;  %s287_s30 = scalar_lea.vmem [#allocation9], %s6731_s7 }
  0x4c   : > { %s295_s18 = sshll.u32 %s287_s30, 4  ;;  %s6553_s16 = scalar_lea.hbm %s6830_s24, 1024  ;;  %s6833_s18 = int_to_ptr.vmem [resolvable:$true] %s295_s18 }
  0x4d   : > { %p6554_p0 = scmp.ne.s32.totalorder %s6830_s24, %s6553_s16  ;;  %s6558_s26 = scalar_lea.hbm %s9480_s4, 2048 }
  0x4e   : > { %p6559_p13 = scmp.lt.u32.totalorder %s6830_s24, %s9480_s4  ;;  %p6560_p1 = scmp.lt.u32.totalorder %s6558_s26, %s6553_s16 }
  0x4f   : > { %p6556_p5 = pnand %p6554_p0, %p6754_p12  ;;  %p6562_p7 = scmp.lt.u32.totalorder %s6553_s16, %s6830_s24 }
  0x50   : > { %p6561_p2 = por %p6560_p1, %p6559_p13 }
  0x51   : > { %p6557_p11 = pneg %p6556_p5 }
  0x52   : > { %p6563_p10 = por %p6562_p7, %p6561_p2 }
  0x54   : > { %p6564_p3 = pnand %p6563_p10, %p6557_p11 }
  0x56   : > { %6567 = shalt.err (!%p6564_p3)
}
  0x57   : > { %s6568_s7 = scalar_lea.vmem %s6833_s18, 1024  ;;  %s6643_s2 = smov [#allocation9]  }
  0x58   : > { %p6569_p4 = scmp.ne.s32.totalorder %s6833_s18, %s6568_s7  ;;  %s6573_s11 = sshll.u32 %s6643_s2, 4  ;;  %s6574_s11 = int_to_ptr.vmem [resolvable:$false] %s6573_s11 }
  0x59   : > { %s6575_s9 = scalar_lea.vmem %s6574_s11, 2048  ;;  %p6576_p0 = scmp.lt.s32.totalorder %s6833_s18, %s6574_s11 }
  0x5a   : > { %p6571_p6 = pnand %p6569_p4, %p6754_p12  ;;  %p6577_p5 = scmp.lt.s32.totalorder %s6575_s9, %s6568_s7 }
  0x5c   : > { %p6572_p8 = pneg %p6571_p6  ;;  %p6578_p13 = por %p6577_p5, %p6576_p0 }
  0x5e   : > { %p6579_p1 = pnand %p6578_p13, %p6572_p8 }
  0x60   : > { %6582 = shalt.err (!%p6579_p1)
}
  0x61   : > { %5908 = dma.hbm_to_vmem [thread:$0]  (!%p6733_p9), %s6830_s24, 1024, %s6833_s18, %s6748_s15, %s9617_s14, %s9617_s14, %s9616_s27  }
  0x62   : > { %p9618_p12 = scmp.ne.s32.totalorder %s9614_s10, 0 }
  0x64   : > { %307 = sbr.rel (%p9618_p12) target bundleno = 1820 (0x71c), region = 40 }
  0x6b   : > { %s309_s17 = sand.u32 1, %s6621_s19   ;;  %p9619_p11 = scmp.ne.s32.totalorder %s9610_s28, 0 }
  0x6c   : > { %s6863_s30 = sshll.u32 %s309_s17, 6  ;;  %s310_s16 = scalar_lea.sflag [#allocation6], %s309_s17 }
  0x6d   : > { %s6866_s13 = scalar_lea.vmem [#allocation5], %s6863_s30 }
  0x6e   : > { %6608 = dma.done.wait (%p9619_p11), %s310_s16, 1024  }
  0x6f   : > { %6610 = vsyncadd (%p9619_p11), %s310_s16, 4294966272  ;;  %s9620_s8 = sadd.s32 4294967295, %s6637_s23   ;;  %s6875_s27 = scalar_lea.vmem [#allocation7], %s6863_s30 }
  0x70   : > { %s318_s15 = sand.u32 1, %s9620_s8  }
  0x71   : > { %s319_s10 = scalar_lea.sflag [#allocation8], %s318_s15 }
  0x72   : > { %6612 = dma.done.wait (%p9619_p11), %s319_s10, 2048  }
  0x73   : > { %6614 = vsyncadd (%p9619_p11), %s319_s10, 4294965248  ;;  %p385_p9 = scmp.lt.s32.totalorder %s6629_s21, 1  ;;  %v9488_v0 = vlaneseq  ;;  %vm424_vm0 = vcmask 1041409   ;;  %vm427_vm1 = vcmask 1042434   ;;  %vm433_vm2 = vcmask 1044484   ;;  %v6924_v11 = vld [vmem:[%s6866_s13] sm:$0xff] }
  0x74   : > { %vm9521_vm3 = vcmask 1045509   ;;  %vm439_vm4 = vcmask 1046534   ;;  %vm442_vm5 = vcmask 1047559   ;;  %vm9511_vm6 = vcmask 64515   ;;  %9630 = vst [vmem:[#allocation21_spill] sm:$0xff] %v6924_v11  ;;  %v408_v12 = vld [vmem:[%s6866_s13 + $0x8] sm:$0xff] }
  0x75   : > { %s10020_s21 = smov (!%p385_p9, %s6629_s21), 1  ;;  %v6886_v1 = vshrl.u32 %v9488_v0, 7  ;;  %vm9520_vm7 = vcmask 59392   ;;  %vm430_vm8 = vcmask 1043459   ;;  %vm9507_vm9 = vcmask 58368   ;;  %v409_v16 = vld [vmem:[%s6866_s13 + $0x10] sm:$0xff] }
  0x76   : > { %s5856_s14 = sshll.u32 %s10020_s21, 3  ;;  %vm534_vm10 = vcmask 64519   ;;  %v410_v17 = vld [vmem:[%s6866_s13 + $0x18] sm:$0xff]  ;;  %v411_v18 = vld [vmem:[%s6866_s13 + $0x20] sm:$0xff]  ;;  %vm9494_vm11 = vcmask 64514   ;;  %vm458_vm12 = vcmask 57344  }
  0x77   : > { %9621 = vst [vmem:[#allocation12_spill] sm:$0xff] %v6886_v1  ;;  %v6890_v2 = vsub.s32 2, %v6886_v1  ;;  %v6893_v3 = vsub.s32 3, %v6886_v1  ;;  %v6896_v4 = vsub.s32 0, %v6886_v1  ;;  %s6903_s18 = scalar_lea.vmem %s9477_s1, %s5856_s14  ;;  %v6906_v5 = vsub.s32 5, %v6886_v1  ;;  %v412_v23 = vld [vmem:[%s6866_s13 + $0x28] sm:$0xff]  ;;  %s7811_s7 = scalar_lea.vmem %s9476_s0, %s5856_s14 }
  0x78   : > { %v6909_v6 = vsub.s32 1, %v6886_v1  ;;  %v6912_v7 = vsub.s32 7, %v6886_v1  ;;  %v6915_v8 = vsub.s32 4, %v6886_v1  ;;  %v6918_v9 = vld [vmem:[%s6903_s18] sm:$0xff]  ;;  %v6921_v10 = vsub.s32 6, %v6886_v1  ;;  %v413_v24 = vld [vmem:[%s6866_s13 + $0x30] sm:$0xff] }
  0x79   : > { %9622 = vst [vmem:[#allocation13_spill] sm:$0xff] %v6890_v2  ;;  %9623 = vst [vmem:[#allocation14_spill] sm:$0xff] %v6893_v3  ;;  %v839_v13 = vrot.slane %v6918_v9, %v6890_v2  ;;  %v846_v14 = vrot.slane %v6918_v9, %v6893_v3  ;;  %v825_v15 = vrot.slane %v6918_v9, %v6896_v4  ;;  %v414_v25 = vld [vmem:[%s6866_s13 + $0x38] sm:$0xff]  ;;  %v6949_v26 = vrot.slane %v408_v12, 7  ;;  %v6966_v34 = vld [vmem:[%s6875_s27] sm:$0xff]  ;;  %s6999_s26 = scalar_lea.vmem [#allocation9], %s6863_s30 }
  0x7a   : > { %9624 = vst [vmem:[#allocation15_spill] sm:$0xff] %v6896_v4  ;;  %9625 = vst [vmem:[#allocation16_spill] sm:$0xff] %v6906_v5  ;;  %v860_v19 = vrot.slane %v6918_v9, %v6906_v5  ;;  %v832_v20 = vrot.slane %v6918_v9, %v6909_v6  ;;  %v874_v21 = vrot.slane %v6918_v9, %v6912_v7  ;;  %v6951_v27 = vrot.slane %v409_v16, 6  ;;  %v539_v35 = vld [vmem:[%s6875_s27 + $0x8] sm:$0xff]  ;;  %v540_v36 = vld [vmem:[%s6875_s27 + $0x10] sm:$0xff]  ;;  %s5892_s2 = sshll.u32 %s10020_s21, 4 }
  0x7b   : > { %9626 = vst [vmem:[#allocation17_spill] sm:$0xff] %v6909_v6  ;;  %9627 = vst [vmem:[#allocation18_spill] sm:$0xff] %v6912_v7  ;;  %v853_v22 = vrot.slane %v6918_v9, %v6915_v8  ;;  %841 = vbcast.lane.b32.xlu1 %v839_v13, 256  ;;  %827 = vbcast.lane.b32.xlu0 %v825_v15, 256  ;;  %v6953_v28 = vrot.slane %v410_v17, 5  ;;  %v6955_v29 = vrot.slane %v411_v18, 4  ;;  %s406_s17 = scalar_lea.vmem %s9481_s5, %s5892_s2 }
  0x7c   : > { %9628 = vst [vmem:[#allocation19_spill] sm:$0xff] %v6915_v8  ;;  %9629 = vst [vmem:[#allocation20_spill] sm:$0xff] %v6921_v10  ;;  %v867_v30 = vrot.slane %v6918_v9, %v6921_v10  ;;  %v6959_v31 = vrot.slane %v412_v23, 3  ;;  %v6961_v32 = vrot.slane %v413_v24, 2  ;;  %v6963_v33 = vrot.slane %v414_v25, 1  ;;  %v541_v38 = vld [vmem:[%s6875_s27 + $0x18] sm:$0xff] }
  0x7d   : > { %535 = vst.msk [vmem:[#allocation2 + $0x31] sm:$0x80] %vm534_vm10, %v6924_v11  ;;  %9631 = vst [vmem:[#allocation22_spill] sm:$0xff] %v6949_v26  ;;  %v473_v37 = vsel %vm433_vm2, %v6949_v26, %v6924_v11  ;;  %v542_v39 = vld [vmem:[%s6875_s27 + $0x20] sm:$0xff]  ;;  %v543_v40 = vld [vmem:[%s6875_s27 + $0x28] sm:$0xff]  ;;  %v6976_v41 = vrot.slane %v539_v35, 7  ;;  %v460_v43 = vsel %vm430_vm8, %v6949_v26, %v6924_v11 }
  0x7e   : > { %v6978_v42 = vrot.slane %v540_v36, 6  ;;  %645 = vst.msk [vmem:[#allocation3 + $0x31] sm:$0x80] %vm534_vm10, %v6966_v34  ;;  %v474_v44 = vsel %vm9521_vm3, %v6951_v27, %v473_v37  ;;  %v477_v45 = vsel %vm424_vm0, %v6961_v32, %v6959_v31  ;;  %v544_v46 = vld [vmem:[%s6875_s27 + $0x30] sm:$0xff]  ;;  %v545_v47 = vld [vmem:[%s6875_s27 + $0x38] sm:$0xff]  ;;  %v6992_v48 = vrot.slane %v541_v38, 5 }
  0x7f   : > { %v6994_v49 = vrot.slane %v542_v39, 4  ;;  %459 = vst.msk [vmem:[#allocation2 + $0xf] sm:$0x1] %vm458_vm12, %v6963_v33  ;;  %v7002_v50 = vld [vmem:[%s6999_s26] sm:$0xff]  ;;  %848 = vbcast.lane.b32.xlu1 %v846_v14, 256  ;;  %834 = vbcast.lane.b32.xlu0 %v832_v20, 256  ;;  %v475_v51 = vsel %vm439_vm4, %v6953_v28, %v474_v44  ;;  %v478_v52 = vsel %vm427_vm1, %v6963_v33, %v477_v45 }
  0x80   : > { %v7008_v53 = vrot.slane %v543_v40, 3  ;;  %v7010_v54 = vrot.slane %v544_v46, 2  ;;  %754 = vst.msk [vmem:[#allocation4 + $0x31] sm:$0x80] %vm534_vm10, %v7002_v50  ;;  %v476_v55 = vsel %vm442_vm5, %v6955_v29, %v475_v51  ;;  %v7017_v56 = vrot.slane %v545_v47, 1  ;;  %v648_v23 = vld [vmem:[%s6999_s26 + $0x8] sm:$0xff] }
  0x81   : > { %9632 = vst [vmem:[#allocation23_spill] sm:$0xff] %v6994_v49  ;;  %485 = vst.msk [vmem:[#allocation2 + $0x1d] sm:$0x7] %vm9520_vm7, %v478_v52  ;;  %v592_v57 = vsel %vm433_vm2, %v6976_v41, %v6966_v34  ;;  %v461_v58 = vsel %vm433_vm2, %v6951_v27, %v460_v43  ;;  %v465_v62 = vsel %vm424_vm0, %v6963_v33, %v6961_v32  ;;  %vm456_vm13 = vcmask 64513   ;;  %v649_v43 = vld [vmem:[%s6999_s26 + $0x10] sm:$0xff]  ;;  %v650_v47 = vld [vmem:[%s6999_s26 + $0x18] sm:$0xff] }
  0x82   : > { %9633 = vst [vmem:[#allocation24_spill] sm:$0xff] %v7008_v53  ;;  %9634 = vst [vmem:[#allocation25_spill] sm:$0xff] %v7010_v54  ;;  %v593_v59 = vsel %vm9521_vm3, %v6978_v42, %v592_v57  ;;  %v596_v60 = vsel %vm424_vm0, %v7010_v54, %v7008_v53  ;;  %v462_v61 = vsel %vm9521_vm3, %v6953_v28, %v461_v58  ;;  %v651_v51 = vld [vmem:[%s6999_s26 + $0x20] sm:$0xff]  ;;  %v654_v57 = vld [vmem:[%s6999_s26 + $0x38] sm:$0xff]  ;;  %vm9524_vm14 = vcmask 64512  }
  0x83   : > { %9635 = vst [vmem:[#allocation26_spill] sm:$0xff] %v7017_v56  ;;  %483 = vst.msk [vmem:[#allocation2 + $0x15] sm:$0xf8] %vm9511_vm6, %v476_v55  ;;  %v594_v63 = vsel %vm439_vm4, %v6992_v48, %v593_v59  ;;  %v597_v12 = vsel %vm427_vm1, %v7017_v56, %v596_v60  ;;  %v463_v13 = vsel %vm439_vm4, %v6955_v29, %v462_v61  ;;  %862 = vbcast.lane.b32.xlu1 %v860_v19, 256  ;;  %v652_v61 = vld [vmem:[%s6999_s26 + $0x28] sm:$0xff]  ;;  %vm495_vm15 = vcmask 64516  }
  0x84   : > { %472 = vst.msk [vmem:[#allocation2 + $0x16] sm:$0x3] %vm9507_vm9, %v465_v62  ;;  %v581_v14 = vsel %vm430_vm8, %v6976_v41, %v6966_v34  ;;  %855 = vbcast.lane.b32.xlu0 %v853_v22, 256  ;;  %v595_v15 = vsel %vm442_vm5, %v6994_v49, %v594_v63  ;;  %v464_v16 = vsel %vm442_vm5, %v6959_v31, %v463_v13  ;;  %v653_v62 = vld [vmem:[%s6999_s26 + $0x30] sm:$0xff]  ;;  %v7120_v63 = vrot.slane %v649_v43, 6 }
  0x85   : > { %580 = vst.msk [vmem:[#allocation3 + $0xf] sm:$0x1] %vm458_vm12, %v7017_v56  ;;  %v582_v17 = vsel %vm433_vm2, %v6978_v42, %v581_v14  ;;  %v586_v19 = vsel %vm424_vm0, %v7017_v56, %v7010_v54  ;;  %v570_v20 = vsel %vm427_vm1, %v6976_v41, %v6966_v34  ;;  %v447_v22 = vsel %vm427_vm1, %v6949_v26, %v6924_v11 }
  0x86   : > { %602 = vst.msk [vmem:[#allocation3 + $0x1d] sm:$0x7] %vm9520_vm7, %v597_v12  ;;  %v583_v18 = vsel %vm9521_vm3, %v6992_v48, %v582_v17  ;;  %v571_v25 = vsel %vm430_vm8, %v6978_v42, %v570_v20  ;;  %v448_v35 = vsel %vm430_vm8, %v6951_v27, %v447_v22  ;;  %v425_v36 = vsel %vm424_vm0, %v6949_v26, %v6924_v11 }
  0x87   : > { %601 = vst.msk [vmem:[#allocation3 + $0x15] sm:$0xf8] %vm9511_vm6, %v595_v15  ;;  %v584_v24 = vsel %vm439_vm4, %v6994_v49, %v583_v18  ;;  %v572_v38 = vsel %vm433_vm2, %v6992_v48, %v571_v25  ;;  %v449_v39 = vsel %vm433_vm2, %v6953_v28, %v448_v35  ;;  %v428_v40 = vsel %vm427_vm1, %v6951_v27, %v425_v36 }
  0x88   : > { %470 = vst.msk [vmem:[#allocation2 + $0xe] sm:$0xfc] %vm9494_vm11, %v464_v16  ;;  %v585_v37 = vsel %vm442_vm5, %v7008_v53, %v584_v24  ;;  %876 = vbcast.lane.b32.xlu1 %v874_v21, 256  ;;  %869 = vbcast.lane.b32.xlu0 %v867_v30, 256  ;;  %v573_v44 = vsel %vm9521_vm3, %v6994_v49, %v572_v38  ;;  %v7102_v21 = vrot.slane %v648_v23, 7  ;;  %v7126_v13 = vrot.slane %v650_v47, 5 }
  0x89   : > { %591 = vst.msk [vmem:[#allocation3 + $0x16] sm:$0x3] %vm9507_vm9, %v586_v19  ;;  %v450_v45 = vsel %vm9521_vm3, %v6955_v29, %v449_v39  ;;  %v431_v46 = vsel %vm430_vm8, %v6953_v28, %v428_v40  ;;  %v574_v9 = vsel %vm439_vm4, %v7008_v53, %v573_v44  ;;  %v7128_v14 = vrot.slane %v651_v51, 4 }
  0x8a   : > { %590 = vst.msk [vmem:[#allocation3 + $0xe] sm:$0xfc] %vm9494_vm11, %v585_v37  ;;  %v7104_v52 = vld [vmem:[#allocation2 + $0x18] sm:$0xff]  ;;  %v451_v30 = vsel %vm439_vm4, %v6959_v31, %v450_v45  ;;  %v434_v55 = vsel %vm433_vm2, %v6955_v29, %v431_v46  ;;  %v575_v59 = vsel %vm442_vm5, %v7010_v54, %v574_v9  ;;  %v7136_v19 = vrot.slane %v654_v57, 1 }
  0x8b   : > { %v961_v58 = vand.u32 2147483647, %v7104_v52  ;;  %v452_v60 = vsel %vm442_vm5, %v6961_v32, %v451_v30  ;;  %579 = vst.msk [vmem:[#allocation3 + $0x7] sm:$0xfe] %vm456_vm13, %v575_v59  ;;  %v437_v12 = vsel %vm9521_vm3, %v6959_v31, %v434_v55  ;;  %v679_v20 = vsel %vm427_vm1, %v7102_v21, %v7002_v50 }
  0x8c   : > { %457 = vst.msk [vmem:[#allocation2 + $0x7] sm:$0xfe] %vm456_vm13, %v452_v60  ;;  %v440_v18 = vsel %vm439_vm4, %v6961_v32, %v437_v12  ;;  %v7143_v24 = vrot.slane %v652_v61, 3  ;;  %v7145_v25 = vrot.slane %v653_v62, 2  ;;  %v680_v37 = vsel %vm430_vm8, %v7120_v63, %v679_v20 }
  0x8d   : > { %v969_v15 = vsub.f32 0.0, %v961_v58  ;;  %v443_v36 = vsel %vm442_vm5, %v6963_v33, %v440_v18  ;;  %689 = vst.msk [vmem:[#allocation4 + $0xf] sm:$0x1] %vm458_vm12, %v7136_v19  ;;  %v555_v38 = vsel %vm424_vm0, %v6976_v41, %v6966_v34  ;;  %v681_v44 = vsel %vm433_vm2, %v7126_v13, %v680_v37 }
  0x8e   : > { %v7130_v16 = vld [vmem:[#allocation3 + $0x18] sm:$0xff]  ;;  %446 = vst.msk [vmem:[#allocation2] sm:$0xff] %vm9524_vm14, %v443_v36  ;;  %v557_v45 = vsel %vm427_vm1, %v6978_v42, %v555_v38  ;;  %v682_v47 = vsel %vm9521_vm3, %v7128_v14, %v681_v44  ;;  %vm497_vm10 = vcmask 60416   ;;  %v603_v62 = vsel %vm9521_vm3, %v6976_v41, %v6966_v34 }
  0x8f   : > { %v7132_v17 = vld [vmem:[#allocation2 + $0x10] sm:$0xff]  ;;  %v1361_v22 = vand.u32 2147483647, %v7130_v16  ;;  %v980_v35 = vmul.f32 1.442695, %v969_v15  ;;  %v683_v30 = vsel %vm439_vm4, %v7143_v24, %v682_v47  ;;  %v559_v55 = vsel %vm430_vm8, %v6992_v48, %v557_v45 }
  0x90   : > { %v960_v23 = vand.u32 2147483647, %v7132_v17  ;;  %v684_v60 = vsel %vm442_vm5, %v7145_v25, %v683_v30  ;;  %v561_v61 = vsel %vm433_vm2, %v6994_v49, %v559_v55  ;;  %vm9491_vm12 = vcmask 64517  }
  0x91   : > { %v1369_v39 = vsub.f32 0.0, %v1361_v22  ;;  %v7156_v43 = vld [vmem:[#allocation3 + $0x10] sm:$0xff]  ;;  %5962 = vpow2.f32 %v980_v35  ;;  %688 = vst.msk [vmem:[#allocation4 + $0x7] sm:$0xfe] %vm456_vm13, %v684_v60  ;;  %v563_v22 = vsel %vm9521_vm3, %v7008_v53, %v561_v61  ;;  %v604_v36 = vsel %vm439_vm4, %v6978_v42, %v603_v62 }
  0x92   : > { %v968_v40 = vsub.f32 0.0, %v960_v23  ;;  %v1360_v46 = vand.u32 2147483647, %v7156_v43  ;;  %v7170_v58 = vld [vmem:[#allocation3 + $0x8] sm:$0xff]  ;;  %v565_v35 = vsel %vm439_vm4, %v7010_v54, %v563_v22  ;;  %v606_v37 = vsel %vm424_vm0, %v7008_v53, %v6994_v49 }
  0x93   : > { %v1380_v51 = vmul.f32 1.442695, %v1369_v39  ;;  %v7172_v59 = vld [vmem:[#allocation2 + $0x8] sm:$0xff]  ;;  %v1359_v15 = vand.u32 2147483647, %v7170_v58  ;;  %v605_v44 = vsel %vm442_vm5, %v6992_v48, %v604_v36  ;;  %v664_v55 = vsel %vm424_vm0, %v7102_v21, %v7002_v50 }
  0x94   : > { %v978_v9 = vmul.f32 1.442695, %v968_v40  ;;  %v1368_v57 = vsub.f32 0.0, %v1360_v46  ;;  %v959_v20 = vand.u32 2147483647, %v7172_v59  ;;  %v567_v40 = vsel %vm442_vm5, %v7017_v56, %v565_v35 }
  0x95   : > { %5964 = vpow2.f32 %v1380_v51  ;;  %v1367_v23 = vsub.f32 0.0, %v1359_v15  ;;  %v7194_v39 = vld [vmem:[#allocation2] sm:$0xff]  ;;  %569 = vst.msk [vmem:[#allocation3] sm:$0xff] %vm9524_vm14, %v567_v40  ;;  %v607_v51 = vsel %vm427_vm1, %v7010_v54, %v606_v37  ;;  %v666_v61 = vsel %vm427_vm1, %v7120_v63, %v664_v55 }
  0x96   : > { %5966 = vpow2.f32 %v978_v9  ;;  %v1378_v18 = vmul.f32 1.442695, %v1368_v57  ;;  %v967_v38 = vsub.f32 0.0, %v959_v20  ;;  %v958_v47 = vand.u32 2147483647, %v7194_v39 }
  0x97   : > { %v1376_v46 = vmul.f32 1.442695, %v1367_v23  ;;  %612 = vst.msk [vmem:[#allocation3 + $0x1c] sm:$0xf0] %vm495_vm15, %v605_v44  ;;  %v608_v30 = vsel %vm430_vm8, %v7017_v56, %v607_v51  ;;  %v499_v57 = vsel %vm439_vm4, %v6949_v26, %v6924_v11  ;;  %v668_v23 = vsel %vm430_vm8, %v7126_v13, %v666_v61 }
  0x98   : > { %5968 = vpow2.f32 %v1378_v18  ;;  %v976_v9 = vmul.f32 1.442695, %v967_v38  ;;  %v966_v60 = vsub.f32 0.0, %v958_v47  ;;  %613 = vst.msk [vmem:[#allocation3 + $0x24] sm:$0xf] %vm497_vm10, %v608_v30  ;;  %v500_v62 = vsel %vm442_vm5, %v6951_v27, %v499_v57  ;;  %v7221_v22 = vld [vmem:[#allocation4 + $0x8] sm:$0xff] }
  0x99   : > { %5970 = vpow2.f32 %v1376_v46  ;;  %509 = vst.msk [vmem:[#allocation2 + $0x23] sm:$0xe0] %vm9491_vm12, %v500_v62  ;;  %v1759_v47 = vand.u32 2147483647, %v7221_v22  ;;  %v670_v30 = vsel %vm433_vm2, %v7128_v14, %v668_v23  ;;  %v501_v55 = vsel %vm424_vm0, %v6955_v29, %v6953_v28 }
  0x9a   : > { %5972 = vpow2.f32 %v976_v9  ;;  %v974_v38 = vmul.f32 1.442695, %v966_v60  ;;  %v672_v12 = vsel %vm9521_vm3, %v7143_v24, %v670_v30  ;;  %vm510_vm9 = vcmask 61440  }
  0x9b   : > { %v5963_v15 = vpop.eup %5962  ;;  %v1767_v37 = vsub.f32 0.0, %v1759_v47  ;;  %v489_v3 = vsel %vm424_vm0, %v6959_v31, %v6955_v29 }
  0x9c   : > { %v1017_v35 = vadd.f32 1.0, %v5963_v15  ;;  %v1020_v36 = vmul.f32 -0.5, %v5963_v15  ;;  %v1023_v40 = vand.u32 2147483647, %v5963_v15  ;;  %v7244_v20 = vld [vmem:[#allocation3] sm:$0xff] }
  0x9e   : > { %5974 = vlog2.f32 %v1017_v35  ;;  %v1021_v9 = vadd.f32 1.0, %v1020_v36  ;;  %v7238_v35 = vsel %vm9521_vm3, %v6949_v26, %v6924_v11  ;;  %vm7240_vm13 = vcmp.lt.f32.partialorder %v1023_v40, 0.0004427343 }
  0x9f   : > { %v5965_v51 = vpop.eup %5964  ;;  %5976 = vpow2.f32 %v974_v38  ;;  %v7248_v38 = vsel %vm427_vm1, %v6959_v31, %v501_v55  ;;  %v7265_v26 = vld [vmem:[#allocation3 + $0x20] sm:$0xff] }
  0xa0   : > { %v5967_v57 = vpop.eup %5966  ;;  %v1417_v61 = vadd.f32 1.0, %v5965_v51  ;;  %v1420_v60 = vmul.f32 -0.5, %v5965_v51  ;;  %v1423_v62 = vand.u32 2147483647, %v5965_v51  ;;  %v1022_v18 = vmul.f32 %v5963_v15, %v1021_v9 }
  0xa1   : > { %v1008_v0 = vadd.f32 1.0, %v5967_v57  ;;  %v1011_v44 = vmul.f32 -0.5, %v5967_v57  ;;  %v1014_v46 = vand.u32 2147483647, %v5967_v57  ;;  %v503_v40 = vsel %vm430_vm8, %v6961_v32, %v7248_v38 }
  0xa2   : > { %v5969_v36 = vpop.eup %5968  ;;  %5978 = vlog2.f32 %v1417_v61  ;;  %v1421_v7 = vadd.f32 1.0, %v1420_v60  ;;  %vm7252_vm12 = vcmp.lt.f32.partialorder %v1423_v62, 0.0004427343  ;;  %v1776_v60 = vmul.f32 1.442695, %v1767_v37 }
  0xa3   : > { %5980 = vlog2.f32 %v1008_v0  ;;  %v1408_v45 = vadd.f32 1.0, %v5969_v36  ;;  %v1012_v5 = vadd.f32 1.0, %v1011_v44  ;;  %v1411_v61 = vmul.f32 -0.5, %v5969_v36  ;;  %v5971_v47 = vpop.eup %5970 }
  0xa4   : > { %vm7256_vm11 = vcmp.lt.f32.partialorder %v1014_v46, 0.0004427343  ;;  %v1414_v55 = vand.u32 2147483647, %v5969_v36  ;;  %v1358_v0 = vand.u32 2147483647, %v7244_v20  ;;  %v5973_v15 = vpop.eup %5972  ;;  %v1422_v44 = vmul.f32 %v5965_v51, %v1421_v7 }
  0xa5   : > { %5982 = vlog2.f32 %v1408_v45  ;;  %v1412_v9 = vadd.f32 1.0, %v1411_v61  ;;  %v1399_v10 = vadd.f32 1.0, %v5971_v47  ;;  %v1402_v30 = vmul.f32 -0.5, %v5971_v47 }
  0xa6   : > { %v1405_v62 = vand.u32 2147483647, %v5971_v47  ;;  %v999_v2 = vadd.f32 1.0, %v5973_v15  ;;  %v1002_v8 = vmul.f32 -0.5, %v5973_v15  ;;  %v1005_v6 = vand.u32 2147483647, %v5973_v15 }
  0xa7   : > { %5984 = vlog2.f32 %v1399_v10  ;;  %v1403_v4 = vadd.f32 1.0, %v1402_v30  ;;  %v1366_v46 = vsub.f32 0.0, %v1358_v0  ;;  %v1013_v11 = vmul.f32 %v5967_v57, %v1012_v5 }
  0xa8   : > { %v5975_v1 = vpop.eup %5974  ;;  %vm7261_vm6 = vcmp.lt.f32.partialorder %v1414_v55, 0.0004427343  ;;  %5986 = vlog2.f32 %v999_v2  ;;  %v1003_v61 = vadd.f32 1.0, %v1002_v8  ;;  %v1413_v54 = vmul.f32 %v5969_v36, %v1412_v9 }
  0xa9   : > { %v5977_v37 = vpop.eup %5976  ;;  %v1019_v56 = vmul.f32 0.6931472, %v5975_v1  ;;  %5988 = vpow2.f32 %v1776_v60  ;;  %v1374_v53 = vmul.f32 1.442695, %v1366_v46  ;;  %vm7267_vm7 = vcmp.lt.f32.partialorder %v1405_v62, 0.0004427343 }
  0xaa   : > { %vm7271_vm3 = vcmp.lt.f32.partialorder %v1005_v6, 0.0004427343  ;;  %v990_v5 = vadd.f32 1.0, %v5977_v37  ;;  %v993_v51 = vmul.f32 -0.5, %v5977_v37  ;;  %v1404_v8 = vmul.f32 %v5971_v47, %v1403_v4 }
  0xab   : > { %v1025_v2 = vsel %vm7240_vm13, %v1022_v18, %v1019_v56  ;;  %5990 = vpow2.f32 %v1374_v53  ;;  %v1362_v1 = vand.u32 2147483647, %v7265_v26  ;;  %v9648_v55 = vmax.f32 %v7104_v52, 0.0 }
  0xac   : > { %v5979_v57 = vpop.eup %5978  ;;  %v1004_v30 = vmul.f32 %v5973_v15, %v1003_v61  ;;  %5992 = vlog2.f32 %v990_v5  ;;  %v996_v60 = vand.u32 2147483647, %v5977_v37  ;;  %v674_v46 = vsel %vm439_vm4, %v7145_v25, %v672_v12 }
  0xad   : > { %v5981_v36 = vpop.eup %5980  ;;  %v1065_v0 = vadd.f32 %v1025_v2, %v9648_v55  ;;  %v1419_v9 = vmul.f32 0.6931472, %v5979_v57  ;;  %v1370_v62 = vsub.f32 0.0, %v1362_v1  ;;  %v994_v53 = vadd.f32 1.0, %v993_v51 }
  0xae   : > { %v1010_v6 = vmul.f32 0.6931472, %v5981_v36  ;;  %v676_v56 = vsel %vm442_vm5, %v7136_v19, %v674_v46  ;;  %v9649_v52 = vmax.f32 %v7130_v16, 0.0  ;;  %v9650_v12 = vmax.f32 %v7132_v17, 0.0 }
  0xaf   : > { %v5983_v49 = vpop.eup %5982  ;;  %v5865_v23 = vadd.f32 -0.6931472, %v1065_v0  ;;  %v1425_v4 = vsel %vm7252_vm12, %v1422_v44, %v1419_v9  ;;  %v1382_v61 = vmul.f32 1.442695, %v1370_v62  ;;  %678 = vst.msk [vmem:[#allocation4] sm:$0xff] %vm9524_vm14, %v676_v56  ;;  %v487_v16 = vsel %vm439_vm4, %v6951_v27, %v7238_v35 }
  0xb0   : > { %v1465_v18 = vadd.f32 %v1425_v4, %v9649_v52  ;;  %v1016_v47 = vsel %vm7256_vm11, %v1013_v11, %v1010_v6  ;;  %v1410_v15 = vmul.f32 0.6931472, %v5983_v49  ;;  %v504_v17 = vsel %vm433_vm2, %v6963_v33, %v503_v40 }
  0xb1   : > { %1174 = vxpose.xlu0.b32.start.end [1/1] (short) (narrow) %v5865_v23, 8  ;;  %v1064_v5 = vadd.f32 %v1016_v47, %v9650_v12  ;;  %v5985_v11 = vpop.eup %5984  ;;  %5994 = vpow2.f32 %v1382_v61  ;;  %v9651_v38 = vmax.f32 %v7156_v43, 0.0  ;;  %511 = vst.msk [vmem:[#allocation2 + $0x2b] sm:$0x1f] %vm510_vm9, %v504_v17  ;;  %v488_v35 = vsel %vm442_vm5, %v6953_v28, %v487_v16 }
  0xb2   : > { %v5873_v49 = vadd.f32 -0.6931472, %v1465_v18  ;;  %v1416_v44 = vsel %vm7261_vm6, %v1413_v54, %v1410_v15  ;;  %v5987_v51 = vpop.eup %5986  ;;  %v1401_v1 = vmul.f32 0.6931472, %v5985_v11  ;;  %v995_v45 = vmul.f32 %v5977_v37, %v994_v53  ;;  %496 = vst.msk [vmem:[#allocation2 + $0x1c] sm:$0xf0] %vm495_vm15, %v488_v35 }
  0xb3   : > { %v5864_v57 = vadd.f32 -0.6931472, %v1064_v5  ;;  %v1464_v2 = vadd.f32 %v1416_v44, %v9651_v38  ;;  %v5989_v36 = vpop.eup %5988  ;;  %v1001_v55 = vmul.f32 0.6931472, %v5987_v51  ;;  %vm7311_vm6 = vcmp.lt.f32.partialorder %v996_v60, 0.0004427343 }
  0xb4   : > { %1574 = vxpose.xlu1.b32.start.end [1/1] (short) (narrow) %v5873_v49, 8  ;;  %v490_v0 = vsel %vm427_vm1, %v6961_v32, %v489_v3  ;;  %v1407_v9 = vsel %vm7267_vm7, %v1404_v8, %v1401_v1  ;;  %v1799_v6 = vadd.f32 1.0, %v5989_v36  ;;  %v1802_v62 = vmul.f32 -0.5, %v5989_v36 }
  0xb5   : > { %1142 = vxpose.xlu0.b32.start.end [1/1] (short) (narrow) %v5864_v57, 8  ;;  %v5872_v43 = vadd.f32 -0.6931472, %v1464_v2  ;;  %v5991_v46 = vpop.eup %5990  ;;  %v9654_v23 = vmax.f32 %v7170_v58, 0.0  ;;  %v1007_v60 = vsel %vm7271_vm3, %v1004_v30, %v1001_v55  ;;  %v491_v4 = vsel %vm430_vm8, %v6963_v33, %v490_v0 }
  0xb6   : > { %v701_v53 = vsel %vm433_vm2, %v7102_v21, %v7002_v50  ;;  %v5993_v56 = vpop.eup %5992  ;;  %v9655_v7 = vmax.f32 %v7172_v59, 0.0  ;;  %5996 = vlog2.f32 %v1799_v6  ;;  %v1803_v52 = vadd.f32 1.0, %v1802_v62  ;;  %v7331_v47 = vld [vmem:[#allocation4] sm:$0xff]  ;;  %498 = vst.msk [vmem:[#allocation2 + $0x24] sm:$0xf] %vm497_vm10, %v491_v4 }
  0xb7   : > { %v1463_v37 = vadd.f32 %v1407_v9, %v9654_v23  ;;  %v1390_v18 = vadd.f32 1.0, %v5991_v46  ;;  %vm9525_vm7 = vcmask 64518   ;;  %v992_v10 = vmul.f32 0.6931472, %v5993_v56 }
  0xb8   : > { %v1063_v8 = vadd.f32 %v1007_v60, %v9655_v7  ;;  %1542 = vxpose.xlu1.b32.start.end [1/1] (short) (narrow) %v5872_v43, 8  ;;  %v1393_v30 = vmul.f32 -0.5, %v5991_v46  ;;  %v705_v15 = vsel %vm424_vm0, %v7145_v25, %v7143_v24  ;;  %v1805_v12 = vand.u32 2147483647, %v5989_v36  ;;  %v7343_v11 = vld [vmem:[#allocation2 + $0x28] sm:$0xff] }
  0xb9   : > { %v5871_v58 = vadd.f32 -0.6931472, %v1463_v37  ;;  %5998 = vlog2.f32 %v1390_v18  ;;  %vm9656_vm3 = vcmask 1045509   ;;  %v998_v5 = vsel %vm7311_vm6, %v995_v45, %v992_v10 }
  0xba   : > { %v5863_v61 = vadd.f32 -0.6931472, %v1063_v8  ;;  %v702_v59 = vsel %vm9656_vm3, %v7120_v63, %v701_v53  ;;  %v1751_v40 = vmax.f32 %v7221_v22, 0.0  ;;  %v1350_v16 = vmax.f32 %v7244_v20, 0.0 }
  0xbb   : > { %1510 = vxpose.xlu0.b32.start.end [1/1] (short) (narrow) %v5871_v58, 8  ;;  %v1394_v3 = vadd.f32 1.0, %v1393_v30  ;;  %v9657_v49 = vmax.f32 %v7194_v39, 0.0  ;;  %v1396_v17 = vand.u32 2147483647, %v5991_v46  ;;  %v5995_v38 = vpop.eup %5994  ;;  %v1804_v2 = vmul.f32 %v5989_v36, %v1803_v52  ;;  %v9669_v39 = vld [vmem:[#allocation25_spill] sm:$0xff] }
  0xbc   : > { %v1758_v51 = vand.u32 2147483647, %v7331_v47  ;;  %v963_v57 = vand.u32 2147483647, %v7343_v11  ;;  %1110 = vxpose.xlu1.b32.start.end [1/1] (short) (narrow) %v5863_v61, 8  ;;  %v1354_v1 = vmax.f32 %v7265_v26, 0.0  ;;  %v703_v22 = vsel %vm439_vm4, %v7126_v13, %v702_v59 }
  0xbd   : > { %v1062_v44 = vadd.f32 %v998_v5, %v9657_v49  ;;  %v706_v35 = vsel %vm427_vm1, %v7136_v19, %v705_v15  ;;  %vm7354_vm11 = vcmp.lt.f32.partialorder %v1805_v12, 0.0004427343  ;;  %v1426_v45 = vadd.f32 1.0, %v5995_v38  ;;  %v7359_v36 = vld [vmem:[#allocation2 + $0x20] sm:$0xff] }
  0xbe   : > { %v1429_v54 = vmul.f32 -0.5, %v5995_v38  ;;  %vm9660_vm12 = vcmask 59392   ;;  %v1766_v0 = vsub.f32 0.0, %v1758_v51  ;;  %v971_v43 = vsub.f32 0.0, %v963_v57  ;;  %v9668_v57 = vld [vmem:[#allocation24_spill] sm:$0xff] }
  0xbf   : > { %v5862_v55 = vadd.f32 -0.6931472, %v1062_v44  ;;  %711 = vst.msk [vmem:[#allocation4 + $0x1d] sm:$0x7] %vm9660_vm12, %v706_v35  ;;  %v704_v9 = vsel %vm442_vm5, %v7128_v14, %v703_v22  ;;  %v690_v6 = vsel %vm430_vm8, %v7102_v21, %v7002_v50  ;;  %vm523_vm13 = vcmask 62464   ;;  %v9667_v44 = vld [vmem:[#allocation23_spill] sm:$0xff] }
  0xc0   : > { %v1395_v62 = vmul.f32 %v5991_v46, %v1394_v3  ;;  %vm7366_vm6 = vcmp.lt.f32.partialorder %v1396_v17, 0.0004427343  ;;  %6000 = vlog2.f32 %v1426_v45  ;;  %v1432_v37 = vand.u32 2147483647, %v5995_v38  ;;  %v5997_v7 = vpop.eup %5996 }
  0xc1   : > { %1078 = vxpose.xlu0.b32.start.end [1/1] (short) (narrow) %v5862_v55, 8  ;;  %vm9663_vm3 = vcmask 64515   ;;  %v1774_v60 = vmul.f32 1.442695, %v1766_v0  ;;  %v984_v4 = vmul.f32 1.442695, %v971_v43  ;;  %v691_v56 = vsel %vm433_vm2, %v7120_v63, %v690_v6 }
  0xc2   : > { %710 = vst.msk [vmem:[#allocation4 + $0x15] sm:$0xf8] %vm9663_vm3, %v704_v9  ;;  %v962_v53 = vand.u32 2147483647, %v7359_v36  ;;  %v1430_v8 = vadd.f32 1.0, %v1429_v54  ;;  %vm9664_vm12 = vcmask 1045509   ;;  %v695_v52 = vsel %vm424_vm0, %v7136_v19, %v7145_v25 }
  0xc3   : > { %v692_v46 = vsel %vm9664_vm12, %v7126_v13, %v691_v56  ;;  %v625_v18 = vsel %vm442_vm5, %v6976_v41, %v6966_v34  ;;  %v1801_v58 = vmul.f32 0.6931472, %v5997_v7  ;;  %6002 = vpow2.f32 %v1774_v60  ;;  %v5999_v15 = vpop.eup %5998 }
  0xc4   : > { %v970_v10 = vsub.f32 0.0, %v962_v53  ;;  %v693_v30 = vsel %vm439_vm4, %v7128_v14, %v692_v46  ;;  %vm9665_vm3 = vcmask 58368   ;;  %634 = vst.msk [vmem:[#allocation3 + $0x2a] sm:$0xc0] %vm9525_vm7, %v625_v18  ;;  %6004 = vpow2.f32 %v984_v4  ;;  %v9675_v4 = vld [vmem:[#allocation22_spill] sm:$0xff]  ;;  %v9676_v46 = vld [vmem:[#allocation21_spill] sm:$0xff] }
  0xc5   : > { %700 = vst.msk [vmem:[#allocation4 + $0x16] sm:$0x3] %vm9665_vm3, %v695_v52  ;;  %v694_v61 = vsel %vm442_vm5, %v7143_v24, %v693_v30  ;;  %v626_v12 = vsel %vm424_vm0, %v6992_v48, %v6978_v42  ;;  %v614_v59 = vsel %vm439_vm4, %v6976_v41, %v6966_v34  ;;  %v1807_v5 = vsel %vm7354_vm11, %v1804_v2, %v1801_v58 }
  0xc6   : > { %v1392_v3 = vmul.f32 0.6931472, %v5999_v15  ;;  %v982_v49 = vmul.f32 1.442695, %v970_v10  ;;  %vm9666_vm12 = vcmask 64514   ;;  %v627_v17 = vsel %vm427_vm1, %v9667_v44, %v626_v12 }
  0xc7   : > { %699 = vst.msk [vmem:[#allocation4 + $0xe] sm:$0xfc] %vm9666_vm12, %v694_v61  ;;  %v1863_v51 = vadd.f32 %v1807_v5, %v1751_v40  ;;  %v628_v22 = vsel %vm430_vm8, %v9668_v57, %v627_v17  ;;  %v615_v35 = vsel %vm442_vm5, %v6978_v42, %v614_v59  ;;  %v616_v34 = vsel %vm424_vm0, %v9667_v44, %v6992_v48 }
  0xc8   : > { %v1398_v2 = vsel %vm7366_vm6, %v1395_v62, %v1392_v3  ;;  %6006 = vpow2.f32 %v982_v49  ;;  %v629_v45 = vsel %vm433_vm2, %v9669_v39, %v628_v22  ;;  %v617_v40 = vsel %vm427_vm1, %v9668_v57, %v616_v34  ;;  %v9673_v62 = vld [vmem:[#allocation26_spill] sm:$0xff] }
  0xc9   : > { %v7408_v55 = vld [vmem:[#allocation4 + $0x18] sm:$0xff]  ;;  %vm9670_vm11 = vcmask 64517   ;;  %v5879_v54 = vadd.f32 -0.6931472, %v1863_v51  ;;  %v1462_v0 = vadd.f32 %v1398_v2, %v1350_v16  ;;  %vm7417_vm3 = vcmp.lt.f32.partialorder %v1432_v37, 0.0004427343 }
  0xca   : > { %623 = vst.msk [vmem:[#allocation3 + $0x23] sm:$0xe0] %vm9670_vm11, %v615_v35  ;;  %v1761_v9 = vand.u32 2147483647, %v7408_v55  ;;  %v1431_v6 = vmul.f32 %v5995_v38, %v1430_v8  ;;  %vm9674_vm6 = vcmask 1045509   ;;  %v618_v60 = vsel %vm430_vm8, %v9669_v39, %v617_v40  ;;  %v6001_v56 = vpop.eup %6000 }
  0xcb   : > { %v630_v23 = vsel %vm9674_vm6, %v9673_v62, %v629_v45  ;;  %v525_v53 = vsel %vm424_vm0, %v6951_v27, %v9675_v4  ;;  %1910 = vxpose.xlu1.b32.start.end [1/1] (short) (narrow) %v5879_v54, 8  ;;  %v5870_v20 = vadd.f32 -0.6931472, %v1462_v0  ;;  %v619_v37 = vsel %vm433_vm2, %v9673_v62, %v618_v60  ;;  %vm9677_vm11 = vmmov %vm9674_vm6 }
  0xcc   : > { %v1769_v16 = vsub.f32 0.0, %v1761_v9  ;;  %635 = vst.msk [vmem:[#allocation3 + $0x32] sm:$0x3f] %vm523_vm13, %v630_v23  ;;  %v526_v38 = vsel %vm427_vm1, %v6953_v28, %v525_v53  ;;  %v1428_v7 = vmul.f32 0.6931472, %v6001_v56  ;;  %v512_v52 = vsel %vm442_vm5, %v9675_v4, %v9676_v46 }
  0xcd   : > { %624 = vst.msk [vmem:[#allocation3 + $0x2b] sm:$0x1f] %vm510_vm9, %v619_v37  ;;  %v527_v8 = vsel %vm430_vm8, %v6955_v29, %v526_v38  ;;  %1478 = vxpose.xlu0.b32.start.end [1/1] (short) (narrow) %v5870_v20, 8  ;;  %v6003_v10 = vpop.eup %6002  ;;  %v1750_v15 = vmax.f32 %v7331_v47, 0.0  ;;  %v513_v12 = vsel %vm424_vm0, %v6953_v28, %v6951_v27  ;;  %v955_v27 = vmax.f32 %v7343_v11, 0.0 }
  0xce   : > { %v1780_v18 = vmul.f32 1.442695, %v1769_v16  ;;  %v7440_v58 = vld [vmem:[#allocation4 + $0x10] sm:$0xff]  ;;  %522 = vst.msk [vmem:[#allocation2 + $0x2a] sm:$0xc0] %vm9525_vm7, %v512_v52  ;;  %v1434_v30 = vsel %vm7417_vm3, %v1431_v6, %v1428_v7  ;;  %v6005_v59 = vpop.eup %6004  ;;  %v1790_v3 = vadd.f32 1.0, %v6003_v10  ;;  %v528_v17 = vsel %vm433_vm2, %v6959_v31, %v527_v8 }
  0xcf   : > { %v1760_v61 = vand.u32 2147483647, %v7440_v58  ;;  %v1466_v5 = vadd.f32 %v1434_v30, %v1354_v1  ;;  %v1793_v49 = vmul.f32 -0.5, %v6003_v10  ;;  %v1796_v51 = vand.u32 2147483647, %v6003_v10 }
  0xd0   : > { %v1035_v22 = vadd.f32 1.0, %v6005_v59  ;;  %v1038_v35 = vmul.f32 -0.5, %v6005_v59  ;;  %6008 = vpow2.f32 %v1780_v18  ;;  %v1041_v45 = vand.u32 2147483647, %v6005_v59 }
  0xd1   : > { %v5874_v34 = vadd.f32 -0.6931472, %v1466_v5  ;;  %6010 = vlog2.f32 %v1790_v3  ;;  %v1794_v2 = vadd.f32 1.0, %v1793_v49  ;;  %v1768_v26 = vsub.f32 0.0, %v1760_v61 }
  0xd2   : > { %v7454_v40 = vpop.eup %6006  ;;  %6012 = vlog2.f32 %v1035_v22  ;;  %vm536_vm12 = vcmask 63488   ;;  %v529_v43 = vsel %vm9677_vm11, %v6961_v32, %v528_v17  ;;  %v514_v9 = vsel %vm427_vm1, %v6955_v29, %v513_v12 }
  0xd3   : > { %v7457_v28 = vld [vmem:[#allocation3 + $0x30] sm:$0xff]  ;;  %1606 = vxpose.xlu1.b32.start.end [1/1] (short) (narrow) %v5874_v34, 8  ;;  %v1026_v1 = vadd.f32 1.0, %v7454_v40  ;;  %v1029_v54 = vmul.f32 -0.5, %v7454_v40  ;;  %vm7467_vm3 = vcmp.lt.f32.partialorder %v1796_v51, 0.0004427343  ;;  %v723_v4 = vsel %vm439_vm4, %v7102_v21, %v7002_v50 }
  0xd4   : > { %v7461_v0 = vld [vmem:[#allocation3 + $0x28] sm:$0xff]  ;;  %v1778_v23 = vmul.f32 1.442695, %v1768_v26  ;;  %v1364_v60 = vand.u32 2147483647, %v7457_v28  ;;  %v1795_v53 = vmul.f32 %v6003_v10, %v1794_v2  ;;  %v1039_v56 = vadd.f32 1.0, %v1038_v35 }
  0xd5   : > { %vm7475_vm6 = vcmp.lt.f32.partialorder %v1041_v45, 0.0004427343  ;;  %6014 = vlog2.f32 %v1026_v1  ;;  %v1363_v16 = vand.u32 2147483647, %v7461_v0  ;;  %v530_v37 = vsel %vm439_vm4, %v6963_v33, %v529_v43 }
  0xd6   : > { %6016 = vpow2.f32 %v1778_v23  ;;  %v1372_v29 = vsub.f32 0.0, %v1364_v60  ;;  %v1030_v38 = vadd.f32 1.0, %v1029_v54  ;;  %537 = vst.msk [vmem:[#allocation2 + $0x39] sm:$0x7f] %vm536_vm12, %v530_v37  ;;  %v515_v7 = vsel %vm430_vm8, %v6959_v31, %v514_v9 }
  0xd7   : > { %v724_v8 = vsel %vm442_vm5, %v7120_v63, %v723_v4  ;;  %v725_v46 = vsel %vm424_vm0, %v7128_v14, %v7126_v13  ;;  %v1371_v18 = vsub.f32 0.0, %v1363_v16  ;;  %v516_v10 = vsel %vm433_vm2, %v6961_v32, %v515_v7 }
  0xd8   : > { %v1386_v52 = vmul.f32 1.442695, %v1372_v29  ;;  %v726_v30 = vsel %vm427_vm1, %v7143_v24, %v725_v46  ;;  %vm9682_vm11 = vcmask 64517   ;;  %vm9683_vm14 = vcmask 1045509  }
  0xd9   : > { %732 = vst.msk [vmem:[#allocation4 + $0x23] sm:$0xe0] %vm9682_vm11, %v724_v8  ;;  %v517_v31 = vsel %vm9683_vm14, %v6963_v33, %v516_v10  ;;  %v727_v61 = vsel %vm430_vm8, %v7145_v25, %v726_v30  ;;  %vm9684_vm7 = vmmov %vm9683_vm14  ;;  %v715_v5 = vsel %vm424_vm0, %v7143_v24, %v7128_v14  ;;  %v1384_v3 = vmul.f32 1.442695, %v1371_v18 }
  0xda   : > { %v712_v12 = vsel %vm9684_vm7, %v7102_v21, %v7002_v50  ;;  %v7505_v32 = vpop.eup %6008  ;;  %6018 = vpow2.f32 %v1386_v52  ;;  %524 = vst.msk [vmem:[#allocation2 + $0x32] sm:$0x3f] %vm523_vm13, %v517_v31  ;;  %v728_v33 = vsel %vm433_vm2, %v7136_v19, %v727_v61  ;;  %v1040_v51 = vmul.f32 %v6005_v59, %v1039_v56  ;;  %vm9687_vm14 = vmmov %vm9684_vm7 }
  0xdb   : > { %v713_v49 = vsel %vm439_vm4, %v7120_v63, %v712_v12  ;;  %v6011_v17 = vpop.eup %6010  ;;  %v1032_v22 = vand.u32 2147483647, %v7454_v40  ;;  %v1817_v35 = vadd.f32 1.0, %v7505_v32  ;;  %733 = vst.msk [vmem:[#allocation4 + $0x2b] sm:$0x1f] %vm510_vm9, %v728_v33  ;;  %6020 = vpow2.f32 %v1384_v3 }
  0xdc   : > { %v714_v34 = vsel %vm442_vm5, %v7126_v13, %v713_v49  ;;  %v6013_v2 = vpop.eup %6012  ;;  %v1792_v45 = vmul.f32 0.6931472, %v6011_v17  ;;  %v716_v26 = vsel %vm427_vm1, %v7145_v25, %v715_v5  ;;  %v636_v59 = vsel %vm424_vm0, %v6978_v42, %v6976_v41 }
  0xdd   : > { %721 = vst.msk [vmem:[#allocation4 + $0x1c] sm:$0xf0] %vm495_vm15, %v714_v34  ;;  %v1037_v1 = vmul.f32 0.6931472, %v6013_v2  ;;  %v954_v54 = vmax.f32 %v7359_v36, 0.0  ;;  %6022 = vlog2.f32 %v1817_v35  ;;  %v1820_v43 = vmul.f32 -0.5, %v7505_v32 }
  0xde   : > { %v1798_v9 = vsel %vm7467_vm3, %v1795_v53, %v1792_v45  ;;  %v1031_v23 = vmul.f32 %v7454_v40, %v1030_v38  ;;  %v7528_v60 = vld [vmem:[#allocation2 + $0x38] sm:$0xff]  ;;  %v717_v4 = vsel %vm430_vm8, %v7136_v19, %v716_v26  ;;  %v637_v56 = vsel %vm427_vm1, %v6992_v48, %v636_v59  ;;  %vm9693_vm3 = vmmov %vm9687_vm14 }
  0xdf   : > { %v6015_v41 = vpop.eup %6014  ;;  %v1862_v42 = vadd.f32 %v1798_v9, %v1750_v15  ;;  %v1043_v36 = vsel %vm7475_vm6, %v1040_v51, %v1037_v1  ;;  %vm7538_vm9 = vcmp.lt.f32.partialorder %v1032_v22, 0.0004427343  ;;  %v1753_v40 = vmax.f32 %v7408_v55, 0.0  ;;  %722 = vst.msk [vmem:[#allocation4 + $0x24] sm:$0xf] %vm497_vm10, %v717_v4  ;;  %vm9694_vm6 = vmmov %vm9693_vm3 }
  0xe0   : > { %v6017_v53 = vpop.eup %6016  ;;  %v1067_v29 = vadd.f32 %v1043_v36, %v955_v27  ;;  %v1028_v48 = vmul.f32 0.6931472, %v6015_v41  ;;  %v965_v16 = vand.u32 2147483647, %v7528_v60  ;;  %v638_v47 = vsel %vm430_vm8, %v9667_v44, %v637_v56 }
  0xe1   : > { %v5878_v15 = vadd.f32 -0.6931472, %v1862_v42  ;;  %v1821_v20 = vadd.f32 1.0, %v1820_v43  ;;  %v1808_v37 = vadd.f32 1.0, %v6017_v53  ;;  %v1811_v38 = vmul.f32 -0.5, %v6017_v53  ;;  %v7551_v46 = vld [vmem:[#allocation2 + $0x30] sm:$0xff] }
  0xe2   : > { %v5867_v7 = vadd.f32 -0.6931472, %v1067_v29  ;;  %v1034_v55 = vsel %vm7538_vm9, %v1031_v23, %v1028_v48  ;;  %v973_v8 = vsub.f32 0.0, %v965_v16  ;;  %v639_v11 = vsel %vm433_vm2, %v9668_v57, %v638_v47 }
  0xe3   : > { %1878 = vxpose.xlu0.b32.start.end [1/1] (short) (narrow) %v5878_v15, 8  ;;  %v1066_v27 = vadd.f32 %v1034_v55, %v954_v54  ;;  %v1823_v52 = vand.u32 2147483647, %v7505_v32  ;;  %6024 = vlog2.f32 %v1808_v37  ;;  %v1814_v44 = vand.u32 2147483647, %v6017_v53 }
  0xe4   : > { %v7556_v18 = vpop.eup %6018  ;;  %1238 = vxpose.xlu1.b32.start.end [1/1] (short) (narrow) %v5867_v7, 8  ;;  %v1752_v10 = vmax.f32 %v7440_v58, 0.0  ;;  %v988_v30 = vmul.f32 1.442695, %v973_v8  ;;  %v964_v31 = vand.u32 2147483647, %v7551_v46  ;;  %v640_v57 = vsel %vm9687_vm14, %v9669_v39, %v639_v11 }
  0xe5   : > { %v5866_v61 = vadd.f32 -0.6931472, %v1066_v27  ;;  %v1812_v12 = vadd.f32 1.0, %v1811_v38  ;;  %v1444_v5 = vadd.f32 1.0, %v7556_v18  ;;  %v7563_v3 = vpop.eup %6020  ;;  %v1822_v33 = vmul.f32 %v7505_v32, %v1821_v20  ;;  %v7573_v39 = vld [vmem:[#allocation4 + $0x28] sm:$0xff] }
  0xe6   : > { %v1447_v49 = vmul.f32 -0.5, %v7556_v18  ;;  %6026 = vpow2.f32 %v988_v30  ;;  %v972_v17 = vsub.f32 0.0, %v964_v31  ;;  %vm7567_vm15 = vcmp.lt.f32.partialorder %v1823_v52, 0.0004427343  ;;  %v7579_v45 = vld [vmem:[#allocation4 + $0x20] sm:$0xff] }
  0xe7   : > { %v6023_v51 = vpop.eup %6022  ;;  %1206 = vxpose.xlu0.b32.start.end [1/1] (short) (narrow) %v5866_v61, 8  ;;  %6028 = vlog2.f32 %v1444_v5  ;;  %v1435_v35 = vadd.f32 1.0, %v7563_v3  ;;  %v1438_v34 = vmul.f32 -0.5, %v7563_v3  ;;  %vm7575_vm10 = vcmp.lt.f32.partialorder %v1814_v44, 0.0004427343 }
  0xe8   : > { %v1819_v2 = vmul.f32 0.6931472, %v6023_v51  ;;  %v641_v26 = vsel %vm439_vm4, %v9673_v62, %v640_v57  ;;  %v745_v59 = vsel %vm424_vm0, %v7120_v63, %v7102_v21  ;;  %v1813_v1 = vmul.f32 %v6017_v53, %v1812_v12 }
  0xe9   : > { %v1450_v54 = vand.u32 2147483647, %v7556_v18  ;;  %6030 = vlog2.f32 %v1435_v35  ;;  %v986_v43 = vmul.f32 1.442695, %v972_v17  ;;  %646 = vst.msk [vmem:[#allocation3 + $0x39] sm:$0x7f] %vm536_vm12, %v641_v26  ;;  %v746_v6 = vsel %vm427_vm1, %v7126_v13, %v745_v59 }
  0xea   : > { %v1825_v9 = vsel %vm7567_vm15, %v1822_v33, %v1819_v2  ;;  %v1448_v23 = vadd.f32 1.0, %v1447_v49  ;;  %v1441_v4 = vand.u32 2147483647, %v7563_v3  ;;  %v1763_v56 = vand.u32 2147483647, %v7573_v39 }
  0xeb   : > { %v1865_v62 = vadd.f32 %v1825_v9, %v1753_v40  ;;  %v1439_v41 = vadd.f32 1.0, %v1438_v34  ;;  %6032 = vpow2.f32 %v986_v43  ;;  %v1762_v42 = vand.u32 2147483647, %v7579_v45 }
  0xec   : > { %v1771_v36 = vsub.f32 0.0, %v1763_v56  ;;  %v734_v53 = vsel %vm442_vm5, %v7102_v21, %v7002_v50  ;;  %v735_v29 = vsel %vm424_vm0, %v7126_v13, %v7120_v63  ;;  %v747_v40 = vsel %vm430_vm8, %v7128_v14, %v746_v6 }
  0xed   : > { %v6025_v48 = vpop.eup %6024  ;;  %v5881_v16 = vadd.f32 -0.6931472, %v1865_v62  ;;  %v1770_v47 = vsub.f32 0.0, %v1762_v42  ;;  %v736_v15 = vsel %vm427_vm1, %v7128_v14, %v735_v29  ;;  %vm9692_vm7 = vcmask 64518  }
  0xee   : > { %743 = vst.msk [vmem:[#allocation4 + $0x2a] sm:$0xc0] %vm9692_vm7, %v734_v53  ;;  %v1810_v20 = vmul.f32 0.6931472, %v6025_v48  ;;  %v1784_v37 = vmul.f32 1.442695, %v1771_v36  ;;  %v748_v50 = vsel %vm433_vm2, %v7143_v24, %v747_v40  ;;  %v737_v21 = vsel %vm430_vm8, %v7143_v24, %v736_v15 }
  0xef   : > { %1974 = vxpose.xlu1.b32.start.end [1/1] (short) (narrow) %v5881_v16, 8  ;;  %v1449_v63 = vmul.f32 %v7556_v18, %v1448_v23  ;;  %v1782_v13 = vmul.f32 1.442695, %v1770_v47  ;;  %v749_v38 = vsel %vm9693_vm3, %v7145_v25, %v748_v50  ;;  %v738_v14 = vsel %vm433_vm2, %v7145_v25, %v737_v21 }
  0xf0   : > { %v6027_v7 = vpop.eup %6026  ;;  %v1816_v55 = vsel %vm7575_vm10, %v1813_v1, %v1810_v20  ;;  %6034 = vpow2.f32 %v1784_v37  ;;  %v7617_v8 = vld [vmem:[#allocation3 + $0x38] sm:$0xff]  ;;  %v750_v24 = vsel %vm439_vm4, %v7136_v19, %v749_v38  ;;  %v739_v11 = vsel %vm9694_vm6, %v7136_v19, %v738_v14 }
  0xf1   : > { %v6029_v27 = vpop.eup %6028  ;;  %v1864_v52 = vadd.f32 %v1816_v55, %v1752_v10  ;;  %v1356_v44 = vmax.f32 %v7457_v28, 0.0  ;;  %vm7626_vm11 = vcmp.lt.f32.partialorder %v1450_v54, 0.0004427343  ;;  %v1053_v18 = vadd.f32 1.0, %v6027_v7  ;;  %755 = vst.msk [vmem:[#allocation4 + $0x39] sm:$0x7f] %vm536_vm12, %v750_v24 }
  0xf2   : > { %744 = vst.msk [vmem:[#allocation4 + $0x32] sm:$0x3f] %vm523_vm13, %v739_v11  ;;  %v1446_v30 = vmul.f32 0.6931472, %v6029_v27  ;;  %v1440_v31 = vmul.f32 %v7563_v3, %v1439_v41  ;;  %6036 = vpow2.f32 %v1782_v13  ;;  %v1365_v19 = vand.u32 2147483647, %v7617_v8 }
  0xf3   : > { %v6031_v61 = vpop.eup %6030  ;;  %v5880_v58 = vadd.f32 -0.6931472, %v1864_v52  ;;  %v1355_v10 = vmax.f32 %v7461_v0, 0.0  ;;  %vm1442_vm9 = vcmp.lt.f32.partialorder %v1441_v4, 0.0004427343  ;;  %6038 = vlog2.f32 %v1053_v18 }
  0xf4   : > { %v1452_v28 = vsel %vm7626_vm11, %v1449_v63, %v1446_v30  ;;  %v1437_v12 = vmul.f32 0.6931472, %v6031_v61  ;;  %v1056_v5 = vmul.f32 -0.5, %v6027_v7  ;;  %v1373_v57 = vsub.f32 0.0, %v1365_v19 }
  0xf5   : > { %v6033_v33 = vpop.eup %6032  ;;  %1942 = vxpose.xlu0.b32.start.end [1/1] (short) (narrow) %v5880_v58, 8  ;;  %v1468_v49 = vadd.f32 %v1452_v28, %v1356_v44  ;;  %v1059_v2 = vand.u32 2147483647, %v6027_v7  ;;  %v957_v56 = vmax.f32 %v7528_v60, 0.0  ;;  %v956_v60 = vmax.f32 %v7551_v46, 0.0 }
  0xf6   : > { %v1443_v17 = vsel %vm1442_vm9, %v1440_v31, %v1437_v12  ;;  %v1044_v3 = vadd.f32 1.0, %v6033_v33  ;;  %v1388_v35 = vmul.f32 1.442695, %v1373_v57  ;;  %v1057_v34 = vadd.f32 1.0, %v1056_v5 }
  0xf7   : > { %v5876_v51 = vadd.f32 -0.6931472, %v1468_v49  ;;  %v1467_v22 = vadd.f32 %v1443_v17, %v1355_v10  ;;  %v1047_v59 = vmul.f32 -0.5, %v6033_v33  ;;  %vm1060_vm13 = vcmp.lt.f32.partialorder %v1059_v2, 0.0004427343 }
  0xf8   : > { %6040 = vlog2.f32 %v1044_v3  ;;  %v7637_v0 = vld [vmem:[#allocation4 + $0x38] sm:$0xff]  ;;  %v1058_v62 = vmul.f32 %v6027_v7, %v1057_v34  ;;  %v1050_v29 = vand.u32 2147483647, %v6033_v33  ;;  %v1755_v25 = vmax.f32 %v7573_v39, 0.0 }
  0xf9   : > { %v7639_v32 = vld [vmem:[#allocation4 + $0x30] sm:$0xff]  ;;  %1670 = vxpose.xlu1.b32.start.end [1/1] (short) (narrow) %v5876_v51, 8  ;;  %v5875_v26 = vadd.f32 -0.6931472, %v1467_v22  ;;  %6042 = vpow2.f32 %v1388_v35  ;;  %v1765_v1 = vand.u32 2147483647, %v7637_v0 }
  0xfa   : > { %v6035_v54 = vpop.eup %6034  ;;  %v1764_v43 = vand.u32 2147483647, %v7639_v32  ;;  %v1048_v36 = vadd.f32 1.0, %v1047_v59  ;;  %vm1051_vm12 = vcmp.lt.f32.partialorder %v1050_v29, 0.0004427343  ;;  %v1754_v61 = vmax.f32 %v7579_v45, 0.0 }
  0xfb   : > { %1638 = vxpose.xlu0.b32.start.end [1/1] (short) (narrow) %v5875_v26, 8  ;;  %v1835_v9 = vadd.f32 1.0, %v6035_v54  ;;  %v1773_v23 = vsub.f32 0.0, %v1765_v1  ;;  %v1838_v48 = vmul.f32 -0.5, %v6035_v54  ;;  %v1841_v14 = vand.u32 2147483647, %v6035_v54 }
  0xfc   : > { %v6037_v4 = vpop.eup %6036  ;;  %v1772_v41 = vsub.f32 0.0, %v1764_v43  ;;  %v1049_v37 = vmul.f32 %v6033_v33, %v1048_v36  ;;  %v1357_v2 = vmax.f32 %v7617_v8, 0.0  ;;  %vm9701_vm11 = vcmask 64512  }
  0xfd   : > { %v6039_v42 = vpop.eup %6038  ;;  %6044 = vlog2.f32 %v1835_v9  ;;  %v1826_v6 = vadd.f32 1.0, %v6037_v4  ;;  %v1788_v16 = vmul.f32 1.442695, %v1773_v23  ;;  %v1829_v15 = vmul.f32 -0.5, %v6037_v4  ;;  %vm9703_vm9 = vmmov %vm9701_vm11 }
  0xfe   : > { %v1055_v53 = vmul.f32 0.6931472, %v6039_v42  ;;  %v1786_v47 = vmul.f32 1.442695, %v1772_v41  ;;  %v1839_v21 = vadd.f32 1.0, %v1838_v48  ;;  %v1757_v42 = vmax.f32 %v7637_v0, 0.0 }
  0xff   : > { %6046 = vlog2.f32 %v1826_v6  ;;  %v1830_v7 = vadd.f32 1.0, %v1829_v15  ;;  %v1832_v11 = vand.u32 2147483647, %v6037_v4  ;;  %vm1842_vm14 = vcmp.lt.f32.partialorder %v1841_v14, 0.0004427343 }
 0x100   : > { %v1061_v40 = vsel %vm1060_vm13, %v1058_v62, %v1055_v53  ;;  %6048 = vpow2.f32 %v1788_v16  ;;  %v1840_v52 = vmul.f32 %v6035_v54, %v1839_v21  ;;  %v1756_v53 = vmax.f32 %v7639_v32, 0.0  ;;  %vm9706_vm13 = vmmov %vm9703_vm9 }
 0x101   : > { %v1069_v20 = vadd.f32 %v1061_v40, %v957_v56  ;;  %6050 = vpow2.f32 %v1786_v47  ;;  %v1831_v31 = vmul.f32 %v6037_v4, %v1830_v7  ;;  %vm1833_vm15 = vcmp.lt.f32.partialorder %v1832_v11, 0.0004427343 }
 0x102   : > { %v6041_v50 = vpop.eup %6040  ;;  %v9697_v14 = vlaneseq }
 0x103   : > { %v6043_v63 = vpop.eup %6042  ;;  %v5869_v13 = vadd.f32 -0.6931472, %v1069_v20  ;;  %v1046_v38 = vmul.f32 0.6931472, %v6041_v50  ;;  %v842_v50 = vpop.permute.xlu1 %841 }
 0x104   : > { %v1453_v55 = vadd.f32 1.0, %v6043_v63  ;;  %v1456_v46 = vmul.f32 -0.5, %v6043_v63  ;;  %v1459_v49 = vand.u32 2147483647, %v6043_v63  ;;  %v7661_v7 = vand.u32 127, %v9697_v14 }
 0x105   : > { %1302 = vxpose.xlu1.b32.start.end [1/1] (short) (narrow) %v5869_v13, 8  ;;  %v1052_v24 = vsel %vm1051_vm12, %v1049_v37, %v1046_v38  ;;  %v828_v37 = vpop.permute.xlu0 %827  ;;  %vm9707_vm12 = vmmov %vm9703_vm9 }
 0x106   : > { %v1068_v27 = vadd.f32 %v1052_v24, %v956_v60  ;;  %6052 = vlog2.f32 %v1453_v55  ;;  %v1457_v5 = vadd.f32 1.0, %v1456_v46  ;;  %vm1460_vm10 = vcmp.lt.f32.partialorder %v1459_v49, 0.0004427343 }
 0x107   : > { %v6045_v44 = vpop.eup %6044  ;;  %v849_v0 = vpop.permute.xlu1 %848  ;;  %v6644_v55 = vmov 1966171168  }
 0x108   : > { %v5868_v18 = vadd.f32 -0.6931472, %v1068_v27  ;;  %v1837_v30 = vmul.f32 0.6931472, %v6045_v44  ;;  %v1458_v35 = vmul.f32 %v6043_v63, %v1457_v5  ;;  %v775_v24 = vunpack.c.l.s4 %v6644_v55  ;;  %v9699_v5 = vld [vmem:[#allocation15_spill] sm:$0xff] }
 0x109   : > { %v6047_v19 = vpop.eup %6046  ;;  %v835_v60 = vpop.permute.xlu0 %834 }
 0x10a   : > { %1270 = vxpose.xlu0.b32.start.end [1/1] (short) (narrow) %v5868_v18, 8  ;;  %v1843_v58 = vsel %vm1842_vm14, %v1840_v52, %v1837_v30  ;;  %v1828_v10 = vmul.f32 0.6931472, %v6047_v19  ;;  %v6049_v28 = vpop.eup %6048  ;;  %v9698_v52 = vld [vmem:[#allocation12_spill] sm:$0xff]  ;;  %v776_v44 = vunpack.c.0.s8 %v775_v24  ;;  %vm9710_vm14 = vmmov %vm9703_vm9 }
 0x10b   : > { %v1867_v12 = vadd.f32 %v1843_v58, %v1755_v25  ;;  %v6051_v57 = vpop.eup %6050  ;;  %v1853_v17 = vadd.f32 1.0, %v6049_v28  ;;  %v1856_v34 = vmul.f32 -0.5, %v6049_v28  ;;  %v1859_v9 = vand.u32 2147483647, %v6049_v28  ;;  %v7652_v63 = vpop.permute.xlu1 %862  ;;  %v6446_v19 = vld [vmem:[%s6903_s18] sm:$0xff] }
 0x10c   : > { %v1834_v33 = vsel %vm1833_vm15, %v1831_v31, %v1828_v10  ;;  %v1844_v51 = vadd.f32 1.0, %v6051_v57  ;;  %v1847_v26 = vmul.f32 -0.5, %v6051_v57  ;;  %v1850_v4 = vand.u32 2147483647, %v6051_v57  ;;  %vm9711_vm15 = vmmov %vm9703_vm9 }
 0x10d   : > { %v5883_v39 = vadd.f32 -0.6931472, %v1867_v12  ;;  %v1866_v3 = vadd.f32 %v1834_v33, %v1754_v61  ;;  %6054 = vlog2.f32 %v1853_v17  ;;  %v1857_v54 = vadd.f32 1.0, %v1856_v34  ;;  %v7650_v21 = vpop.permute.xlu0 %855 }
 0x10e   : > { %6056 = vlog2.f32 %v1844_v51  ;;  %v1848_v23 = vadd.f32 1.0, %v1847_v26  ;;  %vm1860_vm7 = vcmp.lt.f32.partialorder %v1859_v9, 0.0004427343  ;;  %vm1851_vm3 = vcmp.lt.f32.partialorder %v1850_v4, 0.0004427343 }
 0x10f   : > { %2038 = vxpose.xlu1.b32.start.end [1/1] (short) (narrow) %v5883_v39, 8  ;;  %v5882_v22 = vadd.f32 -0.6931472, %v1866_v3  ;;  %v1858_v62 = vmul.f32 %v6049_v28, %v1857_v54  ;;  %v7658_v38 = vpop.permute.xlu1 %876  ;;  %vm765_vm6 = vcmp.ne.s32.totalorder %v9698_v52, %v7661_v7  ;;  %v6645_v25 = vmov 0.0  }
 0x110   : > { %v6053_v45 = vpop.eup %6052  ;;  %v1849_v36 = vmul.f32 %v6051_v57, %v1848_v23  ;;  %v7669_v46 = vsel %vm765_vm6, 1.0, %v6645_v25  ;;  %v779_v31 = vsub.s32 %v776_v44, %v9698_v52 }
 0x111   : > { %2006 = vxpose.xlu0.b32.start.end [1/1] (short) (narrow) %v5882_v22, 8  ;;  %v1455_v59 = vmul.f32 0.6931472, %v6053_v45  ;;  %v7654_v32 = vpop.permute.xlu0 %869  ;;  %v771_v61 = vmul.f32 %v6446_v19, %v7669_v46 }
 0x113   : > { %v1461_v1 = vsel %vm1460_vm10, %v1458_v35, %v1455_v59  ;;  %v780_v58 = vrot.slane %v771_v61, %v779_v31  ;;  %vm9714_vm10 = vmmov %vm9703_vm9 }
 0x114   : > { %v1469_v43 = vadd.f32 %v1461_v1, %v1357_v2 }
 0x115   : > { %v796_v12 = vrot.slane %v780_v58, %v779_v31  ;;  %v788_v33 = vcombine.high %v780_v58, %v780_v58 }
 0x116   : > { %v5877_v56 = vadd.f32 -0.6931472, %v1469_v43 }
 0x117   : > { %v6055_v41 = vpop.eup %6054  ;;  %v881_v57 = vrot.slane %v796_v12, %v9699_v5  ;;  %v810_v3 = vrot.slane %v788_v33, %v779_v31  ;;  %v818_v43 = vcombine.high %v796_v12, %v796_v12 }
 0x118   : > { %1702 = vxpose.xlu0.b32.start.end [1/1] (short) (narrow) %v5877_v56, 8  ;;  %v6057_v6 = vpop.eup %6056  ;;  %v1855_v8 = vmul.f32 0.6931472, %v6055_v41 }
 0x119   : > { %v1846_v29 = vmul.f32 0.6931472, %v6057_v6  ;;  %v918_v39 = vmul.f32 %v881_v57, %v828_v37  ;;  %v820_v45 = vcombine.high %v810_v3, %v810_v3  ;;  %v889_v23 = vrot.slane %v818_v43, %v9699_v5 }
 0x11a   : > { %v1861_v48 = vsel %vm1860_vm7, %v1858_v62, %v1855_v8  ;;  %vm9715_vm7 = vmmov %vm9703_vm9 }
 0x11b   : > { %v1869_v16 = vadd.f32 %v1861_v48, %v1757_v42  ;;  %v1852_v47 = vsel %vm1851_vm3, %v1849_v36, %v1846_v29  ;;  %v7694_v34 = vmul.f32 %v7669_v46, %v918_v39  ;;  %v893_v59 = vrot.slane %v820_v45, %v9699_v5 }
 0x11c   : > { %v1868_v40 = vadd.f32 %v1852_v47, %v1756_v53  ;;  %v885_v42 = vrot.slane %v810_v3, %v9699_v5  ;;  %v920_v6 = vmul.f32 %v889_v23, %v842_v50  ;;  %v773_v50 = vcombine.high %v771_v61, %v771_v61 }
 0x11d   : > { %v5885_v15 = vadd.f32 -0.6931472, %v1869_v16  ;;  %9700 = vst [vmem:[#allocation23_spill] sm:$0xff] %v7694_v34  ;;  %v921_v9 = vmul.f32 %v893_v59, %v849_v0  ;;  %vm9717_vm3 = vcmask 1045509  }
 0x11e   : > { %v5884_v20 = vadd.f32 -0.6931472, %v1868_v40  ;;  %v919_v53 = vmul.f32 %v885_v42, %v835_v60  ;;  %v7723_v40 = vmul.f32 %v7669_v46, %v920_v6  ;;  %v787_v55 = vrot.slane %v773_v50, %v779_v31 }
 0x11f   : > { %2102 = vxpose.xlu1.b32.start.end [1/1] (short) (narrow) %v5885_v15, 8  ;;  %v7710_v41 = vmul.f32 %v7669_v46, %v921_v9 }
 0x120   : > { %2070 = vxpose.xlu0.b32.start.end [1/1] (short) (narrow) %v5884_v20, 8  ;;  %9704 = vst [vmem:[#allocation25_spill] sm:$0xff] %v7723_v40  ;;  %v7728_v37 = vmul.f32 %v7669_v46, %v919_v53  ;;  %v789_v44 = vcombine.high %v787_v55, %v787_v55  ;;  %v803_v12 = vrot.slane %v787_v55, %v779_v31 }
 0x121   : > { %9702 = vst [vmem:[#allocation24_spill] sm:$0xff] %v7710_v41 }
 0x122   : > { %9705 = vst [vmem:[#allocation26_spill] sm:$0xff] %v7728_v37  ;;  %v817_v19 = vrot.slane %v789_v44, %v779_v31  ;;  %v897_v33 = vrot.slane %v803_v12, %v9699_v5  ;;  %v819_v42 = vcombine.high %v803_v12, %v803_v12 }
 0x124   : > { %v901_v61 = vrot.slane %v817_v19, %v9699_v5 }
 0x126   : > { %v923_v3 = vmul.f32 %v901_v61, %v7652_v63  ;;  %v7794_v61 = vsub.s32 %v7661_v7, %v9698_v52 }
 0x128   : > { %9716 = vst [vmem:[#allocation28_spill] sm:$0xff] %v7794_v61 }
 0x131   : > { %v7656_v13 = vpop.trf.xlu0 }
 0x134   : > { %v7663_v11 = vpop.trf.xlu1 }
 0x135   : > { %v7665_v27 = vpop.trf.xlu0  ;;  %v2137_v4 = vadd.f32 %v7663_v11, %v7656_v13 }
 0x138   : > { %v7671_v18 = vpop.trf.xlu1 }
 0x139   : > { %v2136_v29 = vadd.f32 %v7671_v18, %v7665_v27 }
 0x13b   : > { %v7673_v30 = vpop.trf.xlu0 }
 0x13c   : > { %v7678_v10 = vpop.trf.xlu1 }
 0x13d   : > { %v2135_v48 = vadd.f32 %v7673_v30, %v7678_v10 }
 0x141   : > { %v7680_v28 = vpop.trf.xlu0 }
 0x14b   : > { %v7683_v49 = vpop.trf.xlu1 }
 0x14c   : > { %v2143_v15 = vadd.f32 %v2135_v48, %v7683_v49 }
 0x14d   : > { %v7685_v17 = vpop.trf.xlu0 }
 0x14e   : > { %v2134_v51 = vadd.f32 %v7685_v17, %v7680_v28  ;;  %v2151_v14 = vmul.f32 %v2143_v15, %v7728_v37 }
 0x150   : > { %v2161_v24 = vsel %vm9707_vm12, %v2151_v14, 0.0 }
 0x153   : > { %v7689_v22 = vpop.trf.xlu1 }
 0x163   : > { %v7691_v35 = vpop.trf.xlu0 }
 0x164   : > { %v2142_v2 = vadd.f32 %v2134_v51, %v7691_v35  ;;  %v7700_v54 = vpop.trf.xlu1  ;;  %v922_v51 = vmul.f32 %v897_v33, %v7650_v21 }
 0x166   : > { %v2150_v26 = vmul.f32 %v2142_v2, %v7694_v34  ;;  %v7759_v43 = vmul.f32 %v7669_v46, %v922_v51 }
 0x167   : > { %v7705_v56 = vpop.trf.xlu0 }
 0x168   : > { %v2158_v1 = vsel %vm9701_vm11, %v2150_v26, 0.0  ;;  %v7751_v26 = vmul.f32 %v7669_v46, %v923_v3  ;;  %v2138_v31 = vadd.f32 %v7689_v22, %v7705_v56  ;;  %9709 = vst [vmem:[#allocation21_spill] sm:$0xff] %v7759_v43 }
 0x169   : > { %2159 = vadd.xlane.f32.xlu0 %v2158_v1 }
 0x16a   : > { %9708 = vst [vmem:[#allocation22_spill] sm:$0xff] %v7751_v26 }
 0x16f   : > { %v7707_v62 = vpop.trf.xlu1 }
 0x170   : > { %v2145_v36 = vadd.f32 %v2137_v4, %v7707_v62  ;;  %v821_v4 = vcombine.high %v817_v19, %v817_v19 }
 0x172   : > { %v2153_v8 = vmul.f32 %v2145_v36, %v7710_v41  ;;  %v909_v6 = vrot.slane %v821_v4, %v9699_v5 }
 0x174   : > { %v2167_v16 = vsel %vm9703_vm9, %v2153_v8, 0.0  ;;  %v905_v8 = vrot.slane %v819_v42, %v9699_v5 }
 0x175   : > { %v7720_v47 = vpop.trf.xlu0  ;;  %2168 = vadd.xlane.f32.xlu0 %v2167_v16 }
 0x176   : > { %v2144_v20 = vadd.f32 %v2136_v29, %v7720_v47  ;;  %v925_v29 = vmul.f32 %v909_v6, %v7658_v38  ;;  %v924_v16 = vmul.f32 %v905_v8, %v7654_v32 }
 0x178   : > { %v2152_v60 = vmul.f32 %v2144_v20, %v7723_v40  ;;  %v7779_v50 = vmul.f32 %v7669_v46, %v925_v29  ;;  %v7785_v14 = vmul.f32 %v7669_v46, %v924_v16 }
 0x179   : > { %v7734_v25 = vpop.trf.xlu1 }
 0x17a   : > { %v2164_v0 = vsel %vm9706_vm13, %v2152_v60, 0.0  ;;  %9712 = vst [vmem:[#allocation12_spill] sm:$0xff] %v7779_v50  ;;  %9713 = vst [vmem:[#allocation27_spill] sm:$0xff] %v7785_v14 }
 0x17b   : > { %2165 = vadd.xlane.f32.xlu1 %v2164_v0  ;;  %v7736_v58 = vpop.trf.xlu0 }
 0x17c   : > { %v2139_v45 = vadd.f32 %v7736_v58, %v7700_v54 }
 0x17f   : > { %2162 = vadd.xlane.f32.xlu1 %v2161_v24 }
 0x185   : > { %v7739_v57 = vpop.trf.xlu1 }
 0x18a   : > { %v7742_v39 = vpop.trf.xlu0 }
 0x18b   : > { %v2140_v15 = vadd.f32 %v7734_v25, %v7742_v39 }
 0x18f   : > { %v7748_v2 = vpop.trf.xlu1 }
 0x190   : > { %v2147_v59 = vadd.f32 %v2139_v45, %v7748_v2 }
 0x191   : > { %v7756_v1 = vpop.trf.xlu0 }
 0x192   : > { %v2146_v21 = vadd.f32 %v2138_v31, %v7756_v1  ;;  %v2155_v63 = vmul.f32 %v2147_v59, %v7751_v26  ;;  %v6450_v26 = vld [vmem:[#allocation3 + $0x10] sm:$0xff] }
 0x194   : > { %v2173_v9 = vsel %vm9710_vm14, %v2155_v63, 0.0  ;;  %v2154_v23 = vmul.f32 %v2146_v21, %v7759_v43 }
 0x195   : > { %2174 = vadd.xlane.f32.xlu0 %v2173_v9 }
 0x196   : > { %v2170_v36 = vsel %vm9711_vm15, %v2154_v23, 0.0 }
 0x197   : > { %2171 = vadd.xlane.f32.xlu1 %v2170_v36 }
 0x198   : > { %v7768_v53 = vpop.trf.xlu0 }
 0x199   : > { %v2141_v48 = vadd.f32 %v7768_v53, %v7739_v57 }
 0x19f   : > { %v7776_v20 = vpop.trf.xlu1 }
 0x1a0   : > { %v2149_v60 = vadd.f32 %v2141_v48, %v7776_v20  ;;  %v7782_v0 = vpop.trf.xlu0  ;;  %v756_v48 = vld [vmem:[%s7811_s7] sm:$0xff] }
 0x1a1   : > { %v2148_v38 = vadd.f32 %v2140_v15, %v7782_v0 }
 0x1a2   : > { %v2157_v55 = vmul.f32 %v2149_v60, %v7779_v50 }
 0x1a3   : > { %v2156_v32 = vmul.f32 %v2148_v38, %v7785_v14  ;;  %v9718_v38 = vld [vmem:[#allocation17_spill] sm:$0xff] }
 0x1a4   : > { %v2179_v24 = vsel %vm9714_vm10, %v2157_v55, 0.0 }
 0x1a5   : > { %2180 = vadd.xlane.f32.xlu0 %v2179_v24  ;;  %v2176_v44 = vsel %vm9715_vm7, %v2156_v32, 0.0  ;;  %v9719_v24 = vld [vmem:[#allocation19_spill] sm:$0xff] }
 0x1a6   : > { %2177 = vadd.xlane.f32.xlu1 %v2176_v44 }
 0x1f6   : > { %v2160_v46 = vpop.xlane.xlu0 %2159 }
 0x1f7   : > { %v2193_v3 = vrot.slane %v2160_v46, %v7794_v61  ;;  %v9721_v46 = vld [vmem:[#allocation20_spill] sm:$0xff] }
 0x202   : > { %v2169_v51 = vpop.xlane.xlu0 %2168 }
 0x203   : > { %v2205_v7 = vrot.slane %v2169_v51, %v7794_v61 }
 0x208   : > { %v2166_v19 = vpop.xlane.xlu1 %2165 }
 0x209   : > { %v2201_v59 = vrot.slane %v2166_v19, %v7794_v61  ;;  %v9720_v19 = vld [vmem:[#allocation13_spill] sm:$0xff] }
 0x20c   : > { %v2163_v12 = vpop.xlane.xlu1 %2162 }
 0x20d   : > { %v2197_v33 = vrot.slane %v2163_v12, %v7794_v61 }
 0x20f   : > { %v2222_v45 = vsel %vm424_vm0, %v2197_v33, %v2193_v3  ;;  %v9722_v3 = vld [vmem:[#allocation14_spill] sm:$0xff] }
 0x210   : > { %v2223_v21 = vsel %vm427_vm1, %v2201_v59, %v2222_v45  ;;  %v9723_v45 = vld [vmem:[#allocation16_spill] sm:$0xff]  ;;  %v9724_v59 = vld [vmem:[#allocation18_spill] sm:$0xff] }
 0x211   : > { %v2224_v52 = vsel %vm430_vm8, %v2205_v7, %v2223_v21 }
 0x222   : > { %v2175_v9 = vpop.xlane.xlu0 %2174 }
 0x223   : > { %v2213_v23 = vrot.slane %v2175_v9, %v7794_v61 }
 0x224   : > { %v2172_v31 = vpop.xlane.xlu1 %2171 }
 0x225   : > { %v2209_v63 = vrot.slane %v2172_v31, %v7794_v61 }
 0x227   : > { %v2225_v4 = vsel %vm433_vm2, %v2209_v63, %v2224_v52 }
 0x228   : > { %v2226_v8 = vsel %vm9717_vm3, %v2213_v23, %v2225_v4 }
 0x232   : > { %v2181_v42 = vpop.xlane.xlu0 %2180 }
 0x233   : > { %v2178_v36 = vpop.xlane.xlu1 %2177  ;;  %v2221_v29 = vrot.slane %v2181_v42, %v7794_v61  ;;  %v6447_v42 = vld [vmem:[#allocation2 + $0x8] sm:$0xff] }
 0x234   : > { %v2217_v6 = vrot.slane %v2178_v36, %v7794_v61 }
 0x236   : > { %v2227_v16 = vsel %vm439_vm4, %v2217_v6, %v2226_v8 }
 0x237   : > { %v2228_v15 = vsel %vm442_vm5, %v2221_v29, %v2227_v16  ;;  %v6448_v29 = vld [vmem:[#allocation2] sm:$0xff] }
 0x238   : > { %v2230_v60 = vadd.f32 %v2228_v15, %v756_v48 }
 0x23a   : > { %v2241_v55 = vrot.slane %v2230_v60, %v9718_v38  ;;  %v2234_v32 = vrot.slane %v2230_v60, %v9699_v5  ;;  %v2262_v44 = vrot.slane %v2230_v60, %v9719_v24  ;;  %v2248_v12 = vrot.slane %v2230_v60, %v9720_v19 }
 0x23b   : > { %v2276_v33 = vrot.slane %v2230_v60, %v9721_v46  ;;  %v2255_v51 = vrot.slane %v2230_v60, %v9722_v3  ;;  %v2269_v31 = vrot.slane %v2230_v60, %v9723_v45  ;;  %v2283_v21 = vrot.slane %v2230_v60, %v9724_v59 }
 0x23c   : > { %2243 = vbcast.lane.b32.xlu0 %v2241_v55, 256  ;;  %2236 = vbcast.lane.b32.xlu1 %v2234_v32, 256 }
 0x240   : > { %2264 = vbcast.lane.b32.xlu0 %v2262_v44, 256  ;;  %2250 = vbcast.lane.b32.xlu1 %v2248_v12, 256 }
 0x244   : > { %2278 = vbcast.lane.b32.xlu0 %v2276_v33, 256  ;;  %2257 = vbcast.lane.b32.xlu1 %v2255_v51, 256 }
 0x248   : > { %2271 = vbcast.lane.b32.xlu1 %v2269_v31, 256 }
 0x24c   : > { %2285 = vbcast.lane.b32.xlu1 %v2283_v21, 256 }
 0x2ae   : > { %v2244_v63 = vpop.permute.xlu0 %2243  ;;  %v2237_v9 = vpop.permute.xlu1 %2236 }
 0x2af   : > { %v7828_v7 = vsub.f32 %v2244_v63, %v7678_v10  ;;  %v7831_v52 = vsub.f32 %v2244_v63, %v7673_v30  ;;  %v7834_v23 = vsub.f32 %v2237_v9, %v7680_v28  ;;  %v7837_v4 = vsub.f32 %v2244_v63, %v7683_v49 }
 0x2b0   : > { %v7844_v8 = vsub.f32 %v2237_v9, %v7685_v17  ;;  %v7847_v10 = vsub.f32 %v2237_v9, %v7691_v35 }
 0x2b1   : > { %v7840_v36 = vadd.f32 %v6447_v42, %v7828_v7  ;;  %v2432_v6 = vand.u32 2147483647, %v7828_v7  ;;  %v2952_v30 = vand.u32 2147483647, %v7831_v52  ;;  %v7851_v28 = vadd.f32 %v6448_v29, %v7834_v23 }
 0x2b2   : > { %v3472_v49 = vand.u32 2147483647, %v7837_v4  ;;  %v2431_v48 = vand.u32 2147483647, %v7834_v23  ;;  %v2265_v16 = vpop.permute.xlu0 %2264  ;;  %v2951_v17 = vand.u32 2147483647, %v7844_v8  ;;  %v2251_v12 = vpop.permute.xlu1 %2250 }
 0x2b3   : > { %v2312_v15 = vand.u32 2147483647, %v7840_v36  ;;  %v2440_v60 = vsub.f32 0.0, %v2432_v6  ;;  %v3471_v55 = vand.u32 2147483647, %v7847_v10  ;;  %v2960_v35 = vsub.f32 0.0, %v2952_v30 }
 0x2b4   : > { %v2311_v32 = vand.u32 2147483647, %v7851_v28  ;;  %v7860_v44 = vsub.f32 %v2265_v16, %v7705_v56  ;;  %v3480_v33 = vsub.f32 0.0, %v3472_v49  ;;  %v2439_v51 = vsub.f32 0.0, %v2431_v48 }
 0x2b5   : > { %v7863_v31 = vsub.f32 %v2265_v16, %v7689_v22  ;;  %v2320_v21 = vsub.f32 0.0, %v2312_v15  ;;  %v2449_v63 = vmul.f32 1.442695, %v2440_v60  ;;  %v7866_v9 = vsub.f32 %v2265_v16, %v7756_v1 }
 0x2b6   : > { %v2959_v42 = vsub.f32 0.0, %v2951_v17  ;;  %v3479_v6 = vsub.f32 0.0, %v3471_v55  ;;  %v7869_v30 = vsub.f32 %v2251_v12, %v7665_v27  ;;  %v2279_v29 = vpop.permute.xlu0 %2278  ;;  %v2969_v59 = vmul.f32 1.442695, %v2960_v35  ;;  %v2258_v17 = vpop.permute.xlu1 %2257 }
 0x2b7   : > { %9725 = vst [vmem:[#allocation29_spill] sm:$0xff] %v7866_v9  ;;  %v2319_v56 = vsub.f32 0.0, %v2311_v32  ;;  %v2435_v45 = vand.u32 2147483647, %v7860_v44  ;;  %v7873_v49 = vsub.f32 %v2251_v12, %v7671_v18  ;;  %v3489_v22 = vmul.f32 1.442695, %v3480_v33 }
 0x2b8   : > { %v2447_v48 = vmul.f32 1.442695, %v2439_v51  ;;  %v2955_v15 = vand.u32 2147483647, %v7863_v31  ;;  %v7877_v1 = vsub.f32 %v2251_v12, %v7720_v47  ;;  %v2329_v16 = vmul.f32 1.442695, %v2320_v21 }
 0x2b9   : > { %6058 = vpow2.f32 %v2449_v63  ;;  %v3475_v27 = vand.u32 2147483647, %v7866_v9  ;;  %v7881_v60 = vsub.f32 %v2279_v29, %v7742_v39  ;;  %v2967_v55 = vmul.f32 1.442695, %v2959_v42  ;;  %v6451_v9 = vld [vmem:[#allocation3 + $0x8] sm:$0xff] }
 0x2ba   : > { %v3487_v35 = vmul.f32 1.442695, %v3479_v6  ;;  %v2433_v18 = vand.u32 2147483647, %v7869_v30  ;;  %v7885_v32 = vsub.f32 %v2279_v29, %v7734_v25  ;;  %6060 = vpow2.f32 %v2969_v59 }
 0x2bb   : > { %9726 = vst [vmem:[#allocation30_spill] sm:$0xff] %v7881_v60  ;;  %v2327_v33 = vmul.f32 1.442695, %v2319_v56  ;;  %v2443_v51 = vsub.f32 0.0, %v2435_v45  ;;  %v2953_v47 = vand.u32 2147483647, %v7873_v49  ;;  %v7890_v63 = vsub.f32 %v2279_v29, %v7782_v0 }
 0x2bc   : > { %9727 = vst [vmem:[#allocation31_spill] sm:$0xff] %v7885_v32  ;;  %v2963_v12 = vsub.f32 0.0, %v2955_v15  ;;  %v3473_v21 = vand.u32 2147483647, %v7877_v1  ;;  %v7893_v39 = vsub.f32 %v2258_v17, %v7656_v13  ;;  %6062 = vpow2.f32 %v2329_v16 }
 0x2bd   : > { %9728 = vst [vmem:[#allocation32_spill] sm:$0xff] %v7890_v63  ;;  %v3483_v42 = vsub.f32 0.0, %v3475_v27  ;;  %v2437_v6 = vand.u32 2147483647, %v7881_v60  ;;  %v7897_v25 = vsub.f32 %v2258_v17, %v7663_v11  ;;  %6064 = vpow2.f32 %v3489_v22 }
 0x2be   : > { %v2441_v45 = vsub.f32 0.0, %v2433_v18  ;;  %v2957_v59 = vand.u32 2147483647, %v7885_v32  ;;  %v7901_v56 = vsub.f32 %v2258_v17, %v7707_v62  ;;  %6066 = vpow2.f32 %v2327_v33  ;;  %v2272_v17 = vpop.permute.xlu1 %2271 }
 0x2bf   : > { %v2455_v0 = vmul.f32 1.442695, %v2443_v51  ;;  %v2961_v29 = vsub.f32 0.0, %v2953_v47  ;;  %v3477_v13 = vand.u32 2147483647, %v7890_v63  ;;  %6068 = vpow2.f32 %v2447_v48 }
 0x2c0   : > { %v2975_v15 = vmul.f32 1.442695, %v2963_v12  ;;  %v3481_v16 = vsub.f32 0.0, %v3473_v21  ;;  %v2434_v27 = vand.u32 2147483647, %v7893_v39  ;;  %6070 = vpow2.f32 %v2967_v55 }
 0x2c1   : > { %v3495_v11 = vmul.f32 1.442695, %v3483_v42  ;;  %v2445_v3 = vsub.f32 0.0, %v2437_v6  ;;  %v2954_v22 = vand.u32 2147483647, %v7897_v25  ;;  %6072 = vpow2.f32 %v3487_v35 }
 0x2c2   : > { %v2451_v18 = vmul.f32 1.442695, %v2441_v45  ;;  %v2965_v46 = vsub.f32 0.0, %v2957_v59  ;;  %v3474_v62 = vand.u32 2147483647, %v7901_v56  ;;  %6074 = vpow2.f32 %v2455_v0 }
 0x2c3   : > { %v7907_v33 = vpop.eup %6058  ;;  %v2971_v51 = vmul.f32 1.442695, %v2961_v29  ;;  %v3485_v48 = vsub.f32 0.0, %v3477_v13  ;;  %6076 = vpow2.f32 %v2975_v15  ;;  %v3491_v47 = vmul.f32 1.442695, %v3481_v16  ;;  %v2286_v16 = vpop.permute.xlu1 %2285 }
 0x2c4   : > { %v2442_v12 = vsub.f32 0.0, %v2434_v27  ;;  %v7909_v21 = vpop.eup %6060  ;;  %6078 = vpow2.f32 %v3495_v11  ;;  %v2459_v55 = vmul.f32 1.442695, %v2445_v3  ;;  %v2962_v42 = vsub.f32 0.0, %v2954_v22 }
 0x2c5   : > { %v7912_v35 = vsub.f32 %v2272_v17, %v7700_v54  ;;  %6080 = vpow2.f32 %v2451_v18  ;;  %v2979_v6 = vmul.f32 1.442695, %v2965_v46  ;;  %v3482_v45 = vsub.f32 0.0, %v3474_v62 }
 0x2c6   : > { %v7915_v59 = vsub.f32 %v2272_v17, %v7736_v58  ;;  %v7917_v0 = vpop.eup %6062  ;;  %6082 = vpow2.f32 %v2971_v51  ;;  %v3499_v29 = vmul.f32 1.442695, %v3485_v48  ;;  %v7920_v13 = vsub.f32 %v2272_v17, %v7748_v2 }
 0x2c7   : > { %v7922_v15 = vpop.eup %6064  ;;  %6084 = vpow2.f32 %v3491_v47  ;;  %v2453_v3 = vmul.f32 1.442695, %v2442_v12  ;;  %v2973_v46 = vmul.f32 1.442695, %v2962_v42  ;;  %v2436_v27 = vand.u32 2147483647, %v7912_v35 }
 0x2c8   : > { %9729 = vst [vmem:[#allocation33_spill] sm:$0xff] %v7915_v59  ;;  %9730 = vst [vmem:[#allocation34_spill] sm:$0xff] %v7920_v13  ;;  %v7924_v54 = vpop.eup %6066  ;;  %6086 = vpow2.f32 %v2459_v55  ;;  %v3493_v11 = vmul.f32 1.442695, %v3482_v45  ;;  %v2956_v22 = vand.u32 2147483647, %v7915_v59  ;;  %v7934_v62 = vsub.f32 %v2286_v16, %v7739_v57 }
 0x2c9   : > { %v7927_v58 = vpop.eup %6068  ;;  %6088 = vpow2.f32 %v2979_v6  ;;  %v3476_v2 = vand.u32 2147483647, %v7920_v13  ;;  %v2352_v17 = vadd.f32 1.0, %v7917_v0  ;;  %v7940_v48 = vsub.f32 %v2286_v16, %v7768_v53 }
 0x2ca   : > { %v7930_v18 = vpop.eup %6070  ;;  %6090 = vpow2.f32 %v3499_v29  ;;  %9731 = vst [vmem:[#allocation35_spill] sm:$0xff] %v7934_v62  ;;  %v7943_v47 = vsub.f32 %v2286_v16, %v7776_v20  ;;  %v2472_v12 = vadd.f32 1.0, %v7907_v33  ;;  %v2444_v42 = vsub.f32 0.0, %v2436_v27 }
 0x2cb   : > { %v7937_v51 = vpop.eup %6072  ;;  %6092 = vpow2.f32 %v2453_v3  ;;  %9732 = vst [vmem:[#allocation36_spill] sm:$0xff] %v7940_v48  ;;  %v2343_v57 = vadd.f32 1.0, %v7924_v54  ;;  %v2964_v45 = vsub.f32 0.0, %v2956_v22  ;;  %v2355_v29 = vmul.f32 -0.5, %v7917_v0 }
 0x2cc   : > { %v7946_v55 = vpop.eup %6074  ;;  %6094 = vpow2.f32 %v2973_v46  ;;  %v3484_v53 = vsub.f32 0.0, %v3476_v2  ;;  %v2438_v20 = vand.u32 2147483647, %v7934_v62  ;;  %v2463_v16 = vadd.f32 1.0, %v7927_v58  ;;  %v6449_v2 = vld [vmem:[#allocation3] sm:$0xff] }
 0x2cd   : > { %v7949_v6 = vpop.eup %6076  ;;  %6096 = vpow2.f32 %v3493_v11  ;;  %v2958_v46 = vand.u32 2147483647, %v7940_v48  ;;  %v7962_v11 = vmul.f32 1.442695, %v2444_v42  ;;  %v2475_v22 = vmul.f32 -0.5, %v7907_v33 }
 0x2ce   : > { %v7952_v3 = vpop.eup %6078  ;;  %6098 = vlog2.f32 %v2352_v17  ;;  %v7966_v5 = vadd.f32 %v6449_v2, %v7844_v8  ;;  %v7970_v38 = vmul.f32 1.442695, %v2964_v45  ;;  %v2356_v61 = vadd.f32 1.0, %v2355_v29 }
 0x2cf   : > { %9733 = vst [vmem:[#allocation37_spill] sm:$0xff] %v7952_v3  ;;  %v7956_v19 = vpop.eup %6080  ;;  %6100 = vlog2.f32 %v2472_v12  ;;  %v2358_v14 = vand.u32 2147483647, %v7917_v0  ;;  %v7975_v27 = vmul.f32 1.442695, %v3484_v53  ;;  %v7977_v42 = vsub.f32 0.0, %v2438_v20 }
 0x2d0   : > { %v7960_v24 = vpop.eup %6082  ;;  %6102 = vlog2.f32 %v2343_v57  ;;  %v2346_v57 = vmul.f32 -0.5, %v7924_v54  ;;  %v2831_v50 = vand.u32 2147483647, %v7966_v5  ;;  %v7983_v43 = vsub.f32 0.0, %v2958_v46 }
 0x2d1   : > { %v7968_v17 = vpop.eup %6084  ;;  %6104 = vlog2.f32 %v2463_v16  ;;  %v2478_v45 = vand.u32 2147483647, %v7907_v33  ;;  %v2466_v29 = vmul.f32 -0.5, %v7927_v58  ;;  %v7988_v16 = vadd.f32 %v6450_v26, %v7873_v49 }
 0x2d2   : > { %9734 = vst [vmem:[#allocation38_spill] sm:$0xff] %v7968_v17  ;;  %v7973_v12 = vpop.eup %6086  ;;  %v2304_v20 = vmax.f32 %v7840_v36, 0.0  ;;  %v2424_v40 = vmax.f32 %v7828_v7, 0.0  ;;  %v2476_v41 = vadd.f32 1.0, %v2475_v22  ;;  %v2839_v34 = vsub.f32 0.0, %v2831_v50 }
 0x2d3   : > { %9735 = vst [vmem:[#allocation39_spill] sm:$0xff] %v7973_v12  ;;  %v7981_v2 = vpop.eup %6088  ;;  %v2357_v46 = vmul.f32 %v7917_v0, %v2356_v61  ;;  %vm7997_vm6 = vcmp.lt.f32.partialorder %v2358_v14, 0.0004427343  ;;  %v2983_v48 = vadd.f32 1.0, %v7930_v18  ;;  %v2833_v26 = vand.u32 2147483647, %v7988_v16 }
 0x2d4   : > { %9736 = vst [vmem:[#allocation40_spill] sm:$0xff] %v7981_v2  ;;  %v7990_v53 = vpop.eup %6090  ;;  %v2303_v36 = vmax.f32 %v7851_v28, 0.0  ;;  %v2349_v7 = vand.u32 2147483647, %v7924_v54  ;;  %v2847_v50 = vmul.f32 1.442695, %v2839_v34  ;;  %v8014_v12 = vadd.f32 %v6451_v9, %v7831_v52 }
 0x2d5   : > { %9737 = vst [vmem:[#allocation41_spill] sm:$0xff] %v7990_v53  ;;  %v7994_v37 = vpop.eup %6092  ;;  %v2347_v53 = vadd.f32 1.0, %v2346_v57  ;;  %vm8009_vm11 = vcmp.lt.f32.partialorder %v2478_v45, 0.0004427343  ;;  %v2467_v14 = vadd.f32 1.0, %v2466_v29  ;;  %v2841_v0 = vsub.f32 0.0, %v2833_v26 }
 0x2d6   : > { %v8003_v3 = vpop.eup %6094  ;;  %v2477_v60 = vmul.f32 %v7907_v33, %v2476_v41  ;;  %v2423_v28 = vmax.f32 %v7834_v23, 0.0  ;;  %v2469_v57 = vand.u32 2147483647, %v7927_v58  ;;  %6106 = vpow2.f32 %v2847_v50 }
 0x2d7   : > { %v8007_v22 = vpop.eup %6096  ;;  %6108 = vlog2.f32 %v2983_v48  ;;  %v2851_v45 = vmul.f32 1.442695, %v2841_v0  ;;  %v3001_v2 = vadd.f32 1.0, %v7960_v24  ;;  %v2348_v59 = vmul.f32 %v7924_v54, %v2347_v53 }
 0x2d8   : > { %9740 = vst [vmem:[#allocation42_spill] sm:$0xff] %v8007_v22  ;;  %v6099_v13 = vpop.eup %6098  ;;  %vm2350_vm9 = vcmp.lt.f32.partialorder %v2349_v7, 0.0004427343  ;;  %v2832_v9 = vand.u32 2147483647, %v8014_v12  ;;  %v2468_v33 = vmul.f32 %v7927_v58, %v2467_v14  ;;  %v6452_v22 = vld [vmem:[#allocation3 + $0x18] sm:$0xff] }
 0x2d9   : > { %v6101_v34 = vpop.eup %6100  ;;  %v2354_v62 = vmul.f32 0.6931472, %v6099_v13  ;;  %6110 = vpow2.f32 %v2851_v45  ;;  %vm2470_vm13 = vcmp.lt.f32.partialorder %v2469_v57, 0.0004427343  ;;  %v8028_v63 = vadd.f32 %v6452_v22, %v7897_v25 }
 0x2da   : > { %v6103_v29 = vpop.eup %6102  ;;  %v2474_v26 = vmul.f32 0.6931472, %v6101_v34  ;;  %v2840_v0 = vsub.f32 0.0, %v2832_v9  ;;  %6112 = vlog2.f32 %v3001_v2  ;;  %v2461_v58 = vmul.f32 1.442695, %v7977_v42 }
 0x2db   : > { %v6105_v17 = vpop.eup %6104  ;;  %v2360_v41 = vsel %vm7997_vm6, %v2357_v46, %v2354_v62  ;;  %v2345_v23 = vmul.f32 0.6931472, %v6103_v29  ;;  %6114 = vpow2.f32 %v7962_v11  ;;  %v2989_v22 = vand.u32 2147483647, %v7930_v18 }
 0x2dc   : > { %v2416_v13 = vadd.f32 %v2360_v41, %v2304_v20  ;;  %v2480_v48 = vsel %vm8009_vm11, %v2477_v60, %v2474_v26  ;;  %v2465_v50 = vmul.f32 0.6931472, %v6105_v17  ;;  %v2849_v7 = vmul.f32 1.442695, %v2840_v0 }
 0x2dd   : > { %v2536_v34 = vadd.f32 %v2480_v48, %v2424_v40  ;;  %v2351_v32 = vsel %vm2350_vm9, %v2348_v59, %v2345_v23  ;;  %v2986_v60 = vmul.f32 -0.5, %v7930_v18  ;;  %v2992_v40 = vadd.f32 1.0, %v7909_v21 }
 0x2de   : > { %v2415_v54 = vadd.f32 %v2351_v32, %v2303_v36  ;;  %v2471_v53 = vsel %vm2470_vm13, %v2468_v33, %v2465_v50  ;;  %6116 = vpow2.f32 %v2849_v7  ;;  %v2834_v59 = vand.u32 2147483647, %v8028_v63 }
 0x2df   : > { %v2544_v62 = vsub.f32 %v2416_v13, %v2536_v34  ;;  %v2535_v20 = vadd.f32 %v2471_v53, %v2423_v28  ;;  %6118 = vpow2.f32 %v7970_v38  ;;  %v9743_v32 = vand.u32 2147483647, %v7943_v47  ;;  %v6453_v53 = vld [vmem:[#allocation2 + $0x10] sm:$0xff] }
 0x2e0   : > { %v8038_v46 = vpop.eup %6106  ;;  %6120 = vpow2.f32 %v7975_v27  ;;  %v2842_v11 = vsub.f32 0.0, %v2834_v59  ;;  %v8044_v61 = vmul.f32 1.442695, %v7983_v43  ;;  %v2987_v38 = vadd.f32 1.0, %v2986_v60  ;;  %v6454_v60 = vld [vmem:[#allocation4 + $0x8] sm:$0xff] }
 0x2e1   : > { %v3486_v17 = vsub.f32 0.0, %v9743_v32  ;;  %2583 = vxpose.xlu1.b32.start.end [1/1] (short) (narrow) %v2544_v62, 8  ;;  %v2543_v2 = vsub.f32 %v2415_v54, %v2535_v20  ;;  %v6109_v42 = vpop.eup %6108  ;;  %6122 = vpow2.f32 %v2461_v58  ;;  %v2863_v36 = vadd.f32 1.0, %v8038_v46 }
 0x2e2   : > { %6124 = vlog2.f32 %v2992_v40  ;;  %v2853_v14 = vmul.f32 1.442695, %v2842_v11  ;;  %v2943_v27 = vmax.f32 %v7844_v8, 0.0  ;;  %v3004_v45 = vmul.f32 -0.5, %v7960_v24 }
 0x2e3   : > { %2551 = vxpose.xlu0.b32.start.end [1/1] (short) (narrow) %v2543_v2, 8  ;;  %v8046_v28 = vpop.eup %6110  ;;  %v8048_v57 = vmul.f32 1.442695, %v3486_v17  ;;  %6126 = vlog2.f32 %v2863_v36  ;;  %v2985_v29 = vmul.f32 0.6931472, %v6109_v42  ;;  %v2995_v9 = vmul.f32 -0.5, %v7909_v21 }
 0x2e4   : > { %v2881_v26 = vadd.f32 1.0, %v8046_v28  ;;  %6128 = vpow2.f32 %v2853_v14  ;;  %v6113_v43 = vpop.eup %6112  ;;  %v2823_v41 = vmax.f32 %v7966_v5, 0.0  ;;  %v2866_v23 = vmul.f32 -0.5, %v8038_v46 }
 0x2e5   : > { %vm8056_vm12 = vcmp.lt.f32.partialorder %v2989_v22, 0.0004427343  ;;  %v2988_v8 = vmul.f32 %v7930_v18, %v2987_v38  ;;  %v3007_v48 = vand.u32 2147483647, %v7960_v24  ;;  %v3010_v50 = vadd.f32 1.0, %v8003_v3  ;;  %v8064_v0 = vpop.eup %6114 }
 0x2e6   : > { %6130 = vlog2.f32 %v2881_v26  ;;  %v2825_v34 = vmax.f32 %v7988_v16, 0.0  ;;  %v3005_v5 = vadd.f32 1.0, %v3004_v45  ;;  %v8069_v7 = vadd.f32 %v6453_v53, %v7869_v30 }
 0x2e7   : > { %v2991_v18 = vsel %vm8056_vm12, %v2988_v8, %v2985_v29  ;;  %v2996_v62 = vadd.f32 1.0, %v2995_v9  ;;  %v2998_v20 = vand.u32 2147483647, %v7909_v21  ;;  %v8077_v40 = vadd.f32 %v6454_v60, %v7837_v4 }
 0x2e8   : > { %v8071_v58 = vpop.eup %6116  ;;  %v2867_v32 = vadd.f32 1.0, %v2866_v23  ;;  %v2884_v17 = vmul.f32 -0.5, %v8046_v28  ;;  %v3003_v2 = vmul.f32 0.6931472, %v6113_v43  ;;  %vm8085_vm14 = vcmp.lt.f32.partialorder %v3007_v48, 0.0004427343 }
 0x2e9   : > { %v8079_v59 = vpop.eup %6118  ;;  %v2872_v11 = vadd.f32 1.0, %v8071_v58  ;;  %6132 = vlog2.f32 %v3010_v50  ;;  %v2313_v38 = vand.u32 2147483647, %v8069_v7  ;;  %v2869_v45 = vand.u32 2147483647, %v8038_v46 }
 0x2ea   : > { %v8083_v42 = vpop.eup %6120  ;;  %v3006_v29 = vmul.f32 %v7960_v24, %v3005_v5  ;;  %v3013_v26 = vmul.f32 -0.5, %v8003_v3  ;;  %v3055_v43 = vadd.f32 %v2991_v18, %v2943_v27  ;;  %v8097_v23 = vmul.f32 %v7909_v21, %v2996_v62 }
 0x2eb   : > { %v8091_v14 = vpop.eup %6122  ;;  %6134 = vlog2.f32 %v2872_v11  ;;  %v2321_v33 = vsub.f32 0.0, %v2313_v38  ;;  %v3352_v8 = vand.u32 2147483647, %v8077_v40  ;;  %v2868_v50 = vmul.f32 %v8038_v46, %v2867_v32 }
 0x2ec   : > { %v6125_v9 = vpop.eup %6124  ;;  %v2885_v53 = vadd.f32 1.0, %v2884_v17  ;;  %v2887_v60 = vand.u32 2147483647, %v8046_v28  ;;  %v3009_v24 = vsel %vm8085_vm14, %v3006_v29, %v3003_v2  ;;  %vm8104_vm15 = vcmp.lt.f32.partialorder %v2998_v20, 0.0004427343 }
 0x2ed   : > { %v6127_v48 = vpop.eup %6126  ;;  %v2875_v18 = vmul.f32 -0.5, %v8071_v58  ;;  %v2331_v62 = vmul.f32 1.442695, %v2321_v33  ;;  %v3360_v11 = vsub.f32 0.0, %v3352_v8  ;;  %vm2870_vm10 = vcmp.lt.f32.partialorder %v2869_v45, 0.0004427343 }
 0x2ee   : > { %v8108_v27 = vpop.eup %6128  ;;  %v2865_v21 = vmul.f32 0.6931472, %v6127_v48  ;;  %v3014_v32 = vadd.f32 1.0, %v3013_v26  ;;  %v2481_v17 = vadd.f32 1.0, %v7956_v19  ;;  %v2994_v2 = vmul.f32 0.6931472, %v6125_v9 }
 0x2ef   : > { %v2890_v46 = vadd.f32 1.0, %v8108_v27  ;;  %6136 = vpow2.f32 %v2331_v62  ;;  %v3369_v20 = vmul.f32 1.442695, %v3360_v11  ;;  %v2886_v22 = vmul.f32 %v8046_v28, %v2885_v53  ;;  %v6455_v26 = vld [vmem:[#allocation3 + $0x20] sm:$0xff] }
 0x2f0   : > { %v6131_v38 = vpop.eup %6130  ;;  %v2871_v36 = vsel %vm2870_vm10, %v2868_v50, %v2865_v21  ;;  %vm2888_vm7 = vcmp.lt.f32.partialorder %v2887_v60, 0.0004427343  ;;  %v2876_v48 = vadd.f32 1.0, %v2875_v18  ;;  %v2878_v33 = vand.u32 2147483647, %v8071_v58  ;;  %v6456_v18 = vld [vmem:[#allocation2 + $0x18] sm:$0xff] }
 0x2f1   : > { %v2935_v29 = vadd.f32 %v2871_v36, %v2823_v41  ;;  %v2883_v54 = vmul.f32 0.6931472, %v6131_v38  ;;  %6138 = vlog2.f32 %v2890_v46  ;;  %v8116_v13 = vadd.f32 %v6455_v26, %v7863_v31 }
 0x2f2   : > { %6140 = vpow2.f32 %v3369_v20  ;;  %v9750_v50 = vmax.f32 %v7873_v49, 0.0  ;;  %v2893_v53 = vmul.f32 -0.5, %v8108_v27  ;;  %v3512_v60 = vadd.f32 1.0, %v7922_v15 }
 0x2f3   : > { %v3063_v45 = vsub.f32 %v2935_v29, %v3055_v43  ;;  %v2889_v8 = vsel %vm2888_vm7, %v2886_v22, %v2883_v54  ;;  %6142 = vlog2.f32 %v2481_v17  ;;  %v6133_v9 = vpop.eup %6132  ;;  %v2826_v54 = vmax.f32 %v8028_v63, 0.0 }
 0x2f4   : > { %v2937_v41 = vadd.f32 %v2889_v8, %v2825_v34  ;;  %v3057_v28 = vadd.f32 %v3009_v24, %v9750_v50  ;;  %v3016_v22 = vand.u32 2147483647, %v8003_v3  ;;  %v2835_v43 = vand.u32 2147483647, %v8116_v13 }
 0x2f5   : > { %v6135_v21 = vpop.eup %6134  ;;  %3071 = vxpose.xlu0.b32.start.end [1/1] (short) (narrow) %v3063_v45, 8  ;;  %v8128_v62 = vadd.f32 %v6456_v18, %v7893_v39  ;;  %v2877_v49 = vmul.f32 %v8071_v58, %v2876_v48  ;;  %v3000_v24 = vsel %vm8104_vm15, %v8097_v23, %v2994_v2  ;;  %vm2879_vm3 = vcmp.lt.f32.partialorder %v2878_v33, 0.0004427343 }
 0x2f6   : > { %v3065_v16 = vsub.f32 %v2937_v41, %v3057_v28  ;;  %v2874_v34 = vmul.f32 0.6931472, %v6135_v21  ;;  %v3012_v11 = vmul.f32 0.6931472, %v6133_v9  ;;  %v3015_v63 = vmul.f32 %v8003_v3, %v3014_v32 }
 0x2f7   : > { %v2843_v46 = vsub.f32 0.0, %v2835_v43  ;;  %v2894_v38 = vadd.f32 1.0, %v2893_v53  ;;  %6144 = vlog2.f32 %v3512_v60  ;;  %v2314_v36 = vand.u32 2147483647, %v8128_v62 }
 0x2f8   : > { %3135 = vxpose.xlu1.b32.start.end [1/1] (short) (narrow) %v3065_v16, 8  ;;  %v2880_v17 = vsel %vm2879_vm3, %v2877_v49, %v2874_v34  ;;  %v9751_v20 = vmax.f32 %v8014_v12, 0.0  ;;  %v9752_v58 = vmax.f32 %v7831_v52, 0.0  ;;  %v2896_v5 = vand.u32 2147483647, %v8108_v27 }
 0x2f9   : > { %v2855_v23 = vmul.f32 1.442695, %v2843_v46  ;;  %v8141_v2 = vpop.eup %6136  ;;  %v2946_v3 = vmax.f32 %v7897_v25, 0.0  ;;  %vm8144_vm6 = vcmp.lt.f32.partialorder %v3016_v22, 0.0004427343  ;;  %v2484_v33 = vmul.f32 -0.5, %v7956_v19 }
 0x2fa   : > { %v2936_v29 = vadd.f32 %v2880_v17, %v9751_v20  ;;  %v3056_v48 = vadd.f32 %v3000_v24, %v9752_v58  ;;  %v2322_v45 = vsub.f32 0.0, %v2314_v36  ;;  %v3018_v52 = vsel %vm8144_vm6, %v3015_v63, %v3012_v11  ;;  %v6457_v58 = vld [vmem:[#allocation4] sm:$0xff] }
 0x2fb   : > { %v6139_v8 = vpop.eup %6138  ;;  %v2361_v26 = vadd.f32 1.0, %v8141_v2  ;;  %v3515_v9 = vmul.f32 -0.5, %v7922_v15  ;;  %v2895_v25 = vmul.f32 %v8108_v27, %v2894_v38  ;;  %6146 = vpow2.f32 %v2855_v23 }
 0x2fc   : > { %v3064_v12 = vsub.f32 %v2936_v29, %v3056_v48  ;;  %v8153_v41 = vpop.eup %6140  ;;  %v2892_v50 = vmul.f32 0.6931472, %v6139_v8  ;;  %v2333_v28 = vmul.f32 1.442695, %v2322_v45  ;;  %vm2897_vm11 = vcmp.lt.f32.partialorder %v2896_v5, 0.0004427343 }
 0x2fd   : > { %v6143_v53 = vpop.eup %6142  ;;  %6148 = vlog2.f32 %v2361_v26  ;;  %v3392_v60 = vadd.f32 1.0, %v8153_v41  ;;  %v3019_v21 = vadd.f32 1.0, %v7949_v6  ;;  %v2485_v43 = vadd.f32 1.0, %v2484_v33 }
 0x2fe   : > { %3103 = vxpose.xlu0.b32.start.end [1/1] (short) (narrow) %v3064_v12, 8  ;;  %v2898_v22 = vsel %vm2897_vm11, %v2895_v25, %v2892_v50  ;;  %v2487_v18 = vand.u32 2147483647, %v7956_v19  ;;  %v3518_v16 = vand.u32 2147483647, %v7922_v15  ;;  %v3058_v49 = vadd.f32 %v3018_v52, %v2946_v3 }
 0x2ff   : > { %v2938_v34 = vadd.f32 %v2898_v22, %v2826_v54  ;;  %6150 = vlog2.f32 %v3392_v60  ;;  %v3516_v27 = vadd.f32 1.0, %v3515_v9  ;;  %v2364_v24 = vmul.f32 -0.5, %v8141_v2 }
 0x300   : > { %v2425_v11 = vmax.f32 %v7869_v30, 0.0  ;;  %v2483_v63 = vmul.f32 0.6931472, %v6143_v53  ;;  %6152 = vpow2.f32 %v2333_v28  ;;  %v2305_v17 = vmax.f32 %v8069_v7, 0.0 }
 0x301   : > { %v3066_v46 = vsub.f32 %v2938_v34, %v3058_v49  ;;  %v3464_v38 = vmax.f32 %v7837_v4, 0.0  ;;  %6154 = vlog2.f32 %v3019_v21  ;;  %v6145_v36 = vpop.eup %6144  ;;  %v2486_v20 = vmul.f32 %v7956_v19, %v2485_v43 }
 0x302   : > { %v3395_v54 = vmul.f32 -0.5, %v8153_v41  ;;  %v2490_v29 = vadd.f32 1.0, %v7994_v37  ;;  %v8168_v48 = vadd.f32 %v6457_v58, %v7847_v10  ;;  %vm8170_vm9 = vcmp.lt.f32.partialorder %v2487_v18, 0.0004427343 }
 0x303   : > { %3167 = vxpose.xlu1.b32.start.end [1/1] (short) (narrow) %v3066_v46, 8  ;;  %v3344_v7 = vmax.f32 %v8077_v40, 0.0  ;;  %v3517_v4 = vmul.f32 %v7922_v15, %v3516_v27  ;;  %vm8176_vm13 = vcmp.lt.f32.partialorder %v3518_v16, 0.0004427343  ;;  %v2365_v19 = vadd.f32 1.0, %v2364_v24  ;;  %v6458_v40 = vld [vmem:[#allocation2 + $0x28] sm:$0xff] }
 0x304   : > { %v2489_v23 = vsel %vm8170_vm9, %v2486_v20, %v2483_v63  ;;  %v3022_v3 = vmul.f32 -0.5, %v7949_v6  ;;  %v3351_v32 = vand.u32 2147483647, %v8168_v48  ;;  %v2367_v33 = vand.u32 2147483647, %v8141_v2 }
 0x305   : > { %v3514_v45 = vmul.f32 0.6931472, %v6145_v36  ;;  %v2947_v8 = vmax.f32 %v7863_v31, 0.0  ;;  %v8187_v15 = vadd.f32 %v6458_v40, %v7912_v35  ;;  %v8189_v12 = vpop.eup %6146  ;;  %v3396_v52 = vadd.f32 1.0, %v3395_v54 }
 0x306   : > { %v2827_v26 = vmax.f32 %v8116_v13, 0.0  ;;  %6156 = vlog2.f32 %v2490_v29  ;;  %v3359_v9 = vsub.f32 0.0, %v3351_v32  ;;  %v2537_v25 = vadd.f32 %v2489_v23, %v2425_v11 }
 0x307   : > { %v6149_v50 = vpop.eup %6148  ;;  %v3398_v28 = vand.u32 2147483647, %v8153_v41  ;;  %v2899_v53 = vadd.f32 1.0, %v8189_v12  ;;  %v3025_v60 = vand.u32 2147483647, %v7949_v6  ;;  %v2366_v22 = vmul.f32 %v8141_v2, %v2365_v19 }
 0x308   : > { %v2363_v21 = vmul.f32 0.6931472, %v6149_v50  ;;  %v3023_v43 = vadd.f32 1.0, %v3022_v3  ;;  %v3367_v18 = vmul.f32 1.442695, %v3359_v9  ;;  %v3520_v34 = vsel %vm8176_vm13, %v3517_v4, %v3514_v45 }
 0x309   : > { %v6151_v16 = vpop.eup %6150  ;;  %vm2368_vm12 = vcmp.lt.f32.partialorder %v2367_v33, 0.0004427343  ;;  %6158 = vlog2.f32 %v2899_v53  ;;  %v2316_v49 = vand.u32 2147483647, %v8187_v15  ;;  %v3397_v63 = vmul.f32 %v8153_v41, %v3396_v52  ;;  %v6459_v52 = vld [vmem:[#allocation2 + $0x20] sm:$0xff] }
 0x30a   : > { %v8199_v27 = vpop.eup %6152  ;;  %v2369_v24 = vsel %vm2368_vm12, %v2366_v22, %v2363_v21  ;;  %v3394_v11 = vmul.f32 0.6931472, %v6151_v16  ;;  %6160 = vpow2.f32 %v3367_v18  ;;  %vm3399_vm14 = vcmp.lt.f32.partialorder %v3398_v28, 0.0004427343 }
 0x30b   : > { %v6155_v46 = vpop.eup %6154  ;;  %v2417_v36 = vadd.f32 %v2369_v24, %v2305_v17  ;;  %v2370_v2 = vadd.f32 1.0, %v8199_v27  ;;  %v2493_v20 = vmul.f32 -0.5, %v7994_v37  ;;  %v3576_v29 = vadd.f32 %v3520_v34, %v3464_v38 }
 0x30c   : > { %v3400_v54 = vsel %vm3399_vm14, %v3397_v63, %v3394_v11  ;;  %v2902_v58 = vmul.f32 -0.5, %v8189_v12  ;;  %v2324_v30 = vsub.f32 0.0, %v2316_v49  ;;  %v3503_v19 = vadd.f32 1.0, %v7937_v51 }
 0x30d   : > { %v2545_v4 = vsub.f32 %v2417_v36, %v2537_v25  ;;  %v3456_v5 = vadd.f32 %v3400_v54, %v3344_v7  ;;  %6162 = vlog2.f32 %v2370_v2  ;;  %v3021_v41 = vmul.f32 0.6931472, %v6155_v46 }
 0x30e   : > { %6164 = vpow2.f32 %v8048_v57  ;;  %v2496_v17 = vand.u32 2147483647, %v7994_v37  ;;  %v2337_v23 = vmul.f32 1.442695, %v2324_v30  ;;  %v2306_v32 = vmax.f32 %v8128_v62, 0.0 }
 0x30f   : > { %2615 = vxpose.xlu0.b32.start.end [1/1] (short) (narrow) %v2545_v4, 8  ;;  %v3584_v3 = vsub.f32 %v3456_v5, %v3576_v29  ;;  %v2373_v38 = vmul.f32 -0.5, %v8199_v27  ;;  %v2494_v33 = vadd.f32 1.0, %v2493_v20  ;;  %v2903_v40 = vadd.f32 1.0, %v2902_v58 }
 0x310   : > { %v6157_v45 = vpop.eup %6156  ;;  %v3024_v7 = vmul.f32 %v7949_v6, %v3023_v43  ;;  %6166 = vpow2.f32 %v2337_v23  ;;  %v8212_v9 = vadd.f32 %v6459_v52, %v7860_v44  ;;  %v2905_v57 = vand.u32 2147483647, %v8189_v12 }
 0x311   : > { %3623 = vxpose.xlu1.b32.start.end [1/1] (short) (narrow) %v3584_v3, 8  ;;  %vm8215_vm15 = vcmp.lt.f32.partialorder %v3025_v60, 0.0004427343  ;;  %6168 = vlog2.f32 %v3503_v19  ;;  %v2508_v62 = vadd.f32 1.0, %v8064_v0  ;;  %v2426_v6 = vmax.f32 %v7893_v39, 0.0  ;;  %v6460_v39 = vld [vmem:[#allocation4 + $0x18] sm:$0xff] }
 0x312   : > { %v3027_v25 = vsel %vm8215_vm15, %v3024_v7, %v3021_v41  ;;  %vm8223_vm10 = vcmp.lt.f32.partialorder %v2496_v17, 0.0004427343  ;;  %v2315_v53 = vand.u32 2147483647, %v8212_v9  ;;  %v2374_v22 = vadd.f32 1.0, %v2373_v38 }
 0x313   : > { %v6159_v21 = vpop.eup %6158  ;;  %v2492_v60 = vmul.f32 0.6931472, %v6157_v45  ;;  %v2495_v43 = vmul.f32 %v7994_v37, %v2494_v33  ;;  %v3506_v18 = vmul.f32 -0.5, %v7937_v51  ;;  %v2904_v49 = vmul.f32 %v8189_v12, %v2903_v40  ;;  %v6461_v40 = vld [vmem:[#allocation4 + $0x10] sm:$0xff] }
 0x314   : > { %v8230_v16 = vpop.eup %6160  ;;  %v2901_v34 = vmul.f32 0.6931472, %v6159_v21  ;;  %v2323_v24 = vsub.f32 0.0, %v2315_v53  ;;  %v8234_v11 = vadd.f32 %v6460_v39, %v7901_v56  ;;  %vm2906_vm7 = vcmp.lt.f32.partialorder %v2905_v57, 0.0004427343 }
 0x315   : > { %v2376_v63 = vand.u32 2147483647, %v8199_v27  ;;  %v3383_v46 = vadd.f32 1.0, %v8230_v16  ;;  %6170 = vlog2.f32 %v2508_v62  ;;  %v3059_v37 = vadd.f32 %v3027_v25, %v2947_v8 }
 0x316   : > { %v2907_v36 = vsel %vm2906_vm7, %v2904_v49, %v2901_v34  ;;  %v2511_v2 = vmul.f32 -0.5, %v8064_v0  ;;  %v2335_v20 = vmul.f32 1.442695, %v2323_v24  ;;  %v2375_v29 = vmul.f32 %v8199_v27, %v2374_v22  ;;  %v6462_v49 = vld [vmem:[#allocation3 + $0x30] sm:$0xff]  ;;  %v9766_v24 = vld [vmem:[#allocation31_spill] sm:$0xff] }
 0x317   : > { %v6163_v54 = vpop.eup %6162  ;;  %v2939_v12 = vadd.f32 %v2907_v36, %v2827_v26  ;;  %v2498_v58 = vsel %vm8223_vm10, %v2495_v43, %v2492_v60  ;;  %6172 = vlog2.f32 %v3383_v46  ;;  %v2499_v31 = vadd.f32 1.0, %v7946_v55 }
 0x318   : > { %v8246_v30 = vpop.eup %6164  ;;  %v2372_v4 = vmul.f32 0.6931472, %v6163_v54  ;;  %6174 = vpow2.f32 %v2335_v20  ;;  %v3354_v8 = vand.u32 2147483647, %v8234_v11  ;;  %vm2377_vm3 = vcmp.lt.f32.partialorder %v2376_v63, 0.0004427343 }
 0x319   : > { %v3067_v5 = vsub.f32 %v2939_v12, %v3059_v37  ;;  %v3463_v19 = vmax.f32 %v7847_v10, 0.0  ;;  %v3509_v13 = vand.u32 2147483647, %v7937_v51  ;;  %v3386_v41 = vmul.f32 -0.5, %v8230_v16 }
 0x31a   : > { %v8252_v26 = vpop.eup %6166  ;;  %v2378_v27 = vsel %vm2377_vm3, %v2375_v29, %v2372_v4  ;;  %v3507_v17 = vadd.f32 1.0, %v3506_v18  ;;  %v3362_v23 = vsub.f32 0.0, %v3354_v8  ;;  %v2538_v33 = vadd.f32 %v2498_v58, %v2426_v6  ;;  %v9765_v18 = vld [vmem:[#allocation42_spill] sm:$0xff] }
 0x31b   : > { %v6169_v3 = vpop.eup %6168  ;;  %3199 = vxpose.xlu1.b32.start.end [1/1] (short) (narrow) %v3067_v5, 8  ;;  %v2418_v38 = vadd.f32 %v2378_v27, %v2306_v32  ;;  %v2388_v45 = vadd.f32 1.0, %v8252_v26  ;;  %v8257_v7 = vadd.f32 %v6461_v40, %v7877_v1  ;;  %v3343_v10 = vmax.f32 %v8168_v48, 0.0 }
 0x31c   : > { %v2512_v52 = vadd.f32 1.0, %v2511_v2  ;;  %6176 = vlog2.f32 %v2499_v31  ;;  %v3373_v57 = vmul.f32 1.442695, %v3362_v23  ;;  %v2428_v62 = vmax.f32 %v7912_v35, 0.0 }
 0x31d   : > { %v2546_v50 = vsub.f32 %v2418_v38, %v2538_v33  ;;  %6178 = vlog2.f32 %v2388_v45  ;;  %v2514_v25 = vand.u32 2147483647, %v8064_v0  ;;  %v3387_v28 = vadd.f32 1.0, %v3386_v41 }
 0x31e   : > { %v3505_v32 = vmul.f32 0.6931472, %v6169_v3  ;;  %vm8262_vm6 = vcmp.lt.f32.partialorder %v3509_v13, 0.0004427343  ;;  %6180 = vpow2.f32 %v3373_v57  ;;  %v3389_v48 = vand.u32 2147483647, %v8230_v16 }
 0x31f   : > { %v6171_v53 = vpop.eup %6170  ;;  %2647 = vxpose.xlu0.b32.start.end [1/1] (short) (narrow) %v2546_v50, 8  ;;  %v3508_v21 = vmul.f32 %v7937_v51, %v3507_v17  ;;  %v2391_v22 = vmul.f32 -0.5, %v8252_v26  ;;  %v3353_v60 = vand.u32 2147483647, %v8257_v7  ;;  %v2308_v35 = vmax.f32 %v8187_v15, 0.0  ;;  %v9769_v57 = vld [vmem:[#allocation38_spill] sm:$0xff] }
 0x320   : > { %v2513_v43 = vmul.f32 %v8064_v0, %v2512_v52  ;;  %v3530_v34 = vadd.f32 1.0, %v9765_v18  ;;  %v8274_v39 = vadd.f32 %v6462_v49, %v9766_v24  ;;  %vm8276_vm11 = vcmp.lt.f32.partialorder %v2514_v25, 0.0004427343 }
 0x321   : > { %v6173_v63 = vpop.eup %6172  ;;  %v2427_v51 = vmax.f32 %v7860_v44, 0.0  ;;  %v2502_v36 = vmul.f32 -0.5, %v7946_v55  ;;  %v3361_v37 = vsub.f32 0.0, %v3353_v60  ;;  %v3388_v0 = vmul.f32 %v8230_v16, %v3387_v28  ;;  %v6463_v28 = vld [vmem:[#allocation3 + $0x28] sm:$0xff] }
 0x322   : > { %v8282_v2 = vpop.eup %6174  ;;  %v3385_v15 = vmul.f32 0.6931472, %v6173_v63  ;;  %v3511_v20 = vsel %vm8262_vm6, %v3508_v21, %v3505_v32  ;;  %v2510_v54 = vmul.f32 0.6931472, %v6171_v53  ;;  %vm3390_vm9 = vcmp.lt.f32.partialorder %v3389_v48, 0.0004427343 }
 0x323   : > { %v2392_v12 = vadd.f32 1.0, %v2391_v22  ;;  %v2379_v29 = vadd.f32 1.0, %v8282_v2  ;;  %v3371_v58 = vmul.f32 1.442695, %v3361_v37  ;;  %v2505_v31 = vand.u32 2147483647, %v7946_v55 }
 0x324   : > { %v3391_v4 = vsel %vm3390_vm9, %v3388_v0, %v3385_v15  ;;  %6182 = vlog2.f32 %v3530_v34  ;;  %v2837_v8 = vand.u32 2147483647, %v8274_v39  ;;  %v3575_v13 = vadd.f32 %v3511_v20, %v3463_v19  ;;  %v9772_v32 = vld [vmem:[#allocation33_spill] sm:$0xff]  ;;  %v9773_v63 = vld [vmem:[#allocation40_spill] sm:$0xff] }
 0x325   : > { %v3455_v5 = vadd.f32 %v3391_v4, %v3343_v10  ;;  %v2394_v27 = vand.u32 2147483647, %v8252_v26  ;;  %6184 = vlog2.f32 %v2379_v29  ;;  %v2307_v41 = vmax.f32 %v8212_v9, 0.0  ;;  %v9776_v29 = vld [vmem:[#allocation35_spill] sm:$0xff] }
 0x326   : > { %v6177_v16 = vpop.eup %6176  ;;  %v2503_v17 = vadd.f32 1.0, %v2502_v36  ;;  %6186 = vpow2.f32 %v3371_v58  ;;  %v2845_v23 = vsub.f32 0.0, %v2837_v8  ;;  %v2393_v33 = vmul.f32 %v8252_v26, %v2392_v12  ;;  %v6464_v12 = vld [vmem:[#allocation2 + $0x38] sm:$0xff] }
 0x327   : > { %v6179_v3 = vpop.eup %6178  ;;  %v3583_v38 = vsub.f32 %v3455_v5, %v3575_v13  ;;  %v2516_v45 = vsel %vm8276_vm11, %v2513_v43, %v2510_v54  ;;  %v3533_v40 = vmul.f32 -0.5, %v9765_v18  ;;  %v2382_v52 = vmul.f32 -0.5, %v8282_v2 }
 0x328   : > { %v8296_v10 = vpop.eup %6180  ;;  %v2390_v19 = vmul.f32 0.6931472, %v6179_v3  ;;  %v3521_v50 = vadd.f32 1.0, %v9769_v57  ;;  %v2859_v9 = vmul.f32 1.442695, %v2845_v23  ;;  %v8306_v6 = vadd.f32 %v6463_v28, %v9772_v32 }
 0x329   : > { %3591 = vxpose.xlu0.b32.start.end [1/1] (short) (narrow) %v3583_v38, 8  ;;  %vm2395_vm13 = vcmp.lt.f32.partialorder %v2394_v27, 0.0004427343  ;;  %vm8300_vm12 = vcmp.lt.f32.partialorder %v2505_v31, 0.0004427343  ;;  %v3410_v26 = vadd.f32 1.0, %v8296_v10  ;;  %v2540_v48 = vadd.f32 %v2516_v45, %v2428_v62 }
 0x32a   : > { %v2396_v53 = vsel %vm2395_vm13, %v2393_v33, %v2390_v19  ;;  %v3536_v21 = vand.u32 2147483647, %v9765_v18  ;;  %6188 = vpow2.f32 %v2859_v9  ;;  %v2501_v60 = vmul.f32 0.6931472, %v6177_v16 }
 0x32b   : > { %v2420_v22 = vadd.f32 %v2396_v53, %v2308_v35  ;;  %6190 = vlog2.f32 %v3410_v26  ;;  %v3534_v43 = vadd.f32 1.0, %v3533_v40  ;;  %v2383_v34 = vadd.f32 1.0, %v2382_v52 }
 0x32c   : > { %v2385_v49 = vand.u32 2147483647, %v8282_v2  ;;  %6192 = vlog2.f32 %v3521_v50  ;;  %v3037_v46 = vadd.f32 1.0, %v9773_v63  ;;  %v2504_v37 = vmul.f32 %v7946_v55, %v2503_v17 }
 0x32d   : > { %v2548_v36 = vsub.f32 %v2420_v22, %v2540_v48  ;;  %v3413_v15 = vmul.f32 -0.5, %v8296_v10  ;;  %v2836_v62 = vand.u32 2147483647, %v8306_v6  ;;  %v3346_v20 = vmax.f32 %v8234_v11, 0.0 }
 0x32e   : > { %v6183_v0 = vpop.eup %6182  ;;  %v3466_v35 = vmax.f32 %v7901_v56, 0.0  ;;  %vm8316_vm14 = vcmp.lt.f32.partialorder %v3536_v21, 0.0004427343  ;;  %v8321_v58 = vadd.f32 %v6464_v12, %v9776_v29  ;;  %v2507_v55 = vsel %vm8300_vm12, %v2504_v37, %v2501_v60 }
 0x32f   : > { %v6185_v4 = vpop.eup %6184  ;;  %2711 = vxpose.xlu1.b32.start.end [1/1] (short) (narrow) %v2548_v36, 8  ;;  %v3535_v31 = vmul.f32 %v9765_v18, %v3534_v43  ;;  %v3345_v8 = vmax.f32 %v8257_v7, 0.0  ;;  %v2844_v11 = vsub.f32 0.0, %v2836_v62  ;;  %v2384_v13 = vmul.f32 %v8282_v2, %v2383_v34 }
 0x330   : > { %v8327_v5 = vpop.eup %6186  ;;  %v2381_v56 = vmul.f32 0.6931472, %v6185_v4  ;;  %vm2386_vm15 = vcmp.lt.f32.partialorder %v2385_v49, 0.0004427343  ;;  %6194 = vlog2.f32 %v3037_v46  ;;  %v3414_v27 = vadd.f32 1.0, %v3413_v15  ;;  %v8349_v49 = vld [vmem:[#allocation2 + $0x30] sm:$0xff] }
 0x331   : > { %v3532_v16 = vmul.f32 0.6931472, %v6183_v0  ;;  %v3401_v17 = vadd.f32 1.0, %v8327_v5  ;;  %v2857_v23 = vmul.f32 1.442695, %v2844_v11  ;;  %v3465_v38 = vmax.f32 %v7877_v1, 0.0 }
 0x332   : > { %v2387_v3 = vsel %vm2386_vm15, %v2384_v13, %v2381_v56  ;;  %v3524_v18 = vmul.f32 -0.5, %v9769_v57  ;;  %v2318_v33 = vand.u32 2147483647, %v8321_v58  ;;  %v2539_v40 = vadd.f32 %v2507_v55, %v2427_v51  ;;  %v9777_v46 = vld [vmem:[#allocation30_spill] sm:$0xff] }
 0x333   : > { %v2419_v45 = vadd.f32 %v2387_v3, %v2307_v41  ;;  %v3416_v2 = vand.u32 2147483647, %v8296_v10  ;;  %6196 = vlog2.f32 %v3401_v17  ;;  %v3527_v52 = vand.u32 2147483647, %v9769_v57  ;;  %v9782_v17 = vld [vmem:[#allocation34_spill] sm:$0xff] }
 0x334   : > { %v8337_v19 = vpop.eup %6188  ;;  %v2949_v50 = vmax.f32 %v9766_v24, 0.0  ;;  %6198 = vpow2.f32 %v2857_v23  ;;  %v2326_v9 = vsub.f32 0.0, %v2318_v33  ;;  %v3415_v28 = vmul.f32 %v8296_v10, %v3414_v27 }
 0x335   : > { %v6191_v25 = vpop.eup %6190  ;;  %v2547_v26 = vsub.f32 %v2419_v45, %v2539_v40  ;;  %v3538_v41 = vsel %vm8316_vm14, %v3535_v31, %v3532_v16  ;;  %v2917_v44 = vadd.f32 1.0, %v8337_v19  ;;  %v3404_v48 = vmul.f32 -0.5, %v8327_v5  ;;  %v6466_v16 = vld [vmem:[#allocation4 + $0x28] sm:$0xff] }
 0x336   : > { %v6193_v51 = vpop.eup %6192  ;;  %v3412_v53 = vmul.f32 0.6931472, %v6191_v25  ;;  %v3028_v21 = vadd.f32 1.0, %v8079_v59  ;;  %v2341_v22 = vmul.f32 1.442695, %v2326_v9  ;;  %v3525_v60 = vadd.f32 1.0, %v3524_v18 }
 0x337   : > { %2679 = vxpose.xlu0.b32.start.end [1/1] (short) (narrow) %v2547_v26, 8  ;;  %vm3417_vm10 = vcmp.lt.f32.partialorder %v3416_v2, 0.0004427343  ;;  %6200 = vlog2.f32 %v2917_v44  ;;  %v3040_v43 = vmul.f32 -0.5, %v9773_v63  ;;  %v3043_v10 = vand.u32 2147483647, %v9773_v63 }
 0x338   : > { %v3418_v34 = vsel %vm3417_vm10, %v3415_v28, %v3412_v53  ;;  %6202 = vpow2.f32 %v2341_v22  ;;  %v8353_v36 = vadd.f32 %v8349_v49, %v9777_v46  ;;  %v3578_v15 = vadd.f32 %v3538_v41, %v3466_v35 }
 0x339   : > { %v3458_v37 = vadd.f32 %v3418_v34, %v3346_v20  ;;  %v3407_v62 = vand.u32 2147483647, %v8327_v5  ;;  %v3523_v0 = vmul.f32 0.6931472, %v6193_v51  ;;  %v3405_v12 = vadd.f32 1.0, %v3404_v48 }
 0x33a   : > { %v6195_v54 = vpop.eup %6194  ;;  %v2920_v4 = vmul.f32 -0.5, %v8337_v19  ;;  %6204 = vlog2.f32 %v3028_v21  ;;  %v2526_v55 = vadd.f32 1.0, %v8091_v14  ;;  %v3526_v11 = vmul.f32 %v9769_v57, %v3525_v60 }
 0x33b   : > { %v3586_v31 = vsub.f32 %v3458_v37, %v3578_v15  ;;  %v3041_v56 = vadd.f32 1.0, %v3040_v43  ;;  %v2317_v13 = vand.u32 2147483647, %v8353_v36  ;;  %vm8360_vm7 = vcmp.lt.f32.partialorder %v3527_v52, 0.0004427343  ;;  %v9785_v15 = vld [vmem:[#allocation39_spill] sm:$0xff] }
 0x33c   : > { %v2829_v20 = vmax.f32 %v8274_v39, 0.0  ;;  %vm8365_vm3 = vcmp.lt.f32.partialorder %v3043_v10, 0.0004427343  ;;  %v8370_v23 = vadd.f32 %v6466_v16, %v9782_v17  ;;  %vm8372_vm6 = vcmp.lt.f32.partialorder %v3407_v62, 0.0004427343  ;;  %v9786_v16 = vld [vmem:[#allocation29_spill] sm:$0xff] }
 0x33d   : > { %v6197_v3 = vpop.eup %6196  ;;  %3687 = vxpose.xlu1.b32.start.end [1/1] (short) (narrow) %v3586_v31, 8  ;;  %v3529_v18 = vsel %vm8360_vm7, %v3526_v11, %v3523_v0  ;;  %v3039_v33 = vmul.f32 0.6931472, %v6195_v54  ;;  %v2325_v45 = vsub.f32 0.0, %v2317_v13  ;;  %v3406_v2 = vmul.f32 %v8327_v5, %v3405_v12 }
 0x33e   : > { %v8378_v39 = vpop.eup %6198  ;;  %v3403_v40 = vmul.f32 0.6931472, %v6197_v3  ;;  %v2921_v52 = vadd.f32 1.0, %v2920_v4  ;;  %6206 = vlog2.f32 %v2526_v55  ;;  %v2923_v9 = vand.u32 2147483647, %v8337_v19 }
 0x33f   : > { %v3042_v25 = vmul.f32 %v9773_v63, %v3041_v56  ;;  %v2908_v26 = vadd.f32 1.0, %v8378_v39  ;;  %v2339_v28 = vmul.f32 1.442695, %v2325_v45  ;;  %v3031_v44 = vmul.f32 -0.5, %v8079_v59 }
 0x340   : > { %v3409_v41 = vsel %vm8372_vm6, %v3406_v2, %v3403_v40  ;;  %v3034_v51 = vand.u32 2147483647, %v8079_v59  ;;  %v3356_v53 = vand.u32 2147483647, %v8370_v23  ;;  %v3577_v21 = vadd.f32 %v3529_v18, %v3465_v38  ;;  %v6468_v40 = vld [vmem:[#allocation4 + $0x38] sm:$0xff] }
 0x341   : > { %v6201_v48 = vpop.eup %6200  ;;  %v3457_v5 = vadd.f32 %v3409_v41, %v3345_v8  ;;  %v3045_v63 = vsel %vm8365_vm3, %v3042_v25, %v3039_v33  ;;  %6208 = vlog2.f32 %v2908_v26  ;;  %v2922_v43 = vmul.f32 %v8337_v19, %v2921_v52 }
 0x342   : > { %v8395_v22 = vpop.eup %6202  ;;  %v2919_v60 = vmul.f32 0.6931472, %v6201_v48  ;;  %6210 = vpow2.f32 %v2339_v28  ;;  %v3364_v34 = vsub.f32 0.0, %v3356_v53  ;;  %vm2924_vm11 = vcmp.lt.f32.partialorder %v2923_v9, 0.0004427343 }
 0x343   : > { %v3585_v10 = vsub.f32 %v3457_v5, %v3577_v21  ;;  %v2911_v37 = vmul.f32 -0.5, %v8378_v39  ;;  %v2406_v7 = vadd.f32 1.0, %v8395_v22  ;;  %v3032_v38 = vadd.f32 1.0, %v3031_v44 }
 0x344   : > { %v6205_v8 = vpop.eup %6204  ;;  %v2925_v1 = vsel %vm2924_vm11, %v2922_v43, %v2919_v60  ;;  %v2517_v62 = vadd.f32 1.0, %v9785_v15  ;;  %v3377_v0 = vmul.f32 1.442695, %v3364_v34  ;;  %v3061_v12 = vadd.f32 %v3045_v63, %v2949_v50  ;;  %v8410_v50 = vld [vmem:[#allocation4 + $0x20] sm:$0xff] }
 0x345   : > { %3655 = vxpose.xlu0.b32.start.end [1/1] (short) (narrow) %v3585_v10, 8  ;;  %v2941_v54 = vadd.f32 %v2925_v1, %v2829_v20  ;;  %6212 = vlog2.f32 %v2406_v7  ;;  %v2529_v19 = vmul.f32 -0.5, %v8091_v14  ;;  %v2828_v4 = vmax.f32 %v8306_v6, 0.0 }
 0x346   : > { %v2948_v55 = vmax.f32 %v9772_v32, 0.0  ;;  %v2532_v31 = vand.u32 2147483647, %v8091_v14  ;;  %6214 = vpow2.f32 %v3377_v0  ;;  %v2912_v56 = vadd.f32 1.0, %v2911_v37 }
 0x347   : > { %v3069_v11 = vsub.f32 %v2941_v54, %v3061_v12  ;;  %v3030_v13 = vmul.f32 0.6931472, %v6205_v8  ;;  %v2409_v27 = vmul.f32 -0.5, %v8395_v22  ;;  %v2430_v20 = vmax.f32 %v9776_v29, 0.0 }
 0x348   : > { %v6207_v35 = vpop.eup %6206  ;;  %6216 = vlog2.f32 %v2517_v62  ;;  %v3548_v24 = vadd.f32 1.0, %v8083_v42  ;;  %v8414_v6 = vadd.f32 %v8410_v50, %v9786_v16  ;;  %v2914_v32 = vand.u32 2147483647, %v8378_v39 }
 0x349   : > { %3263 = vxpose.xlu1.b32.start.end [1/1] (short) (narrow) %v3069_v11, 8  ;;  %v3033_v3 = vmul.f32 %v8079_v59, %v3032_v38  ;;  %vm8418_vm9 = vcmp.lt.f32.partialorder %v3034_v51, 0.0004427343  ;;  %v2530_v18 = vadd.f32 1.0, %v2529_v19  ;;  %v2310_v29 = vmax.f32 %v8321_v58, 0.0  ;;  %v9791_v19 = vld [vmem:[#allocation37_spill] sm:$0xff] }
 0x34a   : > { %vm8423_vm13 = vcmp.lt.f32.partialorder %v2532_v31, 0.0004427343  ;;  %v3355_v45 = vand.u32 2147483647, %v8414_v6  ;;  %v8429_v2 = vadd.f32 %v6468_v40, %v7943_v47  ;;  %v2913_v59 = vmul.f32 %v8378_v39, %v2912_v56 }
 0x34b   : > { %v6209_v52 = vpop.eup %6208  ;;  %v3036_v9 = vsel %vm8418_vm9, %v3033_v3, %v3030_v13  ;;  %v2410_v25 = vadd.f32 1.0, %v2409_v27  ;;  %v2528_v26 = vmul.f32 0.6931472, %v6207_v35  ;;  %6218 = vlog2.f32 %v3548_v24 }
 0x34c   : > { %v8434_v28 = vpop.eup %6210  ;;  %v2910_v58 = vmul.f32 0.6931472, %v6209_v52  ;;  %v3363_v41 = vsub.f32 0.0, %v3355_v45  ;;  %v3358_v44 = vand.u32 2147483647, %v8429_v2  ;;  %v2531_v53 = vmul.f32 %v8091_v14, %v2530_v18  ;;  %v8457_v18 = vld [vmem:[#allocation3 + $0x38] sm:$0xff] }
 0x34d   : > { %vm2915_vm12 = vcmp.lt.f32.partialorder %v2914_v32, 0.0004427343  ;;  %v2412_v51 = vand.u32 2147483647, %v8395_v22  ;;  %v2397_v48 = vadd.f32 1.0, %v8434_v28  ;;  %v2520_v5 = vmul.f32 -0.5, %v9785_v15 }
 0x34e   : > { %v2916_v39 = vsel %vm2915_vm12, %v2913_v59, %v2910_v58  ;;  %v3375_v21 = vmul.f32 1.442695, %v3363_v41  ;;  %v3366_v63 = vsub.f32 0.0, %v3358_v44  ;;  %v3060_v34 = vadd.f32 %v3036_v9, %v2948_v55  ;;  %v8472_v59 = vld [vmem:[#allocation4 + $0x30] sm:$0xff]  ;;  %v9795_v9 = vld [vmem:[#allocation32_spill] sm:$0xff] }
 0x34f   : > { %v6213_v60 = vpop.eup %6212  ;;  %v2940_v43 = vadd.f32 %v2916_v39, %v2828_v4  ;;  %v2534_v10 = vsel %vm8423_vm13, %v2531_v53, %v2528_v26  ;;  %6220 = vlog2.f32 %v2397_v48  ;;  %v2411_v8 = vmul.f32 %v8395_v22, %v2410_v25 }
 0x350   : > { %v8443_v37 = vpop.eup %6214  ;;  %v2408_v7 = vmul.f32 0.6931472, %v6213_v60  ;;  %6222 = vpow2.f32 %v3375_v21  ;;  %v3381_v14 = vmul.f32 1.442695, %v3366_v63  ;;  %vm2413_vm14 = vcmp.lt.f32.partialorder %v2412_v51, 0.0004427343 }
 0x351   : > { %v3068_v1 = vsub.f32 %v2940_v43, %v3060_v34  ;;  %v2400_v38 = vmul.f32 -0.5, %v8434_v28  ;;  %v3428_v62 = vadd.f32 1.0, %v8443_v37  ;;  %v2523_v12 = vand.u32 2147483647, %v9785_v15 }
 0x352   : > { %v6217_v0 = vpop.eup %6216  ;;  %v2414_v54 = vsel %vm2413_vm14, %v2411_v8, %v2408_v7  ;;  %v3539_v4 = vadd.f32 1.0, %v9791_v19  ;;  %6224 = vpow2.f32 %v3381_v14  ;;  %v2542_v31 = vadd.f32 %v2534_v10, %v2430_v20 }
 0x353   : > { %3231 = vxpose.xlu0.b32.start.end [1/1] (short) (narrow) %v3068_v1, 8  ;;  %v2422_v55 = vadd.f32 %v2414_v54, %v2310_v29  ;;  %v2521_v11 = vadd.f32 1.0, %v2520_v5  ;;  %6226 = vlog2.f32 %v3428_v62  ;;  %v2309_v22 = vmax.f32 %v8353_v36, 0.0 }
 0x354   : > { %6228 = vpow2.f32 %v8044_v61  ;;  %v2429_v56 = vmax.f32 %v9777_v46, 0.0  ;;  %v3551_v13 = vmul.f32 -0.5, %v8083_v42  ;;  %v2401_v35 = vadd.f32 1.0, %v2400_v38  ;;  %v9792_v61 = vld [vmem:[#allocation36_spill] sm:$0xff] }
 0x355   : > { %v2550_v27 = vsub.f32 %v2422_v55, %v2542_v31  ;;  %v2519_v24 = vmul.f32 0.6931472, %v6217_v0  ;;  %v3431_v32 = vmul.f32 -0.5, %v8443_v37  ;;  %v6219_v3 = vpop.eup %6218  ;;  %v3468_v57 = vmax.f32 %v9782_v17, 0.0 }
 0x356   : > { %6230 = vlog2.f32 %v3539_v4  ;;  %v3566_v20 = vadd.f32 1.0, %v8246_v30  ;;  %v8461_v36 = vadd.f32 %v8457_v18, %v9792_v61  ;;  %v2403_v46 = vand.u32 2147483647, %v8434_v28 }
 0x357   : > { %2775 = vxpose.xlu1.b32.start.end [1/1] (short) (narrow) %v2550_v27, 8  ;;  %v2522_v29 = vmul.f32 %v9785_v15, %v2521_v11  ;;  %vm8465_vm15 = vcmp.lt.f32.partialorder %v2523_v12, 0.0004427343  ;;  %v3348_v17 = vmax.f32 %v8370_v23, 0.0  ;;  %v3552_v45 = vadd.f32 1.0, %v3551_v13 }
 0x358   : > { %v3554_v40 = vand.u32 2147483647, %v8083_v42  ;;  %v2838_v52 = vand.u32 2147483647, %v8461_v36  ;;  %v8476_v25 = vadd.f32 %v8472_v59, %v9795_v9  ;;  %v2402_v15 = vmul.f32 %v8434_v28, %v2401_v35 }
 0x359   : > { %v6221_v26 = vpop.eup %6220  ;;  %v2525_v58 = vsel %vm8465_vm15, %v2522_v29, %v2519_v24  ;;  %v3432_v41 = vadd.f32 1.0, %v3431_v32  ;;  %v3550_v44 = vmul.f32 0.6931472, %v6219_v3  ;;  %6232 = vlog2.f32 %v3566_v20 }
 0x35a   : > { %v8481_v23 = vpop.eup %6222  ;;  %v2399_v51 = vmul.f32 0.6931472, %v6221_v26  ;;  %v2846_v53 = vsub.f32 0.0, %v2838_v52  ;;  %v3357_v48 = vand.u32 2147483647, %v8476_v25  ;;  %v3542_v21 = vmul.f32 -0.5, %v9791_v19 }
 0x35b   : > { %vm2404_vm10 = vcmp.lt.f32.partialorder %v2403_v46, 0.0004427343  ;;  %v3434_v39 = vand.u32 2147483647, %v8443_v37  ;;  %v3419_v5 = vadd.f32 1.0, %v8481_v23  ;;  %v3553_v60 = vmul.f32 %v8083_v42, %v3552_v45  ;;  %v9800_v45 = vld [vmem:[#allocation41_spill] sm:$0xff] }
 0x35c   : > { %v8487_v28 = vpop.eup %6224  ;;  %v2405_v63 = vsel %vm2404_vm10, %v2402_v15, %v2399_v51  ;;  %vm8490_vm7 = vcmp.lt.f32.partialorder %v3554_v40, 0.0004427343  ;;  %v2861_v34 = vmul.f32 1.442695, %v2846_v53  ;;  %v2541_v8 = vadd.f32 %v2525_v58, %v2429_v56 }
 0x35d   : > { %v6227_v10 = vpop.eup %6226  ;;  %v2421_v7 = vadd.f32 %v2405_v63, %v2309_v22  ;;  %6234 = vlog2.f32 %v3419_v5  ;;  %v3365_v14 = vsub.f32 0.0, %v3357_v48  ;;  %v3433_v62 = vmul.f32 %v8443_v37, %v3432_v41 }
 0x35e   : > { %v8494_v1 = vpop.eup %6228  ;;  %v3430_v38 = vmul.f32 0.6931472, %v6227_v10  ;;  %v3556_v0 = vsel %vm8490_vm7, %v3553_v60, %v3550_v44  ;;  %v3446_v42 = vadd.f32 1.0, %v8487_v28  ;;  %vm3435_vm3 = vcmp.lt.f32.partialorder %v3434_v39, 0.0004427343 }
 0x35f   : > { %v2549_v54 = vsub.f32 %v2421_v7, %v2541_v8  ;;  %v3543_v12 = vadd.f32 1.0, %v3542_v21  ;;  %6236 = vpow2.f32 %v2861_v34  ;;  %v3422_v31 = vmul.f32 -0.5, %v8481_v23 }
 0x360   : > { %v6231_v4 = vpop.eup %6230  ;;  %v3436_v55 = vsel %vm3435_vm3, %v3433_v62, %v3430_v38  ;;  %6238 = vlog2.f32 %v3446_v42  ;;  %v3569_v11 = vmul.f32 -0.5, %v8246_v30  ;;  %v3580_v56 = vadd.f32 %v3556_v0, %v3468_v57 }
 0x361   : > { %2743 = vxpose.xlu0.b32.start.end [1/1] (short) (narrow) %v2549_v54, 8  ;;  %v3460_v22 = vadd.f32 %v3436_v55, %v3348_v17  ;;  %v3046_v37 = vadd.f32 1.0, %v8494_v1  ;;  %v3379_v13 = vmul.f32 1.442695, %v3365_v14  ;;  %v3545_v27 = vand.u32 2147483647, %v9791_v19 }
 0x362   : > { %v3541_v24 = vmul.f32 0.6931472, %v6231_v4  ;;  %v3449_v32 = vmul.f32 -0.5, %v8487_v28  ;;  %v3423_v20 = vadd.f32 1.0, %v3422_v31  ;;  %v3544_v46 = vmul.f32 %v9791_v19, %v3543_v12 }
 0x363   : > { %v3588_v35 = vsub.f32 %v3460_v22, %v3580_v56  ;;  %6240 = vpow2.f32 %v3379_v13  ;;  %v6233_v3 = vpop.eup %6232  ;;  %v3425_v29 = vand.u32 2147483647, %v8481_v23  ;;  %v3570_v33 = vadd.f32 1.0, %v3569_v11 }
 0x364   : > { %v3572_v57 = vand.u32 2147483647, %v8246_v30  ;;  %6242 = vlog2.f32 %v3046_v37  ;;  %vm8508_vm6 = vcmp.lt.f32.partialorder %v3545_v27, 0.0004427343  ;;  %v3557_v40 = vadd.f32 1.0, %v9800_v45 }
 0x365   : > { %3751 = vxpose.xlu1.b32.start.end [1/1] (short) (narrow) %v3588_v35, 8  ;;  %v3467_v26 = vmax.f32 %v9786_v16, 0.0  ;;  %v3547_v15 = vsel %vm8508_vm6, %v3544_v46, %v3541_v24  ;;  %v3450_v19 = vadd.f32 1.0, %v3449_v32  ;;  %v3568_v58 = vmul.f32 0.6931472, %v6233_v3 }
 0x366   : > { %v3347_v41 = vmax.f32 %v8414_v6, 0.0  ;;  %v3424_v51 = vmul.f32 %v8481_v23, %v3423_v20  ;;  %v3452_v53 = vand.u32 2147483647, %v8487_v28  ;;  %vm3426_vm11 = vcmp.lt.f32.partialorder %v3425_v29, 0.0004427343 }
 0x367   : > { %v6235_v52 = vpop.eup %6234  ;;  %v3350_v39 = vmax.f32 %v8429_v2, 0.0  ;;  %v3571_v5 = vmul.f32 %v8246_v30, %v3570_v33  ;;  %vm8521_vm9 = vcmp.lt.f32.partialorder %v3572_v57, 0.0004427343  ;;  %v3579_v60 = vadd.f32 %v3547_v15, %v3467_v26 }
 0x368   : > { %v3421_v44 = vmul.f32 0.6931472, %v6235_v52  ;;  %6244 = vlog2.f32 %v3557_v40  ;;  %v3451_v23 = vmul.f32 %v8487_v28, %v3450_v19  ;;  %vm3453_vm13 = vcmp.lt.f32.partialorder %v3452_v53, 0.0004427343 }
 0x369   : > { %v6237_v48 = vpop.eup %6236  ;;  %v3574_v10 = vsel %vm8521_vm9, %v3571_v5, %v3568_v58  ;;  %v3470_v2 = vmax.f32 %v7943_v47, 0.0  ;;  %v3049_v30 = vmul.f32 -0.5, %v8494_v1  ;;  %v3052_v4 = vand.u32 2147483647, %v8494_v1  ;;  %v8547_v5 = vpop.trf.xlu0 }
 0x36a   : > { %v6239_v21 = vpop.eup %6238  ;;  %v3427_v63 = vsel %vm3426_vm11, %v3424_v51, %v3421_v44  ;;  %v2926_v43 = vadd.f32 1.0, %v6237_v48  ;;  %v2929_v54 = vmul.f32 -0.5, %v6237_v48  ;;  %v3560_v55 = vmul.f32 -0.5, %v9800_v45 }
 0x36b   : > { %v3459_v6 = vadd.f32 %v3427_v63, %v3347_v41  ;;  %v3448_v34 = vmul.f32 0.6931472, %v6239_v21  ;;  %v3582_v62 = vadd.f32 %v3574_v10, %v3470_v2  ;;  %v3050_v28 = vadd.f32 1.0, %v3049_v30 }
 0x36c   : > { %6246 = vlog2.f32 %v2926_v43  ;;  %v2930_v31 = vadd.f32 1.0, %v2929_v54  ;;  %v2932_v56 = vand.u32 2147483647, %v6237_v48  ;;  %vm8533_vm12 = vcmp.lt.f32.partialorder %v3052_v4, 0.0004427343 }
 0x36d   : > { %v6241_v7 = vpop.eup %6240  ;;  %v3587_v8 = vsub.f32 %v3459_v6, %v3579_v60  ;;  %v3454_v14 = vsel %vm3453_vm13, %v3451_v23, %v3448_v34  ;;  %v3051_v37 = vmul.f32 %v8494_v1, %v3050_v28  ;;  %v3561_v27 = vadd.f32 1.0, %v3560_v55  ;;  %v9805_v6 = vld [vmem:[#allocation26_spill] sm:$0xff]  ;;  %v9809_v55 = vld [vmem:[#allocation24_spill] sm:$0xff] }
 0x36e   : > { %v3462_v38 = vadd.f32 %v3454_v14, %v3350_v39  ;;  %v3437_v0 = vadd.f32 1.0, %v6241_v7  ;;  %v6243_v42 = vpop.eup %6242  ;;  %v3440_v11 = vmul.f32 -0.5, %v6241_v7  ;;  %v3563_v32 = vand.u32 2147483647, %v9800_v45  ;;  %v8545_v39 = vpop.trf.xlu1  ;;  %v9807_v14 = vld [vmem:[#allocation23_spill] sm:$0xff] }
 0x36f   : > { %3719 = vxpose.xlu0.b32.start.end [1/1] (short) (narrow) %v3587_v8, 8  ;;  %v3048_v47 = vmul.f32 0.6931472, %v6243_v42  ;;  %v2931_v20 = vmul.f32 %v6237_v48, %v2930_v31  ;;  %v2830_v33 = vmax.f32 %v8461_v36, 0.0  ;;  %vm2933_vm14 = vcmp.lt.f32.partialorder %v2932_v56, 0.0004427343 }
 0x370   : > { %v3590_v12 = vsub.f32 %v3462_v38, %v3582_v62  ;;  %6248 = vlog2.f32 %v3437_v0  ;;  %v3441_v46 = vadd.f32 1.0, %v3440_v11  ;;  %v2950_v1 = vmax.f32 %v9792_v61, 0.0 }
 0x371   : > { %v3054_v24 = vsel %vm8533_vm12, %v3051_v37, %v3048_v47  ;;  %v3443_v57 = vand.u32 2147483647, %v6241_v7  ;;  %v3562_v40 = vmul.f32 %v9800_v45, %v3561_v27  ;;  %vm3564_vm15 = vcmp.lt.f32.partialorder %v3563_v32, 0.0004427343  ;;  %v9811_v37 = vld [vmem:[#allocation25_spill] sm:$0xff] }
 0x372   : > { %3815 = vxpose.xlu1.b32.start.end [1/1] (short) (narrow) %v3590_v12, 8  ;;  %v6245_v22 = vpop.eup %6244  ;;  %v3062_v15 = vadd.f32 %v3054_v24, %v2950_v1  ;;  %v3442_v58 = vmul.f32 %v6241_v7, %v3441_v46  ;;  %v3349_v51 = vmax.f32 %v8476_v25, 0.0  ;;  %v3469_v36 = vmax.f32 %v9795_v9, 0.0 }
 0x373   : > { %v3559_v29 = vmul.f32 0.6931472, %v6245_v22  ;;  %vm3444_vm10 = vcmp.lt.f32.partialorder %v3443_v57, 0.0004427343  ;;  %vm9806_vm7 = vcmask 64512  }
 0x374   : > { %vm9808_vm3 = vmmov %vm9806_vm7 }
 0x375   : > { %v3565_v41 = vsel %vm3564_vm15, %v3562_v40, %v3559_v29  ;;  %v8551_v21 = vpop.trf.xlu0  ;;  %vm9810_vm6 = vmmov %vm9808_vm3  ;;  %v9813_v29 = vld [vmem:[#allocation22_spill] sm:$0xff]  ;;  %vm9822_vm15 = vcmask 1045509  }
 0x376   : > { %v6247_v35 = vpop.eup %6246  ;;  %v3581_v48 = vadd.f32 %v3565_v41, %v3469_v36  ;;  %v3847_v30 = vadd.f32 %v8551_v21, %v8547_v5  ;;  %vm9812_vm11 = vmmov %vm9808_vm3 }
 0x377   : > { %v2928_v3 = vmul.f32 0.6931472, %v6247_v35  ;;  %vm9814_vm9 = vmmov %vm9808_vm3 }
 0x378   : > { %v8549_v16 = vpop.trf.xlu1  ;;  %vm9816_vm13 = vmmov %vm9808_vm3 }
 0x379   : > { %v2934_v17 = vsel %vm2933_vm14, %v2931_v20, %v2928_v3  ;;  %vm9818_vm12 = vmmov %vm9808_vm3 }
 0x37a   : > { %v6249_v52 = vpop.eup %6248  ;;  %v2942_v26 = vadd.f32 %v2934_v17, %v2830_v33  ;;  %vm9820_vm14 = vmmov %vm9808_vm3 }
 0x37b   : > { %v3439_v19 = vmul.f32 0.6931472, %v6249_v52 }
 0x37c   : > { %v3070_v44 = vsub.f32 %v2942_v26, %v3062_v15  ;;  %v9815_v26 = vld [vmem:[#allocation21_spill] sm:$0xff] }
 0x37d   : > { %v3445_v53 = vsel %vm3444_vm10, %v3442_v58, %v3439_v19 }
 0x37e   : > { %3295 = vxpose.xlu0.b32.start.end [1/1] (short) (narrow) %v3070_v44, 8  ;;  %v3461_v61 = vadd.f32 %v3445_v53, %v3349_v51  ;;  %v8555_v25 = vpop.trf.xlu0 }
 0x37f   : > { %v3848_v9 = vadd.f32 %v8555_v25, %v8545_v39 }
 0x380   : > { %v3589_v45 = vsub.f32 %v3461_v61, %v3581_v48  ;;  %v9817_v48 = vld [vmem:[#allocation12_spill] sm:$0xff] }
 0x382   : > { %3783 = vxpose.xlu0.b32.start.end [1/1] (short) (narrow) %v3589_v45, 8 }
 0x383   : > { %v8553_v63 = vpop.trf.xlu1 }
 0x38f   : > { %v8564_v10 = vpop.trf.xlu0 }
 0x390   : > { %v3849_v11 = vadd.f32 %v8549_v16, %v8564_v10 }
 0x391   : > { %v8559_v60 = vpop.trf.xlu1 }
 0x392   : > { %v3856_v43 = vadd.f32 %v3848_v9, %v8559_v60 }
 0x394   : > { %v3864_v34 = vmul.f32 %v3856_v43, %v9805_v6  ;;  %v9819_v43 = vld [vmem:[#allocation27_spill] sm:$0xff] }
 0x395   : > { %v6478_v6 = vld [vmem:[#allocation4 + $0x18] sm:$0xff] }
 0x396   : > { %v3874_v23 = vsel %vm9806_vm7, %v3864_v34, 0.0 }
 0x399   : > { %3875 = vadd.xlane.f32.xlu1 %v3874_v23 }
 0x39b   : > { %v8575_v0 = vpop.trf.xlu1 }
 0x39f   : > { %v8566_v2 = vpop.trf.xlu0 }
 0x3a0   : > { %v3850_v54 = vadd.f32 %v8553_v63, %v8566_v2 }
 0x3a9   : > { %v8570_v7 = vpop.trf.xlu0 }
 0x3aa   : > { %v3855_v8 = vadd.f32 %v3847_v30, %v8570_v7 }
 0x3ac   : > { %v3863_v38 = vmul.f32 %v3855_v8, %v9807_v14 }
 0x3ae   : > { %v3871_v62 = vsel %vm9808_vm3, %v3863_v38, 0.0 }
 0x3af   : > { %3872 = vadd.xlane.f32.xlu0 %v3871_v62  ;;  %v8577_v42 = vpop.trf.xlu1  ;;  %v9821_v62 = vld [vmem:[#allocation28_spill] sm:$0xff] }
 0x3b7   : > { %v8584_v4 = vpop.trf.xlu0 }
 0x3b8   : > { %v3851_v17 = vadd.f32 %v8575_v0, %v8584_v4 }
 0x3bd   : > { %v8581_v12 = vpop.trf.xlu1 }
 0x3be   : > { %v3858_v28 = vadd.f32 %v3850_v54, %v8581_v12 }
 0x3c0   : > { %v3866_v47 = vmul.f32 %v3858_v28, %v9809_v55 }
 0x3c2   : > { %v3880_v31 = vsel %vm9810_vm6, %v3866_v47, 0.0 }
 0x3c3   : > { %3881 = vadd.xlane.f32.xlu0 %v3880_v31 }
 0x3c5   : > { %v8590_v22 = vpop.trf.xlu0 }
 0x3c6   : > { %v3857_v56 = vadd.f32 %v3849_v11, %v8590_v22 }
 0x3c8   : > { %v3865_v13 = vmul.f32 %v3857_v56, %v9811_v37 }
 0x3c9   : > { %v8595_v35 = vpop.trf.xlu1 }
 0x3ca   : > { %v3877_v27 = vsel %vm9812_vm11, %v3865_v13, 0.0 }
 0x3cb   : > { %3878 = vadd.xlane.f32.xlu1 %v3877_v27 }
 0x3d3   : > { %v8599_v32 = vpop.trf.xlu0 }
 0x3d4   : > { %v3852_v3 = vadd.f32 %v8599_v32, %v8577_v42 }
 0x3d7   : > { %v8597_v24 = vpop.trf.xlu1 }
 0x3e1   : > { %v8607_v1 = vpop.trf.xlu0 }
 0x3e2   : > { %v3853_v51 = vadd.f32 %v8595_v35, %v8607_v1 }
 0x3e5   : > { %v8603_v20 = vpop.trf.xlu1 }
 0x3e6   : > { %v3860_v46 = vadd.f32 %v3852_v3, %v8603_v20 }
 0x3e8   : > { %v3868_v33 = vmul.f32 %v3860_v46, %v9813_v29 }
 0x3ea   : > { %v3886_v57 = vsel %vm9814_vm9, %v3868_v33, 0.0 }
 0x3eb   : > { %3887 = vadd.xlane.f32.xlu0 %v3886_v57 }
 0x3ef   : > { %v8612_v40 = vpop.trf.xlu0 }
 0x3f0   : > { %v3859_v52 = vadd.f32 %v3851_v17, %v8612_v40 }
 0x3f2   : > { %v3867_v15 = vmul.f32 %v3859_v52, %v9815_v26  ;;  %v8619_v41 = vpop.trf.xlu1 }
 0x3f4   : > { %v3883_v19 = vsel %vm9816_vm13, %v3867_v15, 0.0 }
 0x3f5   : > { %3884 = vadd.xlane.f32.xlu1 %v3883_v19 }
 0x3fe   : > { %v8617_v58 = vpop.trf.xlu0 }
 0x3ff   : > { %v3854_v44 = vadd.f32 %v8617_v58, %v8597_v24 }
 0x401   : > { %v3862_v36 = vadd.f32 %v3854_v44, %v8619_v41 }
 0x402   : > { %v8626_v53 = vpop.trf.xlu0 }
 0x403   : > { %v3861_v61 = vadd.f32 %v3853_v51, %v8626_v53  ;;  %v3870_v45 = vmul.f32 %v3862_v36, %v9817_v48 }
 0x405   : > { %v3892_v9 = vsel %vm9818_vm12, %v3870_v45, 0.0  ;;  %v3869_v34 = vmul.f32 %v3861_v61, %v9819_v43  ;;  %v6471_v45 = vld [vmem:[%s7811_s7] sm:$0xff] }
 0x406   : > { %3893 = vadd.xlane.f32.xlu0 %v3892_v9 }
 0x407   : > { %v3889_v23 = vsel %vm9820_vm14, %v3869_v34, 0.0  ;;  %v9823_v34 = vld [vmem:[#allocation17_spill] sm:$0xff] }
 0x408   : > { %3890 = vadd.xlane.f32.xlu1 %v3889_v23 }
 0x426   : > { %v3876_v30 = vpop.xlane.xlu1 %3875 }
 0x427   : > { %v3910_v31 = vrot.slane %v3876_v30, %v9821_v62  ;;  %v9824_v30 = vld [vmem:[#allocation15_spill] sm:$0xff] }
 0x43c   : > { %v3873_v8 = vpop.xlane.xlu0 %3872 }
 0x43d   : > { %v3906_v54 = vrot.slane %v3873_v8, %v9821_v62 }
 0x43f   : > { %v3935_v56 = vsel %vm424_vm0, %v3910_v31, %v3906_v54  ;;  %v9827_v31 = vld [vmem:[#allocation20_spill] sm:$0xff] }
 0x450   : > { %v3882_v28 = vpop.xlane.xlu0 %3881 }
 0x451   : > { %v3918_v46 = vrot.slane %v3882_v28, %v9821_v62  ;;  %v9826_v28 = vld [vmem:[#allocation13_spill] sm:$0xff] }
 0x458   : > { %v3879_v38 = vpop.xlane.xlu1 %3878 }
 0x459   : > { %v3914_v47 = vrot.slane %v3879_v38, %v9821_v62  ;;  %v9825_v38 = vld [vmem:[#allocation19_spill] sm:$0xff] }
 0x45b   : > { %v3936_v13 = vsel %vm427_vm1, %v3914_v47, %v3935_v56  ;;  %v9828_v56 = vld [vmem:[#allocation14_spill] sm:$0xff] }
 0x45c   : > { %v3937_v33 = vsel %vm430_vm8, %v3918_v46, %v3936_v13  ;;  %v9830_v46 = vld [vmem:[#allocation18_spill] sm:$0xff] }
 0x478   : > { %v3888_v27 = vpop.xlane.xlu0 %3887 }
 0x479   : > { %v3926_v52 = vrot.slane %v3888_v27, %v9821_v62  ;;  %v9829_v27 = vld [vmem:[#allocation16_spill] sm:$0xff] }
 0x482   : > { %v3885_v11 = vpop.xlane.xlu1 %3884 }
 0x483   : > { %v3922_v3 = vrot.slane %v3885_v11, %v9821_v62 }
 0x485   : > { %v3938_v57 = vsel %vm433_vm2, %v3922_v3, %v3937_v33 }
 0x486   : > { %v3939_v51 = vsel %vm9822_vm15, %v3926_v52, %v3938_v57 }
 0x493   : > { %v3894_v17 = vpop.xlane.xlu0 %3893 }
 0x494   : > { %v3934_v44 = vrot.slane %v3894_v17, %v9821_v62 }
 0x495   : > { %v3891_v15 = vpop.xlane.xlu1 %3890 }
 0x496   : > { %v3930_v19 = vrot.slane %v3891_v15, %v9821_v62  ;;  %v6477_v62 = vld [vmem:[#allocation3 + $0x30] sm:$0xff] }
 0x498   : > { %v3940_v36 = vsel %vm439_vm4, %v3930_v19, %v3939_v51 }
 0x499   : > { %v3941_v61 = vsel %vm442_vm5, %v3934_v44, %v3940_v36 }
 0x49a   : > { %v3943_v9 = vadd.f32 %v6471_v45, %v3941_v61  ;;  %v6472_v61 = vld [vmem:[#allocation2 + $0x8] sm:$0xff] }
 0x49c   : > { %v3954_v23 = vrot.slane %v3943_v9, %v9823_v34  ;;  %v3947_v8 = vrot.slane %v3943_v9, %v9824_v30  ;;  %v3975_v54 = vrot.slane %v3943_v9, %v9825_v38  ;;  %v3961_v47 = vrot.slane %v3943_v9, %v9826_v28 }
 0x49d   : > { %v3989_v11 = vrot.slane %v3943_v9, %v9827_v31  ;;  %v3968_v13 = vrot.slane %v3943_v9, %v9828_v56  ;;  %v3982_v3 = vrot.slane %v3943_v9, %v9829_v27  ;;  %v3996_v33 = vrot.slane %v3943_v9, %v9830_v46  ;;  %v6473_v9 = vld [vmem:[#allocation2] sm:$0xff] }
 0x49e   : > { %3956 = vbcast.lane.b32.xlu0 %v3954_v23, 256  ;;  %3949 = vbcast.lane.b32.xlu1 %v3947_v8, 256 }
 0x4a2   : > { %3977 = vbcast.lane.b32.xlu0 %v3975_v54, 256  ;;  %3963 = vbcast.lane.b32.xlu1 %v3961_v47, 256 }
 0x4a6   : > { %3991 = vbcast.lane.b32.xlu0 %v3989_v11, 256  ;;  %3970 = vbcast.lane.b32.xlu1 %v3968_v13, 256 }
 0x4aa   : > { %3984 = vbcast.lane.b32.xlu1 %v3982_v3, 256 }
 0x4ae   : > { %3998 = vbcast.lane.b32.xlu1 %v3996_v33, 256 }
 0x510   : > { %v3957_v57 = vpop.permute.xlu0 %3956  ;;  %v3950_v17 = vpop.permute.xlu1 %3949 }
 0x511   : > { %v8658_v52 = vsub.f32 %v3957_v57, %v8545_v39  ;;  %v8661_v15 = vsub.f32 %v3957_v57, %v8555_v25  ;;  %v8664_v19 = vsub.f32 %v3957_v57, %v8559_v60  ;;  %v8667_v44 = vsub.f32 %v3950_v17, %v8547_v5 }
 0x512   : > { %v8670_v51 = vsub.f32 %v3950_v17, %v8551_v21  ;;  %v8673_v36 = vsub.f32 %v3950_v17, %v8570_v7  ;;  %v6474_v7 = vld [vmem:[#allocation4] sm:$0xff] }
 0x513   : > { %v8676_v45 = vadd.f32 %v6472_v61, %v8658_v52  ;;  %v4145_v39 = vand.u32 2147483647, %v8658_v52  ;;  %v4665_v25 = vand.u32 2147483647, %v8661_v15  ;;  %v5185_v60 = vand.u32 2147483647, %v8664_v19 }
 0x514   : > { %v8682_v5 = vadd.f32 %v6473_v9, %v8667_v44  ;;  %v4144_v21 = vand.u32 2147483647, %v8667_v44  ;;  %v4664_v34 = vand.u32 2147483647, %v8670_v51  ;;  %v8687_v23 = vadd.f32 %v6474_v7, %v8673_v36  ;;  %v3978_v30 = vpop.permute.xlu0 %3977 }
 0x515   : > { %v4025_v8 = vand.u32 2147483647, %v8676_v45  ;;  %v4153_v38 = vsub.f32 0.0, %v4145_v39  ;;  %v4673_v54 = vsub.f32 0.0, %v4665_v25  ;;  %v5193_v28 = vsub.f32 0.0, %v5185_v60  ;;  %v3964_v60 = vpop.permute.xlu1 %3963 }
 0x516   : > { %v4024_v47 = vand.u32 2147483647, %v8682_v5  ;;  %v4152_v31 = vsub.f32 0.0, %v4144_v21  ;;  %v4672_v11 = vsub.f32 0.0, %v4664_v34  ;;  %v5064_v56 = vand.u32 2147483647, %v8687_v23 }
 0x517   : > { %v4033_v13 = vsub.f32 0.0, %v4025_v8  ;;  %v4162_v27 = vmul.f32 1.442695, %v4153_v38  ;;  %v4682_v3 = vmul.f32 1.442695, %v4673_v54  ;;  %v8693_v46 = vsub.f32 %v3978_v30, %v8584_v4  ;;  %v6475_v34 = vld [vmem:[#allocation2 + $0x20] sm:$0xff] }
 0x518   : > { %v5202_v33 = vmul.f32 1.442695, %v5193_v28  ;;  %v4032_v57 = vsub.f32 0.0, %v4024_v47  ;;  %v4160_v17 = vmul.f32 1.442695, %v4152_v31  ;;  %v5072_v39 = vsub.f32 0.0, %v5064_v56 }
 0x519   : > { %9831 = vst [vmem:[#allocation42_spill] sm:$0xff] %v8693_v46  ;;  %v4042_v61 = vmul.f32 1.442695, %v4033_v13  ;;  %6250 = vpow2.f32 %v4162_v27  ;;  %v5184_v25 = vand.u32 2147483647, %v8673_v36  ;;  %v8697_v7 = vadd.f32 %v6475_v34, %v8693_v46 }
 0x51a   : > { %6252 = vpow2.f32 %v4682_v3  ;;  %v4040_v9 = vmul.f32 1.442695, %v4032_v57  ;;  %v4680_v21 = vmul.f32 1.442695, %v4672_v11  ;;  %v4148_v4 = vand.u32 2147483647, %v8693_v46 }
 0x51b   : > { %6254 = vpow2.f32 %v4042_v61  ;;  %v5192_v8 = vsub.f32 0.0, %v5184_v25  ;;  %v8701_v38 = vsub.f32 %v3978_v30, %v8575_v0  ;;  %v4028_v54 = vand.u32 2147483647, %v8697_v7 }
 0x51c   : > { %6256 = vpow2.f32 %v5202_v33  ;;  %v8705_v28 = vsub.f32 %v3978_v30, %v8612_v40  ;;  %v8708_v47 = vsub.f32 %v3964_v60, %v8564_v10  ;;  %v5080_v31 = vmul.f32 1.442695, %v5072_v39  ;;  %v3992_v39 = vpop.permute.xlu0 %3991 }
 0x51d   : > { %6258 = vpow2.f32 %v4040_v9  ;;  %v4156_v11 = vsub.f32 0.0, %v4148_v4  ;;  %v4668_v56 = vand.u32 2147483647, %v8701_v38  ;;  %v5200_v13 = vmul.f32 1.442695, %v5192_v8 }
 0x51e   : > { %9832 = vst [vmem:[#allocation31_spill] sm:$0xff] %v8705_v28  ;;  %v4036_v27 = vsub.f32 0.0, %v4028_v54  ;;  %v8713_v0 = vadd.f32 %v8410_v50, %v8705_v28  ;;  %v5188_v3 = vand.u32 2147483647, %v8705_v28  ;;  %6260 = vpow2.f32 %v4160_v17 }
 0x51f   : > { %v4168_v33 = vmul.f32 1.442695, %v4156_v11  ;;  %v4676_v40 = vsub.f32 0.0, %v4668_v56  ;;  %v4146_v30 = vand.u32 2147483647, %v8708_v47  ;;  %6262 = vpow2.f32 %v4680_v21  ;;  %v6476_v11 = vld [vmem:[#allocation4 + $0x10] sm:$0xff] }
 0x520   : > { %9833 = vst [vmem:[#allocation38_spill] sm:$0xff] %v8713_v0  ;;  %v4048_v10 = vmul.f32 1.442695, %v4036_v27  ;;  %v5068_v57 = vand.u32 2147483647, %v8713_v0  ;;  %v5196_v61 = vsub.f32 0.0, %v5188_v3  ;;  %6264 = vpow2.f32 %v5080_v31 }
 0x521   : > { %v4154_v25 = vsub.f32 0.0, %v4146_v30  ;;  %v8719_v9 = vsub.f32 %v3964_v60, %v8549_v16  ;;  %6266 = vpow2.f32 %v5200_v13  ;;  %v4688_v50 = vmul.f32 1.442695, %v4676_v40 }
 0x522   : > { %v5076_v34 = vsub.f32 0.0, %v5068_v57  ;;  %v8722_v17 = vsub.f32 %v3964_v60, %v8590_v22  ;;  %6268 = vpow2.f32 %v4048_v10  ;;  %v5208_v21 = vmul.f32 1.442695, %v5196_v61  ;;  %v3971_v57 = vpop.permute.xlu1 %3970 }
 0x523   : > { %v8724_v8 = vpop.eup %6250  ;;  %v4666_v4 = vand.u32 2147483647, %v8719_v9  ;;  %v8728_v54 = vsub.f32 %v3992_v39, %v8607_v1  ;;  %6270 = vpow2.f32 %v4168_v33  ;;  %v4164_v16 = vmul.f32 1.442695, %v4154_v25 }
 0x524   : > { %9834 = vst [vmem:[#allocation33_spill] sm:$0xff] %v8722_v17  ;;  %v8730_v31 = vpop.eup %6252  ;;  %v8733_v56 = vadd.f32 %v6476_v11, %v8722_v17  ;;  %v5186_v22 = vand.u32 2147483647, %v8722_v17  ;;  %v5088_v13 = vmul.f32 1.442695, %v5076_v34  ;;  %6272 = vpow2.f32 %v4688_v50 }
 0x525   : > { %9835 = vst [vmem:[#allocation40_spill] sm:$0xff] %v8728_v54  ;;  %v8736_v60 = vpop.eup %6254  ;;  %v4674_v27 = vsub.f32 0.0, %v4666_v4  ;;  %v8740_v3 = vadd.f32 %v8349_v49, %v8728_v54  ;;  %v4150_v1 = vand.u32 2147483647, %v8728_v54  ;;  %v8747_v10 = vsub.f32 %v3992_v39, %v8595_v35 }
 0x526   : > { %9836 = vst [vmem:[#allocation35_spill] sm:$0xff] %v8733_v56  ;;  %v8743_v40 = vpop.eup %6256  ;;  %v5066_v33 = vand.u32 2147483647, %v8733_v56  ;;  %v5194_v30 = vsub.f32 0.0, %v5186_v22  ;;  %6274 = vpow2.f32 %v5208_v21  ;;  %v8759_v26 = vsub.f32 %v3992_v39, %v8626_v53 }
 0x527   : > { %9837 = vst [vmem:[#allocation30_spill] sm:$0xff] %v8740_v3  ;;  %9838 = vst [vmem:[#allocation34_spill] sm:$0xff] %v8747_v10  ;;  %v8749_v61 = vpop.eup %6258  ;;  %v4684_v25 = vmul.f32 1.442695, %v4674_v27  ;;  %v4030_v34 = vand.u32 2147483647, %v8740_v3  ;;  %v8753_v43 = vadd.f32 %v6477_v62, %v8747_v10  ;;  %6276 = vpow2.f32 %v5088_v13 }
 0x528   : > { %v4158_v49 = vsub.f32 0.0, %v4150_v1  ;;  %v5074_v4 = vsub.f32 0.0, %v5066_v33  ;;  %v5204_v11 = vmul.f32 1.442695, %v5194_v30  ;;  %v4670_v50 = vand.u32 2147483647, %v8747_v10  ;;  %v8756_v22 = vpop.eup %6260 }
 0x529   : > { %9839 = vst [vmem:[#allocation39_spill] sm:$0xff] %v8753_v43  ;;  %v4038_v35 = vsub.f32 0.0, %v4030_v34  ;;  %9840 = vst [vmem:[#allocation29_spill] sm:$0xff] %v8759_v26  ;;  %v8761_v21 = vpop.eup %6262  ;;  %6278 = vpow2.f32 %v4164_v16  ;;  %v4550_v1 = vand.u32 2147483647, %v8753_v43  ;;  %v8768_v62 = vadd.f32 %v8472_v59, %v8759_v26  ;;  %v6481_v10 = vld [vmem:[#allocation4 + $0x28] sm:$0xff] }
 0x52a   : > { %v4172_v48 = vmul.f32 1.442695, %v4158_v49  ;;  %v5084_v27 = vmul.f32 1.442695, %v5074_v4  ;;  %v4678_v33 = vsub.f32 0.0, %v4670_v50  ;;  %v8764_v30 = vpop.eup %6264  ;;  %6280 = vpow2.f32 %v4684_v25  ;;  %v3985_v49 = vpop.permute.xlu1 %3984 }
 0x52b   : > { %9841 = vst [vmem:[#allocation37_spill] sm:$0xff] %v8768_v62  ;;  %v5190_v13 = vand.u32 2147483647, %v8759_v26  ;;  %v8771_v34 = vpop.eup %6266  ;;  %6282 = vpow2.f32 %v5204_v11  ;;  %v4052_v53 = vmul.f32 1.442695, %v4038_v35  ;;  %v4558_v39 = vsub.f32 0.0, %v4550_v1 }
 0x52c   : > { %v8774_v16 = vsub.f32 %v3971_v57, %v8566_v2  ;;  %v8776_v4 = vpop.eup %6268  ;;  %6284 = vpow2.f32 %v4172_v48  ;;  %v5070_v25 = vand.u32 2147483647, %v8768_v62  ;;  %v8780_v59 = vsub.f32 %v3971_v57, %v8553_v63 }
 0x52d   : > { %v5198_v50 = vsub.f32 0.0, %v5190_v13  ;;  %v8782_v29 = vpop.eup %6270  ;;  %6286 = vpow2.f32 %v5084_v27  ;;  %v4692_v37 = vmul.f32 1.442695, %v4678_v33  ;;  %v8786_v35 = vsub.f32 %v3971_v57, %v8581_v12 }
 0x52e   : > { %v4147_v11 = vand.u32 2147483647, %v8774_v16  ;;  %v4572_v2 = vmul.f32 1.442695, %v4558_v39  ;;  %v5078_v1 = vsub.f32 0.0, %v5070_v25  ;;  %v8790_v48 = vsub.f32 %v3985_v49, %v8577_v42  ;;  %v8792_v13 = vpop.eup %6272  ;;  %v6479_v39 = vld [vmem:[#allocation2 + $0x28] sm:$0xff] }
 0x52f   : > { %9842 = vst [vmem:[#allocation36_spill] sm:$0xff] %v8786_v35  ;;  %v4667_v55 = vand.u32 2147483647, %v8780_v59  ;;  %v5212_v63 = vmul.f32 1.442695, %v5198_v50  ;;  %v8795_v27 = vadd.f32 %v6478_v6, %v8786_v35  ;;  %6288 = vpow2.f32 %v4052_v53 }
 0x530   : > { %v4155_v14 = vsub.f32 0.0, %v4147_v11  ;;  %v5187_v33 = vand.u32 2147483647, %v8786_v35  ;;  %v8798_v26 = vpop.eup %6274  ;;  %v5092_v12 = vmul.f32 1.442695, %v5078_v1  ;;  %v8801_v25 = vadd.f32 %v6479_v39, %v8790_v48  ;;  %v6480_v39 = vld [vmem:[#allocation3 + $0x28] sm:$0xff] }
 0x531   : > { %9843 = vst [vmem:[#allocation32_spill] sm:$0xff] %v8795_v27  ;;  %9844 = vst [vmem:[#allocation41_spill] sm:$0xff] %v8798_v26  ;;  %v4675_v57 = vsub.f32 0.0, %v4667_v55  ;;  %6290 = vpow2.f32 %v4692_v37  ;;  %v5067_v42 = vand.u32 2147483647, %v8795_v27  ;;  %v8805_v11 = vsub.f32 %v3985_v49, %v8599_v32  ;;  %v8807_v6 = vpop.eup %6276 }
 0x532   : > { %v5195_v50 = vsub.f32 0.0, %v5187_v33  ;;  %9846 = vst [vmem:[#allocation15_spill] sm:$0xff] %v8807_v6  ;;  %6292 = vpow2.f32 %v4572_v2  ;;  %v4166_v62 = vmul.f32 1.442695, %v4155_v14  ;;  %v4029_v28 = vand.u32 2147483647, %v8801_v25  ;;  %v3999_v33 = vpop.permute.xlu1 %3998 }
 0x533   : > { %9845 = vst [vmem:[#allocation17_spill] sm:$0xff] %v8805_v11  ;;  %v4149_v53 = vand.u32 2147483647, %v8790_v48  ;;  %v8811_v55 = vpop.eup %6278  ;;  %6294 = vpow2.f32 %v5212_v63  ;;  %v5075_v1 = vsub.f32 0.0, %v5067_v42  ;;  %v8814_v37 = vadd.f32 %v6480_v39, %v8805_v11 }
 0x534   : > { %v8816_v0 = vpop.eup %6280  ;;  %6296 = vpow2.f32 %v5092_v12  ;;  %v4686_v32 = vmul.f32 1.442695, %v4675_v57  ;;  %v4669_v2 = vand.u32 2147483647, %v8805_v11  ;;  %v5206_v26 = vmul.f32 1.442695, %v5195_v50 }
 0x535   : > { %9847 = vst [vmem:[#allocation19_spill] sm:$0xff] %v8814_v37  ;;  %v8819_v14 = vpop.eup %6282  ;;  %v4037_v6 = vsub.f32 0.0, %v4029_v28  ;;  %v4549_v54 = vand.u32 2147483647, %v8814_v37  ;;  %v8823_v63 = vsub.f32 %v3985_v49, %v8603_v20  ;;  %6298 = vpow2.f32 %v4166_v62  ;;  %v6482_v49 = vld [vmem:[#allocation2 + $0x38] sm:$0xff] }
 0x536   : > { %9848 = vst [vmem:[#allocation13_spill] sm:$0xff] %v8819_v14  ;;  %v8825_v42 = vpop.eup %6284  ;;  %v4157_v39 = vsub.f32 0.0, %v4149_v53  ;;  %v8828_v3 = vsub.f32 %v3999_v33, %v8597_v24  ;;  %v5086_v57 = vmul.f32 1.442695, %v5075_v1  ;;  %v4677_v11 = vsub.f32 0.0, %v4669_v2  ;;  %v6487_v14 = vld [vmem:[#allocation3 + $0x18] sm:$0xff] }
 0x537   : > { %9849 = vst [vmem:[#allocation20_spill] sm:$0xff] %v8823_v63  ;;  %9850 = vst [vmem:[#allocation14_spill] sm:$0xff] %v8825_v42  ;;  %v8830_v12 = vpop.eup %6286  ;;  %v8833_v50 = vadd.f32 %v6481_v10, %v8823_v63  ;;  %v5189_v28 = vand.u32 2147483647, %v8823_v63  ;;  %6300 = vpow2.f32 %v4686_v32  ;;  %v4557_v20 = vsub.f32 0.0, %v4549_v54 }
 0x538   : > { %9851 = vst [vmem:[#allocation16_spill] sm:$0xff] %v8828_v3  ;;  %9852 = vst [vmem:[#allocation18_spill] sm:$0xff] %v8830_v12  ;;  %v8837_v42 = vadd.f32 %v6482_v49, %v8828_v3  ;;  %v4151_v62 = vand.u32 2147483647, %v8828_v3  ;;  %6302 = vpow2.f32 %v5206_v26  ;;  %v4050_v24 = vmul.f32 1.442695, %v4037_v6 }
 0x539   : > { %9853 = vst [vmem:[#allocation43_spill] sm:$0xff] %v8833_v50  ;;  %v5069_v53 = vand.u32 2147483647, %v8833_v50  ;;  %v5197_v1 = vsub.f32 0.0, %v5189_v28  ;;  %v8841_v2 = vpop.eup %6288  ;;  %v4170_v37 = vmul.f32 1.442695, %v4157_v39  ;;  %v8845_v32 = vsub.f32 %v3999_v33, %v8617_v58 }
 0x53a   : > { %9854 = vst [vmem:[#allocation44_spill] sm:$0xff] %v8837_v42  ;;  %9855 = vst [vmem:[#allocation45_spill] sm:$0xff] %v8841_v2  ;;  %v4031_v10 = vand.u32 2147483647, %v8837_v42  ;;  %v4159_v43 = vsub.f32 0.0, %v4151_v62  ;;  %6304 = vpow2.f32 %v5086_v57  ;;  %v8850_v26 = vsub.f32 %v3999_v33, %v8619_v41  ;;  %v6483_v57 = vld [vmem:[#allocation4 + $0x38] sm:$0xff] }
 0x53b   : > { %9856 = vst [vmem:[#allocation46_spill] sm:$0xff] %v8845_v32  ;;  %v8847_v54 = vpop.eup %6290  ;;  %v4690_v49 = vmul.f32 1.442695, %v4677_v11  ;;  %v5077_v63 = vsub.f32 0.0, %v5069_v53  ;;  %v4570_v28 = vmul.f32 1.442695, %v4557_v20  ;;  %v8856_v39 = vadd.f32 %v8457_v18, %v8845_v32 }
 0x53c   : > { %9857 = vst [vmem:[#allocation47_spill] sm:$0xff] %v8847_v54  ;;  %9858 = vst [vmem:[#allocation48_spill] sm:$0xff] %v8850_v26  ;;  %v8852_v6 = vpop.eup %6292  ;;  %v4039_v50 = vsub.f32 0.0, %v4031_v10  ;;  %v4671_v62 = vand.u32 2147483647, %v8845_v32  ;;  %6306 = vpow2.f32 %v4050_v24  ;;  %v8862_v11 = vadd.f32 %v6483_v57, %v8850_v26 }
 0x53d   : > { %9859 = vst [vmem:[#allocation49_spill] sm:$0xff] %v8852_v6  ;;  %9860 = vst [vmem:[#allocation50_spill] sm:$0xff] %v8856_v39  ;;  %v8859_v58 = vpop.eup %6294  ;;  %v5210_v3 = vmul.f32 1.442695, %v5197_v1  ;;  %6308 = vpow2.f32 %v4170_v37  ;;  %v4174_v33 = vmul.f32 1.442695, %v4159_v43 }
 0x53e   : > { %9861 = vst [vmem:[#allocation51_spill] sm:$0xff] %v8859_v58  ;;  %9862 = vst [vmem:[#allocation52_spill] sm:$0xff] %v8862_v11  ;;  %v8864_v41 = vpop.eup %6296  ;;  %v4679_v20 = vsub.f32 0.0, %v4671_v62  ;;  %v5191_v53 = vand.u32 2147483647, %v8850_v26  ;;  %6310 = vpow2.f32 %v4690_v49  ;;  %v4065_v43 = vadd.f32 1.0, %v8736_v60 }
 0x53f   : > { %9863 = vst [vmem:[#allocation53_spill] sm:$0xff] %v8864_v41  ;;  %v5090_v18 = vmul.f32 1.442695, %v5077_v63  ;;  %v4551_v10 = vand.u32 2147483647, %v8856_v39  ;;  %v8868_v32 = vpop.eup %6298  ;;  %6312 = vpow2.f32 %v4570_v28  ;;  %v4185_v49 = vadd.f32 1.0, %v8724_v8 }
 0x540   : > { %v4054_v24 = vmul.f32 1.442695, %v4039_v50  ;;  %6314 = vpow2.f32 %v5210_v3  ;;  %v4694_v1 = vmul.f32 1.442695, %v4679_v20  ;;  %v5071_v57 = vand.u32 2147483647, %v8862_v11 }
 0x541   : > { %v8871_v58 = vpop.eup %6300  ;;  %6316 = vpow2.f32 %v4174_v33  ;;  %v5199_v37 = vsub.f32 0.0, %v5191_v53  ;;  %v4559_v63 = vsub.f32 0.0, %v4551_v10  ;;  %v4068_v50 = vmul.f32 -0.5, %v8736_v60 }
 0x542   : > { %v8874_v62 = vpop.eup %6302  ;;  %6318 = vpow2.f32 %v5090_v18  ;;  %v5079_v3 = vsub.f32 0.0, %v5071_v57  ;;  %v4056_v28 = vadd.f32 1.0, %v8749_v61  ;;  %v4071_v33 = vand.u32 2147483647, %v8736_v60 }
 0x543   : > { %9864 = vst [vmem:[#allocation54_spill] sm:$0xff] %v8874_v62  ;;  %6320 = vpow2.f32 %v4054_v24  ;;  %v5214_v20 = vmul.f32 1.442695, %v5199_v37  ;;  %v4574_v26 = vmul.f32 1.442695, %v4559_v63  ;;  %v4176_v10 = vadd.f32 1.0, %v8756_v22 }
 0x544   : > { %v8877_v39 = vpop.eup %6304  ;;  %6322 = vpow2.f32 %v4694_v1  ;;  %v4188_v57 = vmul.f32 -0.5, %v8724_v8  ;;  %v4059_v37 = vmul.f32 -0.5, %v8749_v61  ;;  %v8893_v11 = vmul.f32 1.442695, %v5079_v3  ;;  %v6484_v63 = vld [vmem:[#allocation3] sm:$0xff] }
 0x545   : > { %6324 = vlog2.f32 %v4065_v43  ;;  %v4069_v41 = vadd.f32 1.0, %v4068_v50  ;;  %vm8900_vm10 = vcmp.lt.f32.partialorder %v4071_v33, 0.0004427343  ;;  %v4696_v42 = vadd.f32 1.0, %v8761_v21 }
 0x546   : > { %v8882_v53 = vpop.eup %6306  ;;  %6326 = vlog2.f32 %v4185_v49  ;;  %v8896_v49 = vadd.f32 %v6484_v63, %v8670_v51  ;;  %v4179_v3 = vmul.f32 -0.5, %v8756_v22  ;;  %v4189_v33 = vadd.f32 1.0, %v4188_v57 }
 0x547   : > { %v8886_v24 = vpop.eup %6308  ;;  %6328 = vlog2.f32 %v4056_v28  ;;  %v4191_v28 = vand.u32 2147483647, %v8724_v8  ;;  %v4060_v17 = vadd.f32 1.0, %v4059_v37  ;;  %v4062_v56 = vand.u32 2147483647, %v8749_v61 }
 0x548   : > { %v8891_v43 = vpop.eup %6310  ;;  %6330 = vlog2.f32 %v4176_v10  ;;  %v4544_v50 = vand.u32 2147483647, %v8896_v49  ;;  %v6485_v10 = vld [vmem:[#allocation3 + $0x10] sm:$0xff]  ;;  %v4714_v57 = vadd.f32 1.0, %v8816_v0  ;;  %v9881_v62 = vmax.f32 %v8658_v52, 0.0 }
 0x549   : > { %9865 = vst [vmem:[#allocation55_spill] sm:$0xff] %v8891_v43  ;;  %v8898_v18 = vpop.eup %6312  ;;  %6332 = vpow2.f32 %v5214_v20  ;;  %v8911_v63 = vadd.f32 %v6485_v10, %v8719_v9  ;;  %v4016_v43 = vmax.f32 %v8682_v5, 0.0  ;;  %vm8924_vm7 = vcmp.lt.f32.partialorder %v4191_v28, 0.0004427343 }
 0x54a   : > { %9866 = vst [vmem:[#allocation56_spill] sm:$0xff] %v8898_v18  ;;  %v8906_v2 = vpop.eup %6314  ;;  %6334 = vpow2.f32 %v4574_v26  ;;  %v4070_v26 = vmul.f32 %v8736_v60, %v4069_v41  ;;  %v4552_v54 = vsub.f32 0.0, %v4544_v50  ;;  %v4136_v5 = vmax.f32 %v8667_v44, 0.0 }
 0x54b   : > { %9869 = vst [vmem:[#allocation57_spill] sm:$0xff] %v8906_v2  ;;  %v8913_v20 = vpop.eup %6316  ;;  %v4182_v2 = vand.u32 2147483647, %v8756_v22  ;;  %v4546_v6 = vand.u32 2147483647, %v8911_v63  ;;  %6336 = vlog2.f32 %v4696_v42  ;;  %v4190_v28 = vmul.f32 %v8724_v8, %v4189_v33 }
 0x54c   : > { %9870 = vst [vmem:[#allocation58_spill] sm:$0xff] %v8913_v20  ;;  %v8917_v18 = vpop.eup %6318  ;;  %v4560_v60 = vmul.f32 1.442695, %v4552_v54  ;;  %v6486_v20 = vld [vmem:[#allocation3 + $0x8] sm:$0xff]  ;;  %vm8937_vm3 = vcmp.lt.f32.partialorder %v4062_v56, 0.0004427343 }
 0x54d   : > { %9871 = vst [vmem:[#allocation59_spill] sm:$0xff] %v8917_v18  ;;  %v8922_v35 = vpop.eup %6320  ;;  %v4180_v18 = vadd.f32 1.0, %v4179_v3  ;;  %v4554_v41 = vsub.f32 0.0, %v4546_v6  ;;  %v8933_v50 = vadd.f32 %v6486_v20, %v8661_v15  ;;  %v4699_v44 = vmul.f32 -0.5, %v8761_v21 }
 0x54e   : > { %9872 = vst [vmem:[#allocation60_spill] sm:$0xff] %v8922_v35  ;;  %v8930_v37 = vpop.eup %6322  ;;  %v4061_v35 = vmul.f32 %v8749_v61, %v4060_v17  ;;  %vm8942_vm6 = vcmp.lt.f32.partialorder %v4182_v2, 0.0004427343  ;;  %6338 = vpow2.f32 %v4560_v60  ;;  %v4705_v17 = vadd.f32 1.0, %v8730_v31 }
 0x54f   : > { %9875 = vst [vmem:[#allocation61_spill] sm:$0xff] %v8930_v37  ;;  %v6325_v27 = vpop.eup %6324  ;;  %v4564_v6 = vmul.f32 1.442695, %v4554_v41  ;;  %6340 = vlog2.f32 %v4714_v57  ;;  %v4545_v8 = vand.u32 2147483647, %v8933_v50  ;;  %v9880_v60 = vmax.f32 %v8676_v45, 0.0 }
 0x550   : > { %v6327_v42 = vpop.eup %6326  ;;  %v4067_v37 = vmul.f32 0.6931472, %v6325_v27  ;;  %v4181_v27 = vmul.f32 %v8756_v22, %v4180_v18  ;;  %v4717_v22 = vmul.f32 -0.5, %v8816_v0  ;;  %v4708_v18 = vmul.f32 -0.5, %v8730_v31 }
 0x551   : > { %v6329_v3 = vpop.eup %6328  ;;  %v4187_v20 = vmul.f32 0.6931472, %v6327_v42  ;;  %6342 = vpow2.f32 %v4564_v6  ;;  %v4553_v12 = vsub.f32 0.0, %v4545_v8 }
 0x552   : > { %v6331_v56 = vpop.eup %6330  ;;  %v4073_v61 = vsel %vm8900_vm10, %v4070_v26, %v4067_v37  ;;  %v4058_v33 = vmul.f32 0.6931472, %v6329_v3  ;;  %6344 = vlog2.f32 %v4705_v17  ;;  %v4700_v3 = vadd.f32 1.0, %v4699_v44 }
 0x553   : > { %v8951_v2 = vpop.eup %6332  ;;  %v4129_v41 = vadd.f32 %v4073_v61, %v9880_v60  ;;  %v4193_v57 = vsel %vm8924_vm7, %v4190_v28, %v4187_v20  ;;  %v4178_v42 = vmul.f32 0.6931472, %v6331_v56  ;;  %v4562_v10 = vmul.f32 1.442695, %v4553_v12 }
 0x554   : > { %v8957_v46 = vpop.eup %6334  ;;  %v4249_v1 = vadd.f32 %v4193_v57, %v9881_v62  ;;  %v4064_v26 = vsel %vm8937_vm3, %v4061_v35, %v4058_v33  ;;  %6346 = vpow2.f32 %v8893_v11  ;;  %v4656_v62 = vmax.f32 %v8670_v51, 0.0 }
 0x555   : > { %v4128_v37 = vadd.f32 %v4064_v26, %v4016_v43  ;;  %v4184_v45 = vsel %vm8942_vm6, %v4181_v27, %v4178_v42  ;;  %v6337_v52 = vpop.eup %6336  ;;  %v4702_v35 = vand.u32 2147483647, %v8761_v21  ;;  %6348 = vpow2.f32 %v4562_v10 }
 0x556   : > { %v4257_v28 = vsub.f32 %v4129_v41, %v4249_v1  ;;  %v4248_v6 = vadd.f32 %v4184_v45, %v4136_v5  ;;  %v8971_v20 = vadd.f32 %v6487_v14, %v8780_v59  ;;  %v4536_v12 = vmax.f32 %v8896_v49, 0.0  ;;  %v6488_v1 = vld [vmem:[#allocation2 + $0x10] sm:$0xff] }
 0x557   : > { %v4718_v54 = vadd.f32 1.0, %v4717_v22  ;;  %v4720_v11 = vand.u32 2147483647, %v8816_v0  ;;  %v4538_v5 = vmax.f32 %v8911_v63, 0.0  ;;  %v4658_v44 = vmax.f32 %v8719_v9, 0.0 }
 0x558   : > { %4296 = vxpose.xlu1.b32.start.end [1/1] (short) (narrow) %v4257_v28, 8  ;;  %v4256_v43 = vsub.f32 %v4128_v37, %v4248_v6  ;;  %v4709_v8 = vadd.f32 1.0, %v4708_v18  ;;  %v4547_v51 = vand.u32 2147483647, %v8971_v20  ;;  %v6339_v17 = vpop.eup %6338  ;;  %v4698_v56 = vmul.f32 0.6931472, %v6337_v52 }
 0x559   : > { %v4701_v61 = vmul.f32 %v8761_v21, %v4700_v3  ;;  %v4711_v33 = vand.u32 2147483647, %v8730_v31  ;;  %v4723_v27 = vadd.f32 1.0, %v8871_v58  ;;  %v6341_v60 = vpop.eup %6340  ;;  %v4576_v41 = vadd.f32 1.0, %v6339_v17 }
 0x55a   : > { %4264 = vxpose.xlu0.b32.start.end [1/1] (short) (narrow) %v4256_v43, 8  ;;  %vm8981_vm11 = vcmp.lt.f32.partialorder %v4702_v35, 0.0004427343  ;;  %v4555_v42 = vsub.f32 0.0, %v4547_v51  ;;  %v8986_v26 = vadd.f32 %v6488_v1, %v8708_v47  ;;  %v4719_v18 = vmul.f32 %v8816_v0, %v4718_v54 }
 0x55b   : > { %v6343_v22 = vpop.eup %6342  ;;  %vm8989_vm9 = vcmp.lt.f32.partialorder %v4720_v11, 0.0004427343  ;;  %v4657_v37 = vmax.f32 %v8661_v15, 0.0  ;;  %v4726_v45 = vmul.f32 -0.5, %v8871_v58  ;;  %6350 = vlog2.f32 %v4576_v41 }
 0x55c   : > { %v4594_v10 = vadd.f32 1.0, %v6343_v22  ;;  %v4710_v6 = vmul.f32 %v8730_v31, %v4709_v8  ;;  %v4704_v3 = vsel %vm8981_vm11, %v4701_v61, %v4698_v56  ;;  %vm8999_vm13 = vcmp.lt.f32.partialorder %v4711_v33, 0.0004427343  ;;  %v6345_v35 = vpop.eup %6344 }
 0x55d   : > { %v4566_v0 = vmul.f32 1.442695, %v4555_v42  ;;  %6352 = vlog2.f32 %v4723_v27  ;;  %v4579_v14 = vmul.f32 -0.5, %v6339_v17  ;;  %v4026_v43 = vand.u32 2147483647, %v8986_v26 }
 0x55e   : > { %6354 = vlog2.f32 %v4594_v10  ;;  %v9005_v54 = vpop.eup %6346  ;;  %v4597_v11 = vmul.f32 -0.5, %v6343_v22  ;;  %v4716_v31 = vmul.f32 0.6931472, %v6341_v60  ;;  %v4727_v8 = vadd.f32 1.0, %v4726_v45 }
 0x55f   : > { %6356 = vpow2.f32 %v4566_v0  ;;  %v6349_v51 = vpop.eup %6348  ;;  %v9007_v56 = vadd.f32 %v4704_v3, %v4656_v62  ;;  %v4729_v61 = vand.u32 2147483647, %v8871_v58  ;;  %v4034_v33 = vsub.f32 0.0, %v4026_v43  ;;  %v6489_v43 = vld [vmem:[#allocation4 + $0x8] sm:$0xff] }
 0x560   : > { %v4194_v27 = vadd.f32 1.0, %v8811_v55  ;;  %v4582_v41 = vand.u32 2147483647, %v6339_v17  ;;  %v4585_v57 = vadd.f32 1.0, %v6349_v51  ;;  %v4707_v42 = vmul.f32 0.6931472, %v6345_v35 }
 0x561   : > { %v4539_v1 = vmax.f32 %v8971_v20, 0.0  ;;  %v4580_v10 = vadd.f32 1.0, %v4579_v14  ;;  %v4600_v15 = vand.u32 2147483647, %v6343_v22  ;;  %v4044_v28 = vmul.f32 1.442695, %v4034_v33 }
 0x562   : > { %6358 = vlog2.f32 %v4194_v27  ;;  %v4598_v60 = vadd.f32 1.0, %v4597_v11  ;;  %v4722_v45 = vsel %vm8989_vm9, %v4719_v18, %v4716_v31  ;;  %v9015_v62 = vmul.f32 %v8871_v58, %v4727_v8 }
 0x563   : > { %6360 = vlog2.f32 %v4585_v57  ;;  %v4588_v3 = vmul.f32 -0.5, %v6349_v51  ;;  %v4197_v0 = vmul.f32 -0.5, %v8811_v55  ;;  %v9019_v35 = vadd.f32 %v6489_v43, %v8664_v19 }
 0x564   : > { %6362 = vpow2.f32 %v4044_v28  ;;  %vm9021_vm12 = vcmp.lt.f32.partialorder %v4582_v41, 0.0004427343  ;;  %v4591_v11 = vand.u32 2147483647, %v6349_v51  ;;  %v4713_v18 = vsel %vm8999_vm13, %v4710_v6, %v4707_v42 }
 0x565   : > { %v6351_v58 = vpop.eup %6350  ;;  %v4581_v31 = vmul.f32 %v6339_v17, %v4580_v10  ;;  %vm9028_vm14 = vcmp.lt.f32.partialorder %v4600_v15, 0.0004427343  ;;  %v4770_v8 = vadd.f32 %v4722_v45, %v4658_v44  ;;  %v5065_v33 = vand.u32 2147483647, %v9019_v35 }
 0x566   : > { %v4578_v41 = vmul.f32 0.6931472, %v6351_v58  ;;  %v4599_v57 = vmul.f32 %v6343_v22, %v4598_v60  ;;  %vm9035_vm15 = vcmp.lt.f32.partialorder %v4729_v61, 0.0004427343  ;;  %v4138_v6 = vmax.f32 %v8708_v47, 0.0  ;;  %v6490_v61 = vld [vmem:[#allocation3 + $0x20] sm:$0xff] }
 0x567   : > { %v6353_v27 = vpop.eup %6352  ;;  %v5225_v17 = vadd.f32 1.0, %v8743_v40  ;;  %v4589_v15 = vadd.f32 1.0, %v4588_v3  ;;  %v4769_v42 = vadd.f32 %v4713_v18, %v4657_v37  ;;  %v4198_v10 = vadd.f32 1.0, %v4197_v0  ;;  %v6491_v22 = vld [vmem:[#allocation2 + $0x18] sm:$0xff] }
 0x568   : > { %v6355_v52 = vpop.eup %6354  ;;  %v5073_v21 = vsub.f32 0.0, %v5065_v33  ;;  %v4584_v44 = vsel %vm9021_vm12, %v4581_v31, %v4578_v41  ;;  %vm9045_vm10 = vcmp.lt.f32.partialorder %v4591_v11, 0.0004427343  ;;  %v9050_v60 = vadd.f32 %v6490_v61, %v8701_v38 }
 0x569   : > { %v9041_v9 = vpop.eup %6356  ;;  %v4596_v45 = vmul.f32 0.6931472, %v6355_v52  ;;  %v4648_v3 = vadd.f32 %v4584_v44, %v4536_v12  ;;  %v4200_v0 = vand.u32 2147483647, %v8811_v55  ;;  %v4732_v18 = vadd.f32 1.0, %v8792_v13 }
 0x56a   : > { %v4603_v37 = vadd.f32 1.0, %v9041_v9  ;;  %v4725_v11 = vmul.f32 0.6931472, %v6353_v27  ;;  %v5082_v58 = vmul.f32 1.442695, %v5073_v21  ;;  %6364 = vlog2.f32 %v5225_v17 }
 0x56b   : > { %v4602_v14 = vsel %vm9028_vm14, %v4599_v57, %v4596_v45  ;;  %v4776_v33 = vsub.f32 %v4648_v3, %v9007_v56  ;;  %v4199_v49 = vmul.f32 %v8811_v55, %v4198_v10  ;;  %v4590_v52 = vmul.f32 %v6349_v51, %v4589_v15 }
 0x56c   : > { %v6359_v31 = vpop.eup %6358  ;;  %v4650_v41 = vadd.f32 %v4602_v14, %v4538_v5  ;;  %6366 = vlog2.f32 %v4603_v37  ;;  %v5228_v44 = vmul.f32 -0.5, %v8743_v40  ;;  %v4548_v28 = vand.u32 2147483647, %v9050_v60 }
 0x56d   : > { %v6361_v12 = vpop.eup %6360  ;;  %6368 = vpow2.f32 %v5082_v58  ;;  %4784 = vxpose.xlu0.b32.start.end [1/1] (short) (narrow) %v4776_v33, 8  ;;  %v4606_v17 = vmul.f32 -0.5, %v9041_v9  ;;  %v4196_v63 = vmul.f32 0.6931472, %v6359_v31  ;;  %vm9066_vm7 = vcmp.lt.f32.partialorder %v4200_v0, 0.0004427343 }
 0x56e   : > { %v6363_v57 = vpop.eup %6362  ;;  %v4778_v21 = vsub.f32 %v4650_v41, %v4770_v8  ;;  %v4587_v27 = vmul.f32 0.6931472, %v6361_v12  ;;  %6370 = vlog2.f32 %v4732_v18  ;;  %v5177_v55 = vmax.f32 %v8664_v19, 0.0 }
 0x56f   : > { %v4074_v56 = vadd.f32 1.0, %v6363_v57  ;;  %v4731_v8 = vsel %vm9035_vm15, %v9015_v62, %v4725_v11  ;;  %v5057_v15 = vmax.f32 %v9019_v35, 0.0  ;;  %v4556_v10 = vsub.f32 0.0, %v4548_v28 }
 0x570   : > { %4848 = vxpose.xlu1.b32.start.end [1/1] (short) (narrow) %v4778_v21, 8  ;;  %v4593_v51 = vsel %vm9045_vm10, %v4590_v52, %v4587_v27  ;;  %v9898_v45 = vmax.f32 %v8933_v50, 0.0  ;;  %v5229_v3 = vadd.f32 1.0, %v5228_v44  ;;  %v5231_v37 = vand.u32 2147483647, %v8743_v40 }
 0x571   : > { %6372 = vlog2.f32 %v4074_v56  ;;  %v4607_v0 = vadd.f32 1.0, %v4606_v17  ;;  %v4609_v18 = vand.u32 2147483647, %v9041_v9  ;;  %v4568_v14 = vmul.f32 1.442695, %v4556_v10 }
 0x572   : > { %v4649_v61 = vadd.f32 %v4593_v51, %v9898_v45  ;;  %v9082_v58 = vadd.f32 %v6491_v22, %v8774_v16  ;;  %v4077_v62 = vmul.f32 -0.5, %v6363_v57  ;;  %v4080_v11 = vand.u32 2147483647, %v6363_v57 }
 0x573   : > { %v4202_v31 = vsel %vm9066_vm7, %v4199_v49, %v4196_v63  ;;  %v9899_v50 = vmax.f32 %v8780_v59, 0.0  ;;  %6374 = vpow2.f32 %v4568_v14  ;;  %v4660_v41 = vmax.f32 %v8701_v38, 0.0 }
 0x574   : > { %v4777_v43 = vsub.f32 %v4649_v61, %v4769_v42  ;;  %v4735_v12 = vmul.f32 -0.5, %v8792_v13  ;;  %v6365_v52 = vpop.eup %6364  ;;  %v5230_v44 = vmul.f32 %v8743_v40, %v5229_v3  ;;  %vm9091_vm3 = vcmp.lt.f32.partialorder %v5231_v37, 0.0004427343 }
 0x575   : > { %v4771_v33 = vadd.f32 %v4731_v8, %v9899_v50  ;;  %v4027_v42 = vand.u32 2147483647, %v9082_v58  ;;  %v4203_v49 = vadd.f32 1.0, %v8868_v32  ;;  %v4608_v59 = vmul.f32 %v9041_v9, %v4607_v0 }
 0x576   : > { %4816 = vxpose.xlu0.b32.start.end [1/1] (short) (narrow) %v4777_v43, 8  ;;  %v6367_v21 = vpop.eup %6366  ;;  %vm9098_vm6 = vcmp.lt.f32.partialorder %v4609_v18, 0.0004427343  ;;  %v4250_v17 = vadd.f32 %v4202_v31, %v4138_v6  ;;  %v4540_v40 = vmax.f32 %v9050_v60, 0.0  ;;  %v4078_v5 = vadd.f32 1.0, %v4077_v62 }
 0x577   : > { %v6369_v56 = vpop.eup %6368  ;;  %v4605_v63 = vmul.f32 0.6931472, %v6367_v21  ;;  %vm9105_vm11 = vcmp.lt.f32.partialorder %v4080_v11, 0.0004427343  ;;  %v4035_v8 = vsub.f32 0.0, %v4027_v42  ;;  %v4736_v61 = vadd.f32 1.0, %v4735_v12 }
 0x578   : > { %v6371_v10 = vpop.eup %6370  ;;  %v5105_v45 = vadd.f32 1.0, %v6369_v56  ;;  %v5227_v9 = vmul.f32 0.6931472, %v6365_v52  ;;  %6376 = vlog2.f32 %v4203_v49  ;;  %v4738_v47 = vand.u32 2147483647, %v8792_v13 }
 0x579   : > { %v4611_v3 = vsel %vm9098_vm6, %v4608_v59, %v4605_v63  ;;  %v4046_v6 = vmul.f32 1.442695, %v4035_v8  ;;  %v4206_v37 = vmul.f32 -0.5, %v8868_v32  ;;  %v5108_v18 = vmul.f32 -0.5, %v6369_v56 }
 0x57a   : > { %v4651_v0 = vadd.f32 %v4611_v3, %v4539_v1  ;;  %6378 = vlog2.f32 %v5105_v45  ;;  %v4734_v14 = vmul.f32 0.6931472, %v6371_v10  ;;  %v4079_v43 = vmul.f32 %v6363_v57, %v4078_v5 }
 0x57b   : > { %v6373_v22 = vpop.eup %6372  ;;  %6380 = vpow2.f32 %v4046_v6  ;;  %v4139_v62 = vmax.f32 %v8774_v16, 0.0  ;;  %v5096_v11 = vadd.f32 1.0, %v8764_v30  ;;  %v4737_v12 = vmul.f32 %v8792_v13, %v4736_v61 }
 0x57c   : > { %v4779_v31 = vsub.f32 %v4651_v0, %v4771_v33  ;;  %v4076_v50 = vmul.f32 0.6931472, %v6373_v22  ;;  %v5099_v52 = vmul.f32 -0.5, %v8764_v30  ;;  %v5111_v42 = vand.u32 2147483647, %v6369_v56 }
 0x57d   : > { %v5233_v20 = vsel %vm9091_vm3, %v5230_v44, %v5227_v9  ;;  %vm9121_vm9 = vcmp.lt.f32.partialorder %v4738_v47, 0.0004427343  ;;  %v4209_v57 = vand.u32 2147483647, %v8868_v32  ;;  %v6375_v49 = vpop.eup %6374  ;;  %v5109_v21 = vadd.f32 1.0, %v5108_v18 }
 0x57e   : > { %4880 = vxpose.xlu1.b32.start.end [1/1] (short) (narrow) %v4779_v31, 8  ;;  %v4082_v33 = vsel %vm9105_vm11, %v4079_v43, %v4076_v50  ;;  %v4740_v13 = vsel %vm9121_vm9, %v4737_v12, %v4734_v14  ;;  %v4207_v59 = vadd.f32 1.0, %v4206_v37  ;;  %v9908_v27 = vmax.f32 %v8986_v26, 0.0 }
 0x57f   : > { %v4612_v44 = vadd.f32 1.0, %v6375_v49  ;;  %6382 = vlog2.f32 %v5096_v11  ;;  %v5216_v63 = vadd.f32 1.0, %v8771_v34  ;;  %v5289_v5 = vadd.f32 %v5233_v20, %v5177_v55 }
 0x580   : > { %v4130_v28 = vadd.f32 %v4082_v33, %v9908_v27  ;;  %v4019_v8 = vmax.f32 %v9082_v58, 0.0  ;;  %v5056_v51 = vmax.f32 %v8687_v23, 0.0  ;;  %v5100_v10 = vadd.f32 1.0, %v5099_v52 }
 0x581   : > { %vm9137_vm13 = vcmp.lt.f32.partialorder %v5111_v42, 0.0004427343  ;;  %6384 = vlog2.f32 %v4612_v44  ;;  %vm9141_vm12 = vcmp.lt.f32.partialorder %v4209_v57, 0.0004427343  ;;  %v5110_v3 = vmul.f32 %v6369_v56, %v5109_v21 }
 0x582   : > { %v4258_v45 = vsub.f32 %v4130_v28, %v4250_v17  ;;  %v6377_v61 = vpop.eup %6376  ;;  %v9147_v19 = vadd.f32 %v4740_v13, %v4660_v41  ;;  %v4208_v55 = vmul.f32 %v8868_v32, %v4207_v59  ;;  %v4101_v47 = vadd.f32 1.0, %v8882_v53 }
 0x583   : > { %v4615_v17 = vmul.f32 -0.5, %v6375_v49  ;;  %v5102_v6 = vand.u32 2147483647, %v8764_v30  ;;  %6386 = vlog2.f32 %v5216_v63  ;;  %v5219_v37 = vmul.f32 -0.5, %v8771_v34 }
 0x584   : > { %4328 = vxpose.xlu0.b32.start.end [1/1] (short) (narrow) %v4258_v45, 8  ;;  %v6379_v0 = vpop.eup %6378  ;;  %v4618_v18 = vand.u32 2147483647, %v6375_v49  ;;  %v9154_v14 = vmul.f32 %v8764_v30, %v5100_v10  ;;  %6388 = vlog2.f32 %v4101_v47  ;;  %v4221_v38 = vadd.f32 1.0, %v8886_v24  ;;  %v9932_v47 = vld [vmem:[#allocation13_spill] sm:$0xff] }
 0x585   : > { %v6381_v41 = vpop.eup %6380  ;;  %v5107_v56 = vmul.f32 0.6931472, %v6379_v0  ;;  %v4205_v32 = vmul.f32 0.6931472, %v6377_v61  ;;  %v5176_v22 = vmax.f32 %v8673_v36, 0.0  ;;  %v4104_v43 = vmul.f32 -0.5, %v8882_v53 }
 0x586   : > { %v4083_v11 = vadd.f32 1.0, %v6381_v41  ;;  %v5222_v31 = vand.u32 2147483647, %v8771_v34  ;;  %6390 = vlog2.f32 %v4221_v38  ;;  %v4224_v50 = vmul.f32 -0.5, %v8886_v24 }
 0x587   : > { %v5113_v30 = vsel %vm9137_vm13, %v5110_v3, %v5107_v56  ;;  %v4616_v12 = vadd.f32 1.0, %v4615_v17  ;;  %vm9163_vm14 = vcmp.lt.f32.partialorder %v5102_v6, 0.0004427343  ;;  %v5220_v42 = vadd.f32 1.0, %v5219_v37 }
 0x588   : > { %v5169_v20 = vadd.f32 %v5113_v30, %v5057_v15  ;;  %vm9169_vm15 = vcmp.lt.f32.partialorder %v4618_v18, 0.0004427343  ;;  %6392 = vlog2.f32 %v4083_v11  ;;  %v4086_v57 = vmul.f32 -0.5, %v6381_v41 }
 0x589   : > { %v6383_v33 = vpop.eup %6382  ;;  %v4089_v21 = vand.u32 2147483647, %v6381_v41  ;;  %v4211_v13 = vsel %vm9141_vm12, %v4208_v55, %v4205_v32  ;;  %v4105_v59 = vadd.f32 1.0, %v4104_v43  ;;  %v4107_v27 = vand.u32 2147483647, %v8882_v53 }
 0x58a   : > { %v5297_v28 = vsub.f32 %v5169_v20, %v5289_v5  ;;  %v4225_v44 = vadd.f32 1.0, %v4224_v50  ;;  %v4227_v63 = vand.u32 2147483647, %v8886_v24  ;;  %v4092_v35 = vadd.f32 1.0, %v8776_v4 }
 0x58b   : > { %v6385_v15 = vpop.eup %6384  ;;  %v4617_v10 = vmul.f32 %v6375_v49, %v4616_v12  ;;  %v5221_v45 = vmul.f32 %v8771_v34, %v5220_v42  ;;  %v4021_v9 = vmax.f32 %v8801_v25, 0.0  ;;  %v4141_v61 = vmax.f32 %v8790_v48, 0.0  ;;  %v9925_v42 = vld [vmem:[#allocation54_spill] sm:$0xff]  ;;  %v9933_v34 = vld [vmem:[#allocation32_spill] sm:$0xff] }
 0x58c   : > { %5336 = vxpose.xlu1.b32.start.end [1/1] (short) (narrow) %v5297_v28, 8  ;;  %v4614_v26 = vmul.f32 0.6931472, %v6385_v15  ;;  %v4087_v3 = vadd.f32 1.0, %v4086_v57  ;;  %v5098_v55 = vmul.f32 0.6931472, %v6383_v33  ;;  %6394 = vlog2.f32 %v4092_v35 }
 0x58d   : > { %vm9181_vm10 = vcmp.lt.f32.partialorder %v5222_v31, 0.0004427343  ;;  %v6387_v5 = vpop.eup %6386  ;;  %v4251_v17 = vadd.f32 %v4211_v13, %v4139_v62  ;;  %v4106_v49 = vmul.f32 %v8882_v53, %v4105_v59  ;;  %vm9188_vm7 = vcmp.lt.f32.partialorder %v4107_v27, 0.0004427343  ;;  %v9926_v57 = vld [vmem:[#allocation42_spill] sm:$0xff] }
 0x58e   : > { %v4212_v48 = vadd.f32 1.0, %v8782_v29  ;;  %v6389_v25 = vpop.eup %6388  ;;  %v4620_v6 = vsel %vm9169_vm15, %v4617_v10, %v4614_v26  ;;  %vm9195_vm3 = vcmp.lt.f32.partialorder %v4089_v21, 0.0004427343  ;;  %v4226_v0 = vmul.f32 %v8886_v24, %v4225_v44 }
 0x58f   : > { %vm9200_vm6 = vcmp.lt.f32.partialorder %v4227_v63, 0.0004427343  ;;  %v4652_v53 = vadd.f32 %v4620_v6, %v4540_v40  ;;  %v4103_v62 = vmul.f32 0.6931472, %v6389_v25  ;;  %v4095_v18 = vmul.f32 -0.5, %v8776_v4 }
 0x590   : > { %6396 = vlog2.f32 %v4212_v48  ;;  %v6391_v38 = vpop.eup %6390  ;;  %v4088_v56 = vmul.f32 %v6381_v41, %v4087_v3  ;;  %v5104_v32 = vsel %vm9163_vm14, %v9154_v14, %v5098_v55  ;;  %v4020_v43 = vmax.f32 %v8697_v7, 0.0 }
 0x591   : > { %v5123_v24 = vadd.f32 1.0, %v8877_v39  ;;  %v4780_v11 = vsub.f32 %v4652_v53, %v9147_v19  ;;  %v5218_v31 = vmul.f32 0.6931472, %v6387_v5  ;;  %v4109_v60 = vsel %vm9188_vm7, %v4106_v49, %v4103_v62  ;;  %v9934_v53 = vld [vmem:[#allocation36_spill] sm:$0xff] }
 0x592   : > { %v4223_v40 = vmul.f32 0.6931472, %v6391_v38  ;;  %v6393_v50 = vpop.eup %6392  ;;  %v4133_v30 = vadd.f32 %v4109_v60, %v4021_v9  ;;  %v4098_v12 = vand.u32 2147483647, %v8776_v4  ;;  %v4215_v41 = vmul.f32 -0.5, %v8782_v29  ;;  %v9929_v9 = vld [vmem:[#allocation18_spill] sm:$0xff] }
 0x593   : > { %6398 = vlog2.f32 %v5123_v24  ;;  %4912 = vxpose.xlu1.b32.start.end [1/1] (short) (narrow) %v4780_v11, 8  ;;  %v4085_v14 = vmul.f32 0.6931472, %v6393_v50  ;;  %v4096_v52 = vadd.f32 1.0, %v4095_v18  ;;  %v5243_v19 = vadd.f32 1.0, %v9925_v42  ;;  %v9935_v18 = vld [vmem:[#allocation49_spill] sm:$0xff] }
 0x594   : > { %v4229_v7 = vsel %vm9200_vm6, %v4226_v0, %v4223_v40  ;;  %v5168_v20 = vadd.f32 %v5104_v32, %v5056_v51  ;;  %v4140_v33 = vmax.f32 %v9926_v57, 0.0  ;;  %v4218_v21 = vand.u32 2147483647, %v8782_v29 }
 0x595   : > { %v4253_v1 = vadd.f32 %v4229_v7, %v4141_v61  ;;  %v4091_v13 = vsel %vm9195_vm3, %v4088_v56, %v4085_v14  ;;  %v5224_v59 = vsel %vm9181_vm10, %v5221_v45, %v5218_v31  ;;  %v5126_v27 = vmul.f32 -0.5, %v8877_v39 }
 0x596   : > { %6400 = vlog2.f32 %v5243_v19  ;;  %v6395_v28 = vpop.eup %6394  ;;  %v4131_v44 = vadd.f32 %v4091_v13, %v4019_v8  ;;  %vm9231_vm11 = vcmp.lt.f32.partialorder %v4098_v12, 0.0004427343  ;;  %v4216_v63 = vadd.f32 1.0, %v4215_v41 }
 0x597   : > { %v4261_v23 = vsub.f32 %v4133_v30, %v4253_v1  ;;  %v4094_v35 = vmul.f32 0.6931472, %v6395_v28  ;;  %v4097_v15 = vmul.f32 %v8776_v4, %v4096_v52  ;;  %v5246_v10 = vmul.f32 -0.5, %v9925_v42  ;;  %v9940_v30 = vld [vmem:[#allocation47_spill] sm:$0xff]  ;;  %v9941_v1 = vld [vmem:[#allocation56_spill] sm:$0xff] }
 0x598   : > { %v5114_v45 = vadd.f32 1.0, %v9929_v9  ;;  %v4259_v61 = vsub.f32 %v4131_v44, %v4251_v17  ;;  %v5288_v26 = vadd.f32 %v5224_v59, %v5176_v22  ;;  %vm9240_vm9 = vcmp.lt.f32.partialorder %v4218_v21, 0.0004427343  ;;  %v9942_v21 = vld [vmem:[#allocation35_spill] sm:$0xff]  ;;  %v9945_v59 = vld [vmem:[#allocation33_spill] sm:$0xff] }
 0x599   : > { %4424 = vxpose.xlu1.b32.start.end [1/1] (short) (narrow) %v4261_v23, 8  ;;  %v5129_v8 = vand.u32 2147483647, %v8877_v39  ;;  %v4100_v55 = vsel %vm9231_vm11, %v4097_v15, %v4094_v35  ;;  %v5127_v4 = vadd.f32 1.0, %v5126_v27  ;;  %v5234_v5 = vadd.f32 1.0, %v9932_v47  ;;  %v9946_v35 = vld [vmem:[#allocation39_spill] sm:$0xff] }
 0x59a   : > { %v6397_v3 = vpop.eup %6396  ;;  %6402 = vlog2.f32 %v5114_v45  ;;  %4360 = vxpose.xlu0.b32.start.end [1/1] (short) (narrow) %v4259_v61, 8  ;;  %v5296_v17 = vsub.f32 %v5168_v20, %v5288_v26  ;;  %v4217_v36 = vmul.f32 %v8782_v29, %v4216_v63  ;;  %v5249_v22 = vand.u32 2147483647, %v9925_v42 }
 0x59b   : > { %v4214_v49 = vmul.f32 0.6931472, %v6397_v3  ;;  %v5059_v48 = vmax.f32 %v9933_v34, 0.0  ;;  %v5247_v25 = vadd.f32 1.0, %v5246_v10  ;;  %v5117_v6 = vmul.f32 -0.5, %v9929_v9  ;;  %v9949_v3 = vld [vmem:[#allocation55_spill] sm:$0xff] }
 0x59c   : > { %6404 = vlog2.f32 %v5234_v5  ;;  %v4132_v0 = vadd.f32 %v4100_v55, %v4020_v43  ;;  %v5179_v62 = vmax.f32 %v9934_v53, 0.0  ;;  %v4630_v38 = vadd.f32 1.0, %v9935_v18  ;;  %v9950_v5 = vld [vmem:[#allocation34_spill] sm:$0xff] }
 0x59d   : > { %v6399_v37 = vpop.eup %6398  ;;  %v4220_v16 = vsel %vm9240_vm9, %v4217_v36, %v4214_v49  ;;  %v5128_v29 = vmul.f32 %v8877_v39, %v5127_v4  ;;  %vm9257_vm13 = vcmp.lt.f32.partialorder %v5129_v8, 0.0004427343  ;;  %v5237_v24 = vmul.f32 -0.5, %v9932_v47 }
 0x59e   : > { %v5125_v56 = vmul.f32 0.6931472, %v6399_v37  ;;  %5304 = vxpose.xlu0.b32.start.end [1/1] (short) (narrow) %v5296_v17, 8  ;;  %v4252_v11 = vadd.f32 %v4220_v16, %v4140_v33  ;;  %vm9262_vm12 = vcmp.lt.f32.partialorder %v5249_v22, 0.0004427343  ;;  %6406 = vlog2.f32 %v4630_v38  ;;  %v9953_v37 = vld [vmem:[#allocation60_spill] sm:$0xff] }
 0x59f   : > { %v5120_v31 = vand.u32 2147483647, %v9929_v9  ;;  %v5248_v39 = vmul.f32 %v9925_v42, %v5247_v25  ;;  %v5118_v50 = vadd.f32 1.0, %v5117_v6  ;;  %v4750_v12 = vadd.f32 1.0, %v9940_v30 }
 0x5a0   : > { %v6401_v60 = vpop.eup %6400  ;;  %v5131_v40 = vsel %vm9257_vm13, %v5128_v29, %v5125_v56  ;;  %v4260_v41 = vsub.f32 %v4132_v0, %v4252_v11  ;;  %v5240_v7 = vand.u32 2147483647, %v9932_v47  ;;  %v4633_v52 = vmul.f32 -0.5, %v9935_v18 }
 0x5a1   : > { %v5245_v14 = vmul.f32 0.6931472, %v6401_v60  ;;  %v5171_v19 = vadd.f32 %v5131_v40, %v5059_v48  ;;  %v5238_v20 = vadd.f32 1.0, %v5237_v24  ;;  %6408 = vlog2.f32 %v4750_v12  ;;  %v9955_v24 = vld [vmem:[#allocation58_spill] sm:$0xff]  ;;  %v9958_v40 = vld [vmem:[#allocation17_spill] sm:$0xff] }
 0x5a2   : > { %v4621_v57 = vadd.f32 1.0, %v9941_v1  ;;  %4392 = vxpose.xlu0.b32.start.end [1/1] (short) (narrow) %v4260_v41, 8  ;;  %v5058_v42 = vmax.f32 %v9942_v21, 0.0  ;;  %vm9277_vm14 = vcmp.lt.f32.partialorder %v5120_v31, 0.0004427343  ;;  %v5178_v27 = vmax.f32 %v9945_v59, 0.0 }
 0x5a3   : > { %v5251_v33 = vsel %vm9262_vm12, %v5248_v39, %v5245_v14  ;;  %v5119_v23 = vmul.f32 %v9929_v9, %v5118_v50  ;;  %v4636_v51 = vand.u32 2147483647, %v9935_v18  ;;  %v4542_v15 = vmax.f32 %v9946_v35, 0.0 }
 0x5a4   : > { %v6403_v28 = vpop.eup %6402  ;;  %v5291_v44 = vadd.f32 %v5251_v33, %v5179_v62  ;;  %6410 = vlog2.f32 %v4621_v57  ;;  %v4634_v10 = vadd.f32 1.0, %v4633_v52  ;;  %v4753_v45 = vmul.f32 -0.5, %v9940_v30  ;;  %v9954_v62 = vld [vmem:[#allocation19_spill] sm:$0xff] }
 0x5a5   : > { %v5116_v63 = vmul.f32 0.6931472, %v6403_v28  ;;  %v5239_v58 = vmul.f32 %v9932_v47, %v5238_v20  ;;  %vm9287_vm15 = vcmp.lt.f32.partialorder %v5240_v7, 0.0004427343  ;;  %v4741_v55 = vadd.f32 1.0, %v9949_v3  ;;  %v9959_v20 = vld [vmem:[#allocation45_spill] sm:$0xff] }
 0x5a6   : > { %v6405_v61 = vpop.eup %6404  ;;  %v5299_v26 = vsub.f32 %v5171_v19, %v5291_v44  ;;  %v4662_v17 = vmax.f32 %v9950_v5, 0.0  ;;  %v4624_v49 = vmul.f32 -0.5, %v9941_v1  ;;  %vm9296_vm10 = vcmp.lt.f32.partialorder %v4636_v51, 0.0004427343  ;;  %v9962_v44 = vld [vmem:[#allocation44_spill] sm:$0xff] }
 0x5a7   : > { %v5122_v9 = vsel %vm9277_vm14, %v5119_v23, %v5116_v63  ;;  %v5236_v4 = vmul.f32 0.6931472, %v6405_v61  ;;  %v4756_v47 = vand.u32 2147483647, %v9940_v30  ;;  %6412 = vlog2.f32 %v4741_v55  ;;  %v9963_v63 = vld [vmem:[#allocation14_spill] sm:$0xff] }
 0x5a8   : > { %5400 = vxpose.xlu1.b32.start.end [1/1] (short) (narrow) %v5299_v26, 8  ;;  %v5170_v36 = vadd.f32 %v5122_v9, %v5058_v42  ;;  %v6407_v34 = vpop.eup %6406  ;;  %v4635_v25 = vmul.f32 %v9935_v18, %v4634_v10  ;;  %v4754_v6 = vadd.f32 1.0, %v4753_v45  ;;  %v4119_v0 = vadd.f32 1.0, %v9953_v37 }
 0x5a9   : > { %v5242_v48 = vsel %vm9287_vm15, %v5239_v58, %v5236_v4  ;;  %v4632_v53 = vmul.f32 0.6931472, %v6407_v34  ;;  %v4541_v38 = vmax.f32 %v9954_v62, 0.0  ;;  %v4744_v56 = vmul.f32 -0.5, %v9949_v3  ;;  %v9968_v4 = vld [vmem:[#allocation16_spill] sm:$0xff]  ;;  %v9970_v34 = vld [vmem:[#allocation57_spill] sm:$0xff] }
 0x5aa   : > { %v5290_v16 = vadd.f32 %v5242_v48, %v5178_v27  ;;  %v4625_v29 = vadd.f32 1.0, %v4624_v49  ;;  %v4627_v32 = vand.u32 2147483647, %v9941_v1  ;;  %6414 = vlog2.f32 %v4119_v0  ;;  %v9981_v62 = vld [vmem:[#allocation38_spill] sm:$0xff] }
 0x5ab   : > { %v4239_v11 = vadd.f32 1.0, %v9955_v24  ;;  %v6409_v43 = vpop.eup %6408  ;;  %v4638_v18 = vsel %vm9296_vm10, %v4635_v25, %v4632_v53  ;;  %vm9311_vm7 = vcmp.lt.f32.partialorder %v4756_v47, 0.0004427343  ;;  %v4661_v39 = vmax.f32 %v9958_v40, 0.0 }
 0x5ac   : > { %v5298_v31 = vsub.f32 %v5170_v36, %v5290_v16  ;;  %v4752_v50 = vmul.f32 0.6931472, %v6409_v43  ;;  %v4755_v12 = vmul.f32 %v9940_v30, %v4754_v6  ;;  %v4122_v41 = vmul.f32 -0.5, %v9953_v37  ;;  %v9973_v43 = vld [vmem:[#allocation30_spill] sm:$0xff] }
 0x5ad   : > { %6416 = vlog2.f32 %v4239_v11  ;;  %v4654_v7 = vadd.f32 %v4638_v18, %v4542_v15  ;;  %v4745_v52 = vadd.f32 1.0, %v4744_v56  ;;  %v4747_v19 = vand.u32 2147483647, %v9949_v3  ;;  %v9982_v18 = vld [vmem:[#allocation61_spill] sm:$0xff] }
 0x5ae   : > { %v6411_v14 = vpop.eup %6410  ;;  %5368 = vxpose.xlu0.b32.start.end [1/1] (short) (narrow) %v5298_v31, 8  ;;  %v4110_v57 = vadd.f32 1.0, %v9959_v20  ;;  %v4758_v33 = vsel %vm9311_vm7, %v4755_v12, %v4752_v50  ;;  %v4626_v42 = vmul.f32 %v9941_v1, %v4625_v29  ;;  %v4242_v13 = vmul.f32 -0.5, %v9955_v24 }
 0x5af   : > { %v4623_v21 = vmul.f32 0.6931472, %v6411_v14  ;;  %v4774_v30 = vadd.f32 %v4758_v33, %v4662_v17  ;;  %vm9324_vm3 = vcmp.lt.f32.partialorder %v4627_v32, 0.0004427343  ;;  %v4125_v27 = vand.u32 2147483647, %v9953_v37 }
 0x5b0   : > { %6418 = vlog2.f32 %v4110_v57  ;;  %v4023_v23 = vmax.f32 %v9962_v44, 0.0  ;;  %v4123_v51 = vadd.f32 1.0, %v4122_v41  ;;  %v4230_v35 = vadd.f32 1.0, %v9963_v63  ;;  %v9977_v41 = vld [vmem:[#allocation15_spill] sm:$0xff] }
 0x5b1   : > { %v4629_v28 = vsel %vm9324_vm3, %v4626_v42, %v4623_v21  ;;  %v6413_v15 = vpop.eup %6412  ;;  %v4782_v1 = vsub.f32 %v4654_v7, %v4774_v30  ;;  %v4746_v10 = vmul.f32 %v9949_v3, %v4745_v52  ;;  %vm9334_vm6 = vcmp.lt.f32.partialorder %v4747_v19, 0.0004427343  ;;  %v9969_v3 = vld [vmem:[#allocation59_spill] sm:$0xff]  ;;  %v9978_v42 = vld [vmem:[#allocation41_spill] sm:$0xff] }
 0x5b2   : > { %v4245_v61 = vand.u32 2147483647, %v9955_v24  ;;  %v4743_v26 = vmul.f32 0.6931472, %v6413_v15  ;;  %v4243_v58 = vadd.f32 1.0, %v4242_v13  ;;  %v4113_v8 = vmul.f32 -0.5, %v9959_v20 }
 0x5b3   : > { %6420 = vlog2.f32 %v4230_v35  ;;  %4976 = vxpose.xlu1.b32.start.end [1/1] (short) (narrow) %v4782_v1, 8  ;;  %v4653_v55 = vadd.f32 %v4629_v28, %v4541_v38  ;;  %vm9340_vm11 = vcmp.lt.f32.partialorder %v4125_v27, 0.0004427343  ;;  %v4143_v5 = vmax.f32 %v9968_v4, 0.0  ;;  %v9979_v28 = vld [vmem:[#allocation43_spill] sm:$0xff] }
 0x5b4   : > { %v5141_v17 = vadd.f32 1.0, %v9969_v3  ;;  %v6415_v49 = vpop.eup %6414  ;;  %v4749_v36 = vsel %vm9334_vm6, %v4746_v10, %v4743_v26  ;;  %v4124_v22 = vmul.f32 %v9953_v37, %v4123_v51  ;;  %v4116_v47 = vand.u32 2147483647, %v9959_v20 }
 0x5b5   : > { %v5261_v48 = vadd.f32 1.0, %v9970_v34  ;;  %v4773_v25 = vadd.f32 %v4749_v36, %v4661_v39  ;;  %v4121_v6 = vmul.f32 0.6931472, %v6415_v49  ;;  %v4233_v0 = vmul.f32 -0.5, %v9963_v63 }
 0x5b6   : > { %6422 = vlog2.f32 %v5141_v17  ;;  %v4244_v53 = vmul.f32 %v9955_v24, %v4243_v58  ;;  %vm9353_vm9 = vcmp.lt.f32.partialorder %v4245_v61, 0.0004427343  ;;  %v4114_v38 = vadd.f32 1.0, %v4113_v8  ;;  %v9976_v24 = vld [vmem:[#allocation40_spill] sm:$0xff] }
 0x5b7   : > { %v6417_v16 = vpop.eup %6416  ;;  %6424 = vlog2.f32 %v5261_v48  ;;  %v4781_v56 = vsub.f32 %v4653_v55, %v4773_v25  ;;  %v4127_v37 = vsel %vm9340_vm11, %v4124_v22, %v4121_v6  ;;  %v5144_v32 = vmul.f32 -0.5, %v9969_v3  ;;  %v9980_v58 = vld [vmem:[#allocation20_spill] sm:$0xff] }
 0x5b8   : > { %v4241_v29 = vmul.f32 0.6931472, %v6417_v16  ;;  %v4135_v11 = vadd.f32 %v4127_v37, %v4023_v23  ;;  %v4022_v31 = vmax.f32 %v9973_v43, 0.0  ;;  %vm9361_vm13 = vcmp.lt.f32.partialorder %v4116_v47, 0.0004427343 }
 0x5b9   : > { %v4142_v60 = vmax.f32 %v9976_v24, 0.0  ;;  %4944 = vxpose.xlu0.b32.start.end [1/1] (short) (narrow) %v4781_v56, 8  ;;  %v4234_v50 = vadd.f32 1.0, %v4233_v0  ;;  %v5264_v12 = vmul.f32 -0.5, %v9970_v34  ;;  %v5132_v14 = vadd.f32 1.0, %v9977_v41 }
 0x5ba   : > { %v6419_v40 = vpop.eup %6418  ;;  %v4247_v39 = vsel %vm9353_vm9, %v4244_v53, %v4241_v29  ;;  %v4115_v19 = vmul.f32 %v9959_v20, %v4114_v38  ;;  %v4236_v57 = vand.u32 2147483647, %v9963_v63  ;;  %v5145_v33 = vadd.f32 1.0, %v5144_v32 }
 0x5bb   : > { %v4255_v7 = vadd.f32 %v4247_v39, %v4143_v5  ;;  %v4112_v52 = vmul.f32 0.6931472, %v6419_v40  ;;  %v5147_v21 = vand.u32 2147483647, %v9969_v3  ;;  %6426 = vlog2.f32 %v5132_v14  ;;  %v9983_v40 = vld [vmem:[#allocation31_spill] sm:$0xff] }
 0x5bc   : > { %v5252_v13 = vadd.f32 1.0, %v9978_v42  ;;  %v5061_v44 = vmax.f32 %v9979_v28, 0.0  ;;  %v5267_v23 = vand.u32 2147483647, %v9970_v34  ;;  %v4235_v20 = vmul.f32 %v9963_v63, %v4234_v50  ;;  %v9985_v28 = vld [vmem:[#allocation51_spill] sm:$0xff] }
 0x5bd   : > { %v6421_v30 = vpop.eup %6420  ;;  %v4263_v59 = vsub.f32 %v4135_v11, %v4255_v7  ;;  %v4118_v27 = vsel %vm9361_vm13, %v4115_v19, %v4112_v52  ;;  %v5265_v35 = vadd.f32 1.0, %v5264_v12  ;;  %vm4237_vm12 = vcmp.lt.f32.partialorder %v4236_v57, 0.0004427343  ;;  %v9984_v19 = vld [vmem:[#allocation53_spill] sm:$0xff] }
 0x5be   : > { %v4232_v51 = vmul.f32 0.6931472, %v6421_v30  ;;  %6428 = vlog2.f32 %v5252_v13  ;;  %v4134_v15 = vadd.f32 %v4118_v27, %v4022_v31  ;;  %v5135_v1 = vmul.f32 -0.5, %v9977_v41 }
 0x5bf   : > { %4488 = vxpose.xlu1.b32.start.end [1/1] (short) (narrow) %v4263_v59, 8  ;;  %v5159_v10 = vadd.f32 1.0, %v9005_v54  ;;  %v5146_v26 = vmul.f32 %v9969_v3, %v5145_v33  ;;  %vm5148_vm14 = vcmp.lt.f32.partialorder %v5147_v21, 0.0004427343  ;;  %v5181_v8 = vmax.f32 %v9980_v58, 0.0  ;;  %v9987_v58 = vld [vmem:[#allocation48_spill] sm:$0xff] }
 0x5c0   : > { %v6423_v45 = vpop.eup %6422  ;;  %v4238_v61 = vsel %vm4237_vm12, %v4235_v20, %v4232_v51  ;;  %vm5268_vm15 = vcmp.lt.f32.partialorder %v5267_v23, 0.0004427343  ;;  %v5255_v63 = vmul.f32 -0.5, %v9978_v42  ;;  %v5266_v17 = vmul.f32 %v9970_v34, %v5265_v35  ;;  %v9986_v20 = vld [vmem:[#allocation52_spill] sm:$0xff] }
 0x5c1   : > { %v6425_v55 = vpop.eup %6424  ;;  %v4254_v9 = vadd.f32 %v4238_v61, %v4142_v60  ;;  %v5143_v4 = vmul.f32 0.6931472, %v6423_v45  ;;  %v5138_v49 = vand.u32 2147483647, %v9977_v41  ;;  %6430 = vlog2.f32 %v5159_v10 }
 0x5c2   : > { %v5263_v5 = vmul.f32 0.6931472, %v6425_v55  ;;  %v5136_v47 = vadd.f32 1.0, %v5135_v1  ;;  %v5279_v3 = vadd.f32 1.0, %v8951_v2  ;;  %v5162_v6 = vmul.f32 -0.5, %v9005_v54 }
 0x5c3   : > { %v4262_v36 = vsub.f32 %v4134_v15, %v4254_v9  ;;  %v5149_v22 = vsel %vm5148_vm14, %v5146_v26, %v5143_v4  ;;  %v5256_v16 = vadd.f32 1.0, %v5255_v63  ;;  %v5060_v38 = vmax.f32 %v9981_v62, 0.0  ;;  %v9989_v62 = vld [vmem:[#allocation46_spill] sm:$0xff] }
 0x5c4   : > { %v5173_v48 = vadd.f32 %v5149_v22, %v5061_v44  ;;  %v5269_v25 = vsel %vm5268_vm15, %v5266_v17, %v5263_v5  ;;  %6432 = vlog2.f32 %v5279_v3  ;;  %v5258_v34 = vand.u32 2147483647, %v9978_v42  ;;  %v9988_v22 = vld [vmem:[#allocation50_spill] sm:$0xff] }
 0x5c5   : > { %4456 = vxpose.xlu0.b32.start.end [1/1] (short) (narrow) %v4262_v36, 8  ;;  %v5293_v0 = vadd.f32 %v5269_v25, %v5181_v8  ;;  %v6427_v53 = vpop.eup %6426  ;;  %v4639_v56 = vadd.f32 1.0, %v8957_v46  ;;  %v5137_v32 = vmul.f32 %v9977_v41, %v5136_v47  ;;  %vm5139_vm10 = vcmp.lt.f32.partialorder %v5138_v49, 0.0004427343 }
 0x5c6   : > { %v5134_v29 = vmul.f32 0.6931472, %v6427_v53  ;;  %v5163_v43 = vadd.f32 1.0, %v5162_v6  ;;  %v5282_v31 = vmul.f32 -0.5, %v8951_v2  ;;  %v4759_v24 = vadd.f32 1.0, %v9982_v18 }
 0x5c7   : > { %v5301_v37 = vsub.f32 %v5173_v48, %v5293_v0  ;;  %6434 = vlog2.f32 %v4639_v56  ;;  %v5180_v39 = vmax.f32 %v9983_v40, 0.0  ;;  %v5257_v12 = vmul.f32 %v9978_v42, %v5256_v16 }
 0x5c8   : > { %v6429_v11 = vpop.eup %6428  ;;  %v5140_v60 = vsel %vm5139_vm10, %v5137_v32, %v5134_v29  ;;  %vm5259_vm7 = vcmp.lt.f32.partialorder %v5258_v34, 0.0004427343  ;;  %v5165_v7 = vand.u32 2147483647, %v9005_v54  ;;  %6436 = vlog2.f32 %v4759_v24 }
 0x5c9   : > { %5464 = vxpose.xlu1.b32.start.end [1/1] (short) (narrow) %v5301_v37, 8  ;;  %v5254_v50 = vmul.f32 0.6931472, %v6429_v11  ;;  %v5172_v14 = vadd.f32 %v5140_v60, %v5060_v38  ;;  %v4642_v52 = vmul.f32 -0.5, %v8957_v46  ;;  %v5150_v57 = vadd.f32 1.0, %v9984_v19 }
 0x5ca   : > { %v5164_v13 = vmul.f32 %v9005_v54, %v5163_v43  ;;  %v5283_v30 = vadd.f32 1.0, %v5282_v31  ;;  %v5285_v59 = vand.u32 2147483647, %v8951_v2  ;;  %v4762_v42 = vmul.f32 -0.5, %v9982_v18  ;;  %v9990_v31 = vld [vmem:[#allocation37_spill] sm:$0xff] }
 0x5cb   : > { %v5260_v41 = vsel %vm5259_vm7, %v5257_v12, %v5254_v50  ;;  %v6431_v33 = vpop.eup %6430  ;;  %6438 = vlog2.f32 %v5150_v57  ;;  %v5270_v44 = vadd.f32 1.0, %v9985_v28  ;;  %vm5166_vm3 = vcmp.lt.f32.partialorder %v5165_v7, 0.0004427343  ;;  %v9991_v12 = vld [vmem:[#allocation29_spill] sm:$0xff] }
 0x5cc   : > { %v5292_v21 = vadd.f32 %v5260_v41, %v5180_v39  ;;  %v5161_v27 = vmul.f32 0.6931472, %v6431_v33  ;;  %v5063_v35 = vmax.f32 %v9986_v20, 0.0  ;;  %v4643_v1 = vadd.f32 1.0, %v4642_v52 }
 0x5cd   : > { %6440 = vlog2.f32 %v5270_v44  ;;  %v5284_v54 = vmul.f32 %v8951_v2, %v5283_v30  ;;  %v4645_v45 = vand.u32 2147483647, %v8957_v46  ;;  %v5153_v61 = vmul.f32 -0.5, %v9984_v19  ;;  %v9992_v44 = vld [vmem:[#allocation26_spill] sm:$0xff] }
 0x5ce   : > { %v5300_v23 = vsub.f32 %v5172_v14, %v5292_v21  ;;  %v6433_v51 = vpop.eup %6432  ;;  %v5167_v15 = vsel %vm5166_vm3, %v5164_v13, %v5161_v27  ;;  %v5183_v8 = vmax.f32 %v9987_v58, 0.0  ;;  %vm5286_vm6 = vcmp.lt.f32.partialorder %v5285_v59, 0.0004427343 }
 0x5cf   : > { %v5281_v10 = vmul.f32 0.6931472, %v6433_v51  ;;  %v5175_v26 = vadd.f32 %v5167_v15, %v5063_v35  ;;  %v4763_v55 = vadd.f32 1.0, %v4762_v42  ;;  %v4765_v63 = vand.u32 2147483647, %v9982_v18 }
 0x5d0   : > { %5432 = vxpose.xlu0.b32.start.end [1/1] (short) (narrow) %v5300_v23, 8  ;;  %v5273_v5 = vmul.f32 -0.5, %v9985_v28  ;;  %v4644_v36 = vmul.f32 %v8957_v46, %v4643_v1  ;;  %v4543_v47 = vmax.f32 %v9988_v22, 0.0  ;;  %vm4646_vm11 = vcmp.lt.f32.partialorder %v4645_v45, 0.0004427343 }
 0x5d1   : > { %v6435_v9 = vpop.eup %6434  ;;  %v5287_v4 = vsel %vm5286_vm6, %v5284_v54, %v5281_v10  ;;  %v5154_v3 = vadd.f32 1.0, %v5153_v61  ;;  %v5156_v48 = vand.u32 2147483647, %v9984_v19  ;;  %v4764_v16 = vmul.f32 %v9982_v18, %v4763_v55  ;;  %v9994_v54 = vld [vmem:[#allocation23_spill] sm:$0xff] }
 0x5d2   : > { %v5295_v17 = vadd.f32 %v5287_v4, %v5183_v8  ;;  %v4641_v49 = vmul.f32 0.6931472, %v6435_v9  ;;  %v6437_v2 = vpop.eup %6436  ;;  %v4663_v38 = vmax.f32 %v9989_v62, 0.0  ;;  %vm4766_vm9 = vcmp.lt.f32.partialorder %v4765_v63, 0.0004427343  ;;  %v9996_v4 = vld [vmem:[#allocation24_spill] sm:$0xff] }
 0x5d3   : > { %v4761_v0 = vmul.f32 0.6931472, %v6437_v2  ;;  %v5274_v34 = vadd.f32 1.0, %v5273_v5  ;;  %v5276_v37 = vand.u32 2147483647, %v9985_v28  ;;  %v5155_v11 = vmul.f32 %v9984_v19, %v5154_v3  ;;  %v9998_v2 = vld [vmem:[#allocation25_spill] sm:$0xff] }
 0x5d4   : > { %v5303_v25 = vsub.f32 %v5175_v26, %v5295_v17  ;;  %v4647_v6 = vsel %vm4646_vm11, %v4644_v36, %v4641_v49  ;;  %v5062_v24 = vmax.f32 %v9990_v31, 0.0  ;;  %vm5157_vm13 = vcmp.lt.f32.partialorder %v5156_v48, 0.0004427343  ;;  %v10000_v62 = vld [vmem:[#allocation22_spill] sm:$0xff] }
 0x5d5   : > { %v4655_v53 = vadd.f32 %v4647_v6, %v4543_v47  ;;  %v6439_v56 = vpop.eup %6438  ;;  %v4767_v46 = vsel %vm4766_vm9, %v4764_v16, %v4761_v0  ;;  %v5275_v39 = vmul.f32 %v9985_v28, %v5274_v34  ;;  %v5182_v14 = vmax.f32 %v9991_v12, 0.0 }
 0x5d6   : > { %5528 = vxpose.xlu1.b32.start.end [1/1] (short) (narrow) %v5303_v25, 8  ;;  %v4775_v29 = vadd.f32 %v4767_v46, %v4663_v38  ;;  %v5152_v32 = vmul.f32 0.6931472, %v6439_v56  ;;  %vm5277_vm12 = vcmp.lt.f32.partialorder %v5276_v37, 0.0004427343  ;;  %vm9993_vm14 = vcmask 64512  }
 0x5d7   : > { %v6441_v43 = vpop.eup %6440  ;;  %vm9995_vm15 = vmmov %vm9993_vm14 }
 0x5d8   : > { %v4783_v60 = vsub.f32 %v4655_v53, %v4775_v29  ;;  %v5158_v18 = vsel %vm5157_vm13, %v5155_v11, %v5152_v32  ;;  %v5272_v40 = vmul.f32 0.6931472, %v6441_v43  ;;  %v4312_v57 = vpop.trf.xlu1  ;;  %vm9997_vm10 = vmmov %vm9993_vm14  ;;  %v10002_v29 = vld [vmem:[#allocation21_spill] sm:$0xff] }
 0x5d9   : > { %v5174_v50 = vadd.f32 %v5158_v18, %v5062_v24  ;;  %vm9999_vm7 = vmmov %vm9997_vm10 }
 0x5da   : > { %5008 = vxpose.xlu0.b32.start.end [1/1] (short) (narrow) %v4783_v60, 8  ;;  %v5278_v7 = vsel %vm5277_vm12, %v5275_v39, %v5272_v40  ;;  %v4280_v19 = vpop.trf.xlu0  ;;  %vm10001_vm3 = vmmov %vm9999_vm7  ;;  %v10004_v40 = vld [vmem:[#allocation12_spill] sm:$0xff] }
 0x5db   : > { %v5294_v41 = vadd.f32 %v5278_v7, %v5182_v14  ;;  %vm10003_vm6 = vmmov %vm10001_vm3  ;;  %v10006_v7 = vld [vmem:[#allocation27_spill] sm:$0xff] }
 0x5dc   : > { %vm10005_vm11 = vmmov %vm10001_vm3 }
 0x5dd   : > { %v5302_v52 = vsub.f32 %v5174_v50, %v5294_v41  ;;  %vm10007_vm9 = vmmov %vm10001_vm3 }
 0x5df   : > { %5496 = vxpose.xlu0.b32.start.end [1/1] (short) (narrow) %v5302_v52, 8 }
 0x5ed   : > { %v4800_v21 = vpop.trf.xlu0 }
 0x5ee   : > { %v5560_v15 = vadd.f32 %v4800_v21, %v4280_v19  ;;  %v10008_v21 = vld [vmem:[#allocation28_spill] sm:$0xff] }
 0x5f0   : > { %v4864_v33 = vpop.trf.xlu1 }
 0x5f6   : > { %v4832_v30 = vpop.trf.xlu0 }
 0x5f7   : > { %v5561_v59 = vadd.f32 %v4832_v30, %v4312_v57 }
 0x5fe   : > { %v4896_v13 = vpop.trf.xlu1 }
 0x604   : > { %v4344_v51 = vpop.trf.xlu0 }
 0x605   : > { %v5562_v5 = vadd.f32 %v4864_v33, %v4344_v51 }
 0x60c   : > { %v5352_v27 = vpop.trf.xlu1 }
 0x60d   : > { %v5569_v42 = vadd.f32 %v5561_v59, %v5352_v27 }
 0x60f   : > { %v5577_v28 = vmul.f32 %v5569_v42, %v9992_v44 }
 0x611   : > { %v5587_v23 = vsel %vm9993_vm14, %v5577_v28, 0.0 }
 0x612   : > { %5588 = vadd.xlane.f32.xlu1 %v5587_v23 }
 0x613   : > { %v4928_v35 = vpop.trf.xlu1 }
 0x619   : > { %v4440_v61 = vpop.trf.xlu1 }
 0x61a   : > { %v4376_v20 = vpop.trf.xlu0 }
 0x61b   : > { %v5563_v58 = vadd.f32 %v4896_v13, %v4376_v20 }
 0x61e   : > { %v5320_v1 = vpop.trf.xlu0 }
 0x61f   : > { %v5568_v10 = vadd.f32 %v5560_v15, %v5320_v1 }
 0x621   : > { %v5576_v45 = vmul.f32 %v5568_v10, %v9994_v54 }
 0x622   : > { %v4408_v8 = vpop.trf.xlu0 }
 0x623   : > { %v5584_v26 = vsel %vm9995_vm15, %v5576_v45, 0.0  ;;  %v5564_v56 = vadd.f32 %v4928_v35, %v4408_v8 }
 0x624   : > { %5585 = vadd.xlane.f32.xlu0 %v5584_v26 }
 0x628   : > { %v5416_v55 = vpop.trf.xlu1 }
 0x629   : > { %v5571_v9 = vadd.f32 %v5563_v58, %v5416_v55  ;;  %v6492_v55 = vld [vmem:[%s7811_s7] sm:$0xff] }
 0x62b   : > { %v5579_v63 = vmul.f32 %v5571_v9, %v9996_v4 }
 0x62d   : > { %v5593_v17 = vsel %vm9997_vm10, %v5579_v63, 0.0 }
 0x62e   : > { %v5384_v49 = vpop.trf.xlu0  ;;  %5594 = vadd.xlane.f32.xlu0 %v5593_v17 }
 0x62f   : > { %v5570_v36 = vadd.f32 %v5562_v5, %v5384_v49 }
 0x631   : > { %v5578_v22 = vmul.f32 %v5570_v36, %v9998_v2 }
 0x633   : > { %v5590_v47 = vsel %vm9999_vm7, %v5578_v22, 0.0  ;;  %v4992_v3 = vpop.trf.xlu1 }
 0x634   : > { %5591 = vadd.xlane.f32.xlu1 %v5590_v47 }
 0x639   : > { %v4960_v25 = vpop.trf.xlu0 }
 0x63a   : > { %v5565_v6 = vadd.f32 %v4960_v25, %v4440_v61 }
 0x63f   : > { %v4504_v48 = vpop.trf.xlu1 }
 0x645   : > { %v4472_v16 = vpop.trf.xlu0 }
 0x646   : > { %v5566_v18 = vadd.f32 %v4992_v3, %v4472_v16 }
 0x649   : > { %v5480_v0 = vpop.trf.xlu1 }
 0x64a   : > { %v5573_v53 = vadd.f32 %v5565_v6, %v5480_v0 }
 0x64c   : > { %v5581_v38 = vmul.f32 %v5573_v53, %v10000_v62 }
 0x64e   : > { %v5599_v34 = vsel %vm10001_vm3, %v5581_v38, 0.0 }
 0x64f   : > { %5600 = vadd.xlane.f32.xlu0 %v5599_v34 }
 0x650   : > { %v5448_v46 = vpop.trf.xlu0 }
 0x651   : > { %v5572_v37 = vadd.f32 %v5564_v56, %v5448_v46 }
 0x653   : > { %v5580_v32 = vmul.f32 %v5572_v37, %v10002_v29 }
 0x655   : > { %v5596_v11 = vsel %vm10003_vm6, %v5580_v32, 0.0 }
 0x656   : > { %5597 = vadd.xlane.f32.xlu1 %v5596_v11  ;;  %v5544_v31 = vpop.trf.xlu1 }
 0x65a   : > { %v5024_v43 = vpop.trf.xlu0 }
 0x65b   : > { %v5567_v24 = vadd.f32 %v5024_v43, %v4504_v48 }
 0x65d   : > { %v5575_v60 = vadd.f32 %v5567_v24, %v5544_v31 }
 0x65f   : > { %v5583_v39 = vmul.f32 %v5575_v60, %v10004_v40  ;;  %v5512_v50 = vpop.trf.xlu0 }
 0x660   : > { %v5574_v12 = vadd.f32 %v5566_v18, %v5512_v50 }
 0x661   : > { %v5605_v14 = vsel %vm10005_vm11, %v5583_v39, 0.0 }
 0x662   : > { %v5582_v41 = vmul.f32 %v5574_v12, %v10006_v7  ;;  %5606 = vadd.xlane.f32.xlu0 %v5605_v14 }
 0x664   : > { %v5602_v52 = vsel %vm10007_vm9, %v5582_v41, 0.0 }
 0x665   : > { %5603 = vadd.xlane.f32.xlu1 %v5602_v52 }
 0x69f   : > { %v5589_v57 = vpop.xlane.xlu1 %5588 }
 0x6a0   : > { %v5623_v27 = vrot.slane %v5589_v57, %v10008_v21 }
 0x6b1   : > { %v5586_v19 = vpop.xlane.xlu0 %5585 }
 0x6b2   : > { %v5619_v13 = vrot.slane %v5586_v19, %v10008_v21 }
 0x6b4   : > { %v5648_v44 = vsel %vm424_vm0, %v5623_v27, %v5619_v13  ;;  %vm10009_vm0 = vcmask 1045509  }
 0x6bb   : > { %v5595_v30 = vpop.xlane.xlu0 %5594 }
 0x6bc   : > { %v5631_v20 = vrot.slane %v5595_v30, %v10008_v21 }
 0x6c1   : > { %v5592_v33 = vpop.xlane.xlu1 %5591 }
 0x6c2   : > { %v5627_v59 = vrot.slane %v5592_v33, %v10008_v21 }
 0x6c4   : > { %v5649_v28 = vsel %vm427_vm1, %v5627_v59, %v5648_v44 }
 0x6c5   : > { %v5650_v35 = vsel %vm430_vm8, %v5631_v20, %v5649_v28 }
 0x6dc   : > { %v5601_v23 = vpop.xlane.xlu0 %5600 }
 0x6dd   : > { %v5639_v10 = vrot.slane %v5601_v23, %v10008_v21 }
 0x6e3   : > { %v5598_v42 = vpop.xlane.xlu1 %5597 }
 0x6e4   : > { %v5635_v51 = vrot.slane %v5598_v42, %v10008_v21 }
 0x6e6   : > { %v5651_v15 = vsel %vm433_vm2, %v5635_v51, %v5650_v35  ;;  %vm10010_vm2 = vmmov %vm10001_vm3 }
 0x6e7   : > { %v5652_v26 = vsel %vm10009_vm0, %v5639_v10, %v5651_v15 }
 0x6ef   : > { %v5607_v1 = vpop.xlane.xlu0 %5606 }
 0x6f0   : > { %v5647_v61 = vrot.slane %v5607_v1, %v10008_v21 }
 0x6f2   : > { %v5604_v54 = vpop.xlane.xlu1 %5603 }
 0x6f3   : > { %v5643_v45 = vrot.slane %v5604_v54, %v10008_v21 }
 0x6f5   : > { %v5653_v58 = vsel %vm439_vm4, %v5643_v45, %v5652_v26  ;;  %vm10011_vm4 = vmmov %vm10010_vm2 }
 0x6f6   : > { %v5654_v8 = vsel %vm442_vm5, %v5647_v61, %v5653_v58 }
 0x6f7   : > { %v5656_v9 = vadd.f32 %v6492_v55, %v5654_v8 }
 0x6f9   : > { %v5657_v4 = vand.u32 2147483647, %v5656_v9  ;;  %vm5665_vm1 = vcmp.ge.f32.partialorder %v5656_v9, 0.0 }
 0x6fb   : > { %v5658_v63 = vsub.f32 0.0, %v5657_v4 }
 0x6fd   : > { %v5659_v5 = vmul.f32 1.442695, %v5658_v63 }
 0x6ff   : > { %6442 = vpow2.f32 %v5659_v5 }
 0x709   : > { %v6443_v17 = vpop.eup %6442 }
 0x70a   : > { %v5661_v49 = vadd.f32 1.0, %v6443_v17 }
 0x70c   : > { %6444 = vrcp.f32 %v5661_v49 }
 0x716   : > { %v6445_v36 = vpop.eup %6444 }
 0x717   : > { %v5664_v2 = vmul.f32 %v6445_v36, %v6443_v17 }
 0x719   : > { %v5666_v22 = vsel %vm5665_vm1, %v6445_v36, %v5664_v2  ;;  %v5667_v47 = vsel %vm5665_vm1, %v5664_v2, %v6445_v36 }
 0x71a   : > { %5668 = vst.msk [vmem:[%s406_s17] sm:$0xff] %vm10010_vm2, %v5667_v47 }
 0x71b   : > { %5886 = vst.msk [vmem:[%s406_s17 + $0x8] sm:$0xff] %vm10011_vm4, %v5666_v22 }
 0x71c PF: > { %s21_s23 = sadd.s32 1, %s6637_s23   ;;  %s10012_s18 = smov %s6621_s19 }
 0x71d   : > { %p18_p2 = scmp.ge.s32.totalorder %s21_s23, 4   ;;  %s10013_s19 = smov %s6625_s20 }
 0x71e   : > { %s10014_s20 = smov %s6723_s29  ;;  %s10015_s21 = smov %s6633_s22 }
 0x71f   : > { %s10016_s22 = smov %s10018_s25  ;;  %20 = sbr.rel (!%p18_p2) target bundleno = 8 (0x8), region = 132 }
 0x726   :  { %5698 = vsyncpa [#allocation6], 1 }
 0x727   :  { %5700 = vsyncpa [#allocation6 + $0x1], 1 }
 0x728   :  { %5701 = vsyncpa [#allocation8], 1 }
 0x729   :  { %5703 = vsyncpa [#allocation8 + $0x1], 1 }

</bundles_post_ra>
